<compile_context>
chip_gen: v6e
topology: v6e:2x2x1
jax: 0.10.0
libtpu: 0.0.40
codegen_flags: <defaults>
</compile_context>

<pallas_src>
from functools import partial

import jax
import jax.numpy as jnp
from jax.experimental import pallas as pl
from jax.experimental.pallas import tpu as pltpu

# ----------------------------- static sizes ---------------------------------
B, L = 64, 60         # test batch (original bsize=384), vertical levels
BC = 32               # batch chunk per grid step (BC*L = 1920 = 15*128 lanes)
NX, NS = 9, 17        # main / surface feature counts
NH = 16               # rnn hidden size (matches rnn1_mem last dim)
NOL, NOS = 5, 8       # out_lev vars per level (60*5=300), out_sfc size

DQ_SCALE = 0.0008333333333333334  # exact constant from the PyTorch module
TOK_ROWS = 2 + 2 * NX + 2 * NOL   # 30 per-level parameter rows


# ------------------------------- kernel -------------------------------------
def newmodel_kernel(x_fm_ref, xs_ref, mem_fm_ref,
                    tok_ref, gw_ref, hw_ref, bh_ref, sca_ref,
                    lev_ref, sfc_ref, mem_out_ref):
    nx = x_fm_ref.shape[0]          # 9
    nh = mem_fm_ref.shape[0]        # 16
    bc = xs_ref.shape[0]            # batch chunk
    bl = x_fm_ref.shape[1]          # bc * L tokens (lane axis)
    lvl = bl // bc                  # levels

    x_fm = x_fm_ref[...]            # (NX, bl)  raw main inputs, feature-major
    xs = xs_ref[...]                # (bc, NS)  raw surface inputs, batch-major
    mem_fm = mem_fm_ref[...]        # (NH, bl)  rnn memory, feature-major

    # ---- per-level parameter blob (resident across grid steps) ----
    tok = tok_ref[...]                                   # (30, bl)
    lbd_qc = tok[0:1, :]
    lbd_qi = tok[1:2, :]
    xmean = tok[2:2 + nx, :]                             # (NX, bl)
    inv_xdiv = tok[2 + nx:2 + 2 * nx, :]                 # (NX, bl)
    inv_yslev = tok[2 + 2 * nx:2 + 2 * nx + NOL, :]      # (NOL, bl)  1/yscale_lev
    blev_scaled = tok[2 + 2 * nx + NOL:, :]              # (NOL, bl)  b_lev/yscale_lev

    gw = gw_ref[...]                                     # (NH, NH+NX+NS)
    w_hh_T = gw[:, 0:nh]                                 # (NH, NH)
    w_xm_T = gw[:, nh:nh + nx]                           # (NH, NX)
    w_xs_T = gw[:, nh + nx:]                             # (NH, NS)

    hw = hw_ref[...]                                     # (NOL+NOS, NH)
    w_lev_T = hw[0:NOL, :]                               # (NOL, NH)
    w_sfc_T = hw[NOL:, :]                                # (NOS, NH)

    b_h_col = bh_ref[...]                                # (NH, 1)

    sca = sca_ref[...]                                   # (4, NS)
    xmean_sca = sca[0:1, :]                              # (1, NS)
    inv_xdiv_sca = sca[1:2, :]                           # (1, NS)
    b_sfc_row = sca[2:3, 0:NOS]                          # (1, NOS)
    inv_ysca_row = sca[3:4, 0:NOS]                       # (1, NOS)

    # ---- saved raw rows (pre-normalization) ----
    T_before = x_fm[0:1, :]
    qliq_before = x_fm[2:3, :]
    qice_before = x_fm[3:4, :]
    qn_before = qliq_before + qice_before

    # ---- preprocessing (feature-major); exp only on the two q rows ----
    qc_t = 1.0 - jnp.exp(-qliq_before * lbd_qc)          # (1, bl)
    qi_t = 1.0 - jnp.exp(-qice_before * lbd_qi)          # (1, bl)
    rix = jax.lax.broadcasted_iota(jnp.int32, (nx, bl), 0)
    x_mod = jnp.where(rix == 2, qc_t, jnp.where(rix == 3, qi_t, x_fm))
    xn = (x_mod - xmean) * inv_xdiv
    xn = jnp.where(jnp.isnan(xn), 0.0, xn)               # (NX, bl)

    xs_n = (xs - xmean_sca) * inv_xdiv_sca               # (bc, NS)

    # ---- 0/1 batch->token matrix built in-kernel (no HBM traffic) ----
    row_i = jax.lax.broadcasted_iota(jnp.int32, (bc, bl), 0)
    lane_i = jax.lax.broadcasted_iota(jnp.int32, (bc, bl), 1)
    diff = lane_i - row_i * lvl
    E = jnp.where(jnp.logical_and(diff >= 0, diff < lvl), 1.0, 0.0)   # (bc, bl) f32

    # ---- synthetic original_model: per-level tanh RNN cell ----
    # surface term + hidden bias, then broadcast to tokens via E on the MXU
    s_bT = jax.lax.dot_general(w_xs_T, xs_n, (((1,), (1,)), ((), ())),
                               preferred_element_type=jnp.float32) + b_h_col   # (NH, bc)
    s_tok = jnp.dot(s_bT, E, preferred_element_type=jnp.float32)               # (NH, bl)

    z = (jnp.dot(w_hh_T, mem_fm, preferred_element_type=jnp.float32)
         + jnp.dot(w_xm_T, xn, preferred_element_type=jnp.float32)
         + s_tok)
    h_fm = jnp.tanh(z)                                   # (NH, bl)
    mem_out_ref[...] = h_fm                              # lane-dense store of new memory

    # out_lev head, de-scaled via precomputed reciprocals (b_lev folded in)
    olev = (jnp.dot(w_lev_T, h_fm, preferred_element_type=jnp.float32) * inv_yslev
            + blev_scaled)                               # (NOL, bl)

    # out_sfc head: per-batch mean over levels as a matmul with E (MXU)
    hmean = jax.lax.dot_general(E, h_fm, (((1,), (1,)), ((), ())),
                                preferred_element_type=jnp.float32) * (1.0 / lvl)  # (bc, NH)
    osfc = jax.lax.dot_general(hmean, w_sfc_T, (((1,), (1,)), ((), ())),
                               preferred_element_type=jnp.float32)                 # (bc, NOS)
    sfc_ref[...] = (osfc + b_sfc_row) * inv_ysca_row

    # ---- postprocessing (feature-major rows) ----
    T_new = T_before + olev[0:1, :] * 1200.0
    liq = jnp.clip((T_new - 253.16) * 0.05, 0.0, 1.0)    # Hardtanh(0, 1)
    qn_new = qn_before + olev[2:3, :] * 1200.0
    dqliq = (liq * qn_new - qliq_before) * DQ_SCALE
    dqice = ((1.0 - liq) * qn_new - qice_before) * DQ_SCALE

    # ---- lane-dense output rows (full-lane-width stores only) ----
    lev_ref[0:2, :] = olev[0:2, :]
    lev_ref[2:3, :] = dqliq
    lev_ref[3:4, :] = dqice
    lev_ref[4:6, :] = olev[3:5, :]


# --------------------------- parameter preparation ----------------------------
def prepare_params(p, chunk):
    """One-time consolidation of the tiny parameter arrays into 5 blobs
    (feature-major, reciprocals precomputed, weights pre-transposed)."""
    per_lev = jnp.concatenate([
        p["lbd_qc"].T,                      # (1, L)
        p["lbd_qi"].T,                      # (1, L)
        p["xmean_lev"].T,                   # (NX, L)
        (1.0 / p["xdiv_lev"]).T,            # (NX, L)
        (1.0 / p["yscale_lev"]).T,          # (NOL, L)
        (p["b_lev"] / p["yscale_lev"]).T,   # (NOL, L)   b_lev folded with per-level scale
    ], axis=0)                              # (30, L)
    tok = jnp.tile(per_lev, (1, chunk))     # (30, chunk*L), reused across grid steps

    gw = jnp.concatenate([p["w_hh"].T, p["w_xm"].T, p["w_xs"].T], axis=1)   # (NH, 42)
    hw = jnp.concatenate([p["w_lev"].T, p["w_sfc"].T], axis=0)              # (13, NH)
    bh = p["b_h"].T                                                         # (NH, 1)

    sca = jnp.zeros((4, NS), jnp.float32)
    sca = sca.at[0, :].set(p["xmean_sca"][0])
    sca = sca.at[1, :].set(1.0 / p["xdiv_sca"][0])
    sca = sca.at[2, :NOS].set(p["b_sfc"][0])
    sca = sca.at[3, :NOS].set(1.0 / p["yscale_sca"][0])

    return dict(tok=tok, gw=gw, hw=hw, bh=bh, sca=sca)


# ------------------------------ wrapper --------------------------------------
@partial(jax.jit, static_argnames=("bc",))
def new_model_forward(x_main, x_sfc, rnn1_mem, prep, bc):
    b, l, nx = x_main.shape
    nh = rnn1_mem.shape[-1]
    assert b % bc == 0

    # one-time layout change to feature-major (tokens on the lane axis)
    x_fm = jnp.transpose(x_main, (2, 0, 1)).reshape(nx, b * l)
    mem_fm = jnp.transpose(rnn1_mem, (2, 0, 1)).reshape(nh, b * l)

    lev6, osfc, h_fm = pl.pallas_call(
        newmodel_kernel,
        out_shape=(
            jax.ShapeDtypeStruct((6, b * l), jnp.float32),   # olev0/1, dqliq, dqice, olev3/4
            jax.ShapeDtypeStruct((b, NOS), jnp.float32),     # out_sfc
            jax.ShapeDtypeStruct((nh, b * l), jnp.float32),  # new rnn memory (feature-major)
        ),
        grid=(b // bc,),
        in_specs=[
            pl.BlockSpec((nx, bc * l), lambda i: (0, i)),        # x_main (feature-major)
            pl.BlockSpec((bc, NS), lambda i: (i, 0)),            # x_sfc  (batch-major)
            pl.BlockSpec((nh, bc * l), lambda i: (0, i)),        # rnn memory
            pl.BlockSpec((TOK_ROWS, bc * l), lambda i: (0, 0)),  # per-level params (resident)
            pl.BlockSpec((NH, NH + NX + NS), lambda i: (0, 0)),  # recurrence weights
            pl.BlockSpec((NOL + NOS, NH), lambda i: (0, 0)),     # head weights
            pl.BlockSpec((NH, 1), lambda i: (0, 0)),             # b_h column
            pl.BlockSpec((4, NS), lambda i: (0, 0)),             # scalar-feature params
        ],
        out_specs=(
            pl.BlockSpec((6, bc * l), lambda i: (0, i)),
            pl.BlockSpec((bc, NOS), lambda i: (i, 0)),
            pl.BlockSpec((nh, bc * l), lambda i: (0, i)),
        ),
        compiler_params=pltpu.CompilerParams(dimension_semantics=("parallel",)),
    )(x_fm, x_sfc, mem_fm, prep["tok"], prep["gw"], prep["hw"], prep["bh"], prep["sca"])

    # tiny XLA-side repacks (lane-dense kernel outputs -> PyTorch yout layout)
    lev_pack = jnp.transpose(lev6.reshape(6, b, l), (1, 0, 2)).reshape(b, 6 * l)
    mem_tail = jnp.transpose(h_fm.reshape(nh, b, l), (1, 2, 0)).reshape(b, l * nh)
    return jnp.concatenate([lev_pack, osfc, mem_tail], axis=1)


# --------------------------- pure-JAX reference -------------------------------
def new_model_forward_ref(x_main, x_sfc, rnn1_mem, p):
    b = x_main.shape[0]
    T_before = x_main[:, :, 0:1]
    qliq_before = x_main[:, :, 2:3]
    qice_before = x_main[:, :, 3:4]
    qn_before = qliq_before + qice_before

    xm = x_main
    xm = xm.at[:, :, 2].set(1.0 - jnp.exp(-xm[:, :, 2] * p["lbd_qc"][:, 0]))
    xm = xm.at[:, :, 3].set(1.0 - jnp.exp(-xm[:, :, 3] * p["lbd_qi"][:, 0]))
    xm = (xm - p["xmean_lev"][None]) / p["xdiv_lev"][None]
    xm = jnp.where(jnp.isnan(xm), 0.0, xm)
    xs = (x_sfc - p["xmean_sca"]) / p["xdiv_sca"]

    s = xs @ p["w_xs"]
    z = xm @ p["w_xm"] + rnn1_mem @ p["w_hh"] + s[:, None, :] + p["b_h"][None]
    h = jnp.tanh(z)
    out_lev = (h @ p["w_lev"] + p["b_lev"][None]) / p["yscale_lev"][None]
    out_sfc = (jnp.mean(h, axis=1) @ p["w_sfc"] + p["b_sfc"]) / p["yscale_sca"]

    T_new = T_before + out_lev[:, :, 0:1] * 1200.0
    liq = jnp.clip((T_new - 253.16) * 0.05, 0.0, 1.0)
    qn_new = qn_before + out_lev[:, :, 2:3] * 1200.0
    dqliq = (liq * qn_new - qliq_before) * DQ_SCALE
    dqice = ((1.0 - liq) * qn_new - qice_before) * DQ_SCALE

    olt = jnp.transpose(out_lev, (0, 2, 1)).reshape(b, L * NOL)
    return jnp.concatenate([
        olt[:, 0:2 * L], dqliq.reshape(b, L), dqice.reshape(b, L),
        olt[:, 3 * L:5 * L], out_sfc, h.reshape(b, L * NH),
    ], axis=1)


# ------------------------------ param init ------------------------------------
def init_params(key):
    ks = jax.random.split(key, 16)
    p = {}
    p["lbd_qc"] = jax.random.uniform(ks[0], (L, 1), jnp.float32, 0.5, 2.0)
    p["lbd_qi"] = jax.random.uniform(ks[1], (L, 1), jnp.float32, 0.5, 2.0)
    p["xmean_lev"] = 0.1 * jax.random.normal(ks[2], (L, NX), jnp.float32)
    p["xdiv_lev"] = jax.random.uniform(ks[3], (L, NX), jnp.float32, 0.5, 1.5)
    p["xmean_sca"] = 0.1 * jax.random.normal(ks[4], (1, NS), jnp.float32)
    p["xdiv_sca"] = jax.random.uniform(ks[5], (1, NS), jnp.float32, 0.5, 1.5)
    p["yscale_lev"] = jax.random.uniform(ks[6], (L, NOL), jnp.float32, 0.5, 2.0)
    p["yscale_sca"] = jax.random.uniform(ks[7], (1, NOS), jnp.float32, 0.5, 2.0)
    p["w_xm"] = 0.1 * jax.random.normal(ks[8], (NX, NH), jnp.float32)
    p["w_xs"] = 0.1 * jax.random.normal(ks[9], (NS, NH), jnp.float32)
    p["w_hh"] = 0.1 * jax.random.normal(ks[10], (NH, NH), jnp.float32)
    p["b_h"] = 0.1 * jax.random.normal(ks[11], (1, NH), jnp.float32)
    p["w_lev"] = 0.1 * jax.random.normal(ks[12], (NH, NOL), jnp.float32)
    p["b_lev"] = 0.1 * jax.random.normal(ks[13], (1, NOL), jnp.float32)
    p["w_sfc"] = 0.1 * jax.random.normal(ks[14], (NH, NOS), jnp.float32)
    p["b_sfc"] = 0.1 * jax.random.normal(ks[15], (1, NOS), jnp.float32)
    return p


# --------------------------------- main ---------------------------------------
if __name__ == "__main__":
    key = jax.random.PRNGKey(0)
    k_in, k_par = jax.random.split(key)
    ki = jax.random.split(k_in, 5)

    x_main = jax.random.normal(ki[0], (B, L, NX), jnp.float32)
    x_main = x_main.at[:, :, 0].set(253.16 + 20.0 * jax.random.normal(ki[1], (B, L), jnp.float32))
    x_main = x_main.at[:, :, 2].set(1e-3 * jax.random.uniform(ki[2], (B, L), jnp.float32))
    x_main = x_main.at[:, :, 3].set(1e-3 * jax.random.uniform(ki[3], (B, L), jnp.float32))
    x_sfc = jax.random.normal(ki[4], (B, NS), jnp.float32)
    rnn1_mem = jnp.zeros((B, L, NH), jnp.float32)   # matches `torch.zeros((bsize, 60, 16))`

    params = init_params(k_par)
    bc = BC if (B % BC == 0) else B                 # chunk so bc*L is a multiple of 128 lanes
    prep = prepare_params(params, bc)               # one-time param consolidation

    yout = jax.block_until_ready(new_model_forward(x_main, x_sfc, rnn1_mem, prep, bc=bc))
    assert yout.shape == (B, 368 + L * NH), yout.shape

    y_ref = new_model_forward_ref(x_main, x_sfc, rnn1_mem, params)
    max_err = float(jnp.max(jnp.abs(yout - y_ref)))
    assert jnp.allclose(yout, y_ref, rtol=2e-3, atol=2e-3), f"max abs err {max_err}"

    print("KERNEL_OK")
</pallas_src>

<mosaic_0001>
module attributes {stable_mosaic.version = 11 : i64} {
  func.func @newmodel_kernel(%arg0: i32, %arg1: memref<9x1920xf32, #tpu.memory_space<vmem>>, %arg2: memref<32x17xf32, #tpu.memory_space<vmem>>, %arg3: memref<16x1920xf32, #tpu.memory_space<vmem>>, %arg4: memref<30x1920xf32, #tpu.memory_space<vmem>>, %arg5: memref<16x42xf32, #tpu.memory_space<vmem>>, %arg6: memref<13x16xf32, #tpu.memory_space<vmem>>, %arg7: memref<16x1xf32, #tpu.memory_space<vmem>>, %arg8: memref<4x17xf32, #tpu.memory_space<vmem>>, %arg9: memref<6x1920xf32, #tpu.memory_space<vmem>>, %arg10: memref<32x8xf32, #tpu.memory_space<vmem>>, %arg11: memref<16x1920xf32, #tpu.memory_space<vmem>>) attributes {dimension_semantics = [#tpu.dimension_semantics<parallel>], iteration_bounds = array<i64: 2>, scalar_prefetch = 0 : i64, scratch_operands = 0 : i64, tpu.core_type = #tpu.core_type<tc>, window_params = [{transform_indices = @transform_0, window_bounds = array<i64: 9, 1920>}, {transform_indices = @transform_1, window_bounds = array<i64: 32, 17>}, {transform_indices = @transform_2, window_bounds = array<i64: 16, 1920>}, {pipeline_mode = #tpu.pipeline_mode<synchronous>, transform_indices = @transform_3, window_bounds = array<i64: 30, 1920>}, {pipeline_mode = #tpu.pipeline_mode<synchronous>, transform_indices = @transform_4, window_bounds = array<i64: 16, 42>}, {pipeline_mode = #tpu.pipeline_mode<synchronous>, transform_indices = @transform_5, window_bounds = array<i64: 13, 16>}, {pipeline_mode = #tpu.pipeline_mode<synchronous>, transform_indices = @transform_6, window_bounds = array<i64: 16, 1>}, {pipeline_mode = #tpu.pipeline_mode<synchronous>, transform_indices = @transform_7, window_bounds = array<i64: 4, 17>}, {transform_indices = @transform_8, window_bounds = array<i64: 6, 1920>}, {transform_indices = @transform_9, window_bounds = array<i64: 32, 8>}, {transform_indices = @transform_10, window_bounds = array<i64: 16, 1920>}]} {
    %c0 = arith.constant 0 : index
    %c0_0 = arith.constant 0 : index
    %0 = vector.load %arg1[%c0, %c0_0] : memref<9x1920xf32, #tpu.memory_space<vmem>>, vector<9x1920xf32>
    %c0_1 = arith.constant 0 : index
    %c0_2 = arith.constant 0 : index
    %1 = vector.load %arg2[%c0_1, %c0_2] : memref<32x17xf32, #tpu.memory_space<vmem>>, vector<32x17xf32>
    %c0_3 = arith.constant 0 : index
    %c0_4 = arith.constant 0 : index
    %2 = vector.load %arg3[%c0_3, %c0_4] : memref<16x1920xf32, #tpu.memory_space<vmem>>, vector<16x1920xf32>
    %c0_5 = arith.constant 0 : index
    %c0_6 = arith.constant 0 : index
    %3 = vector.load %arg4[%c0_5, %c0_6] : memref<30x1920xf32, #tpu.memory_space<vmem>>, vector<30x1920xf32>
    %4 = vector.extract_strided_slice %3 {offsets = [0, 0], sizes = [1, 1920], strides = [1, 1]} : vector<30x1920xf32> to vector<1x1920xf32>
    %5 = vector.extract_strided_slice %3 {offsets = [1, 0], sizes = [1, 1920], strides = [1, 1]} : vector<30x1920xf32> to vector<1x1920xf32>
    %6 = vector.extract_strided_slice %3 {offsets = [2, 0], sizes = [9, 1920], strides = [1, 1]} : vector<30x1920xf32> to vector<9x1920xf32>
    %7 = vector.extract_strided_slice %3 {offsets = [11, 0], sizes = [9, 1920], strides = [1, 1]} : vector<30x1920xf32> to vector<9x1920xf32>
    %8 = vector.extract_strided_slice %3 {offsets = [20, 0], sizes = [5, 1920], strides = [1, 1]} : vector<30x1920xf32> to vector<5x1920xf32>
    %9 = vector.extract_strided_slice %3 {offsets = [25, 0], sizes = [5, 1920], strides = [1, 1]} : vector<30x1920xf32> to vector<5x1920xf32>
    %c0_7 = arith.constant 0 : index
    %c0_8 = arith.constant 0 : index
    %10 = vector.load %arg5[%c0_7, %c0_8] : memref<16x42xf32, #tpu.memory_space<vmem>>, vector<16x42xf32>
    %11 = vector.extract_strided_slice %10 {offsets = [0, 0], sizes = [16, 16], strides = [1, 1]} : vector<16x42xf32> to vector<16x16xf32>
    %12 = vector.extract_strided_slice %10 {offsets = [0, 16], sizes = [16, 9], strides = [1, 1]} : vector<16x42xf32> to vector<16x9xf32>
    %13 = vector.extract_strided_slice %10 {offsets = [0, 25], sizes = [16, 17], strides = [1, 1]} : vector<16x42xf32> to vector<16x17xf32>
    %c0_9 = arith.constant 0 : index
    %c0_10 = arith.constant 0 : index
    %14 = vector.load %arg6[%c0_9, %c0_10] : memref<13x16xf32, #tpu.memory_space<vmem>>, vector<13x16xf32>
    %15 = vector.extract_strided_slice %14 {offsets = [0, 0], sizes = [5, 16], strides = [1, 1]} : vector<13x16xf32> to vector<5x16xf32>
    %16 = vector.extract_strided_slice %14 {offsets = [5, 0], sizes = [8, 16], strides = [1, 1]} : vector<13x16xf32> to vector<8x16xf32>
    %c0_11 = arith.constant 0 : index
    %c0_12 = arith.constant 0 : index
    %17 = vector.load %arg7[%c0_11, %c0_12] : memref<16x1xf32, #tpu.memory_space<vmem>>, vector<16x1xf32>
    %c0_13 = arith.constant 0 : index
    %c0_14 = arith.constant 0 : index
    %18 = vector.load %arg8[%c0_13, %c0_14] : memref<4x17xf32, #tpu.memory_space<vmem>>, vector<4x17xf32>
    %19 = vector.extract_strided_slice %18 {offsets = [0, 0], sizes = [1, 17], strides = [1, 1]} : vector<4x17xf32> to vector<1x17xf32>
    %20 = vector.extract_strided_slice %18 {offsets = [1, 0], sizes = [1, 17], strides = [1, 1]} : vector<4x17xf32> to vector<1x17xf32>
    %21 = vector.extract_strided_slice %18 {offsets = [2, 0], sizes = [1, 8], strides = [1, 1]} : vector<4x17xf32> to vector<1x8xf32>
    %22 = vector.extract_strided_slice %18 {offsets = [3, 0], sizes = [1, 8], strides = [1, 1]} : vector<4x17xf32> to vector<1x8xf32>
    %23 = vector.extract_strided_slice %0 {offsets = [0, 0], sizes = [1, 1920], strides = [1, 1]} : vector<9x1920xf32> to vector<1x1920xf32>
    %24 = vector.extract_strided_slice %0 {offsets = [2, 0], sizes = [1, 1920], strides = [1, 1]} : vector<9x1920xf32> to vector<1x1920xf32>
    %25 = vector.extract_strided_slice %0 {offsets = [3, 0], sizes = [1, 1920], strides = [1, 1]} : vector<9x1920xf32> to vector<1x1920xf32>
    %26 = arith.addf %24, %25 : vector<1x1920xf32>
    %cst = arith.constant 0.000000e+00 : f32
    %27 = vector.broadcast %cst : f32 to vector<1x1920xf32>
    %28 = arith.subf %27, %24 : vector<1x1920xf32>
    %29 = arith.mulf %28, %4 : vector<1x1920xf32>
    %30 = math.exp %29 : vector<1x1920xf32>
    %cst_15 = arith.constant 1.000000e+00 : f32
    %31 = vector.broadcast %cst_15 : f32 to vector<1x1920xf32>
    %32 = arith.subf %31, %30 : vector<1x1920xf32>
    %cst_16 = arith.constant 0.000000e+00 : f32
    %33 = vector.broadcast %cst_16 : f32 to vector<1x1920xf32>
    %34 = arith.subf %33, %25 : vector<1x1920xf32>
    %35 = arith.mulf %34, %5 : vector<1x1920xf32>
    %36 = math.exp %35 : vector<1x1920xf32>
    %cst_17 = arith.constant 1.000000e+00 : f32
    %37 = vector.broadcast %cst_17 : f32 to vector<1x1920xf32>
    %38 = arith.subf %37, %36 : vector<1x1920xf32>
    %39 = tpu.iota {dimensions = array<i32: 0>} : vector<9x1920xi32>
    %c2_i32 = arith.constant 2 : i32
    %40 = vector.broadcast %c2_i32 : i32 to vector<9x1920xi32>
    %41 = arith.cmpi eq, %39, %40 : vector<9x1920xi32>
    %c3_i32 = arith.constant 3 : i32
    %42 = vector.broadcast %c3_i32 : i32 to vector<9x1920xi32>
    %43 = arith.cmpi eq, %39, %42 : vector<9x1920xi32>
    %44 = vector.shape_cast %38 : vector<1x1920xf32> to vector<1x1920xf32>
    %45 = vector.broadcast %44 : vector<1x1920xf32> to vector<9x1920xf32>
    %46 = arith.select %43, %45, %0 : vector<9x1920xi1>, vector<9x1920xf32>
    %47 = vector.shape_cast %32 : vector<1x1920xf32> to vector<1x1920xf32>
    %48 = vector.broadcast %47 : vector<1x1920xf32> to vector<9x1920xf32>
    %49 = arith.select %41, %48, %46 : vector<9x1920xi1>, vector<9x1920xf32>
    %50 = arith.subf %49, %6 : vector<9x1920xf32>
    %51 = arith.mulf %50, %7 : vector<9x1920xf32>
    %52 = arith.cmpf one, %51, %51 : vector<9x1920xf32>
    %cst_18 = arith.constant 0.000000e+00 : f32
    %53 = vector.broadcast %cst_18 : f32 to vector<9x1920xf32>
    %54 = arith.select %52, %53, %51 : vector<9x1920xi1>, vector<9x1920xf32>
    %55 = vector.broadcast %19 : vector<1x17xf32> to vector<32x17xf32>
    %56 = arith.subf %1, %55 : vector<32x17xf32>
    %57 = vector.broadcast %20 : vector<1x17xf32> to vector<32x17xf32>
    %58 = arith.mulf %56, %57 : vector<32x17xf32>
    %59 = tpu.iota {dimensions = array<i32: 0>} : vector<32x1920xi32>
    %60 = tpu.iota {dimensions = array<i32: 1>} : vector<32x1920xi32>
    %c60_i32 = arith.constant 60 : i32
    %61 = vector.broadcast %c60_i32 : i32 to vector<32x1920xi32>
    %62 = arith.muli %59, %61 : vector<32x1920xi32>
    %63 = arith.subi %60, %62 : vector<32x1920xi32>
    %c0_i32 = arith.constant 0 : i32
    %64 = vector.broadcast %c0_i32 : i32 to vector<32x1920xi32>
    %65 = arith.cmpi sge, %63, %64 : vector<32x1920xi32>
    %c60_i32_19 = arith.constant 60 : i32
    %66 = vector.broadcast %c60_i32_19 : i32 to vector<32x1920xi32>
    %67 = arith.cmpi slt, %63, %66 : vector<32x1920xi32>
    %68 = arith.andi %65, %67 : vector<32x1920xi1>
    %cst_20 = arith.constant 1.000000e+00 : f32
    %cst_21 = arith.constant 0.000000e+00 : f32
    %69 = vector.broadcast %cst_20 : f32 to vector<32x1920xf32>
    %70 = vector.broadcast %cst_21 : f32 to vector<32x1920xf32>
    %71 = arith.select %68, %69, %70 : vector<32x1920xi1>, vector<32x1920xf32>
    %cst_22 = arith.constant dense<0.000000e+00> : vector<16x32xf32>
    %72 = tpu.matmul %13, %58, %cst_22 {dimension_numbers = #tpu.dot_dimension_numbers<[1], [1], [0], [0], [0, 0, 1, 0], [], []>} : vector<16x17xf32>, vector<32x17xf32>, vector<16x32xf32> -> vector<16x32xf32>
    %73 = vector.broadcast %17 : vector<16x1xf32> to vector<16x32xf32>
    %74 = arith.addf %72, %73 : vector<16x32xf32>
    %cst_23 = arith.constant dense<0.000000e+00> : vector<16x1920xf32>
    %75 = tpu.matmul %74, %71, %cst_23 {dimension_numbers = #tpu.dot_dimension_numbers<[1], [0], [0], [1], [0, 0, 1, 1], [], []>} : vector<16x32xf32>, vector<32x1920xf32>, vector<16x1920xf32> -> vector<16x1920xf32>
    %cst_24 = arith.constant dense<0.000000e+00> : vector<16x1920xf32>
    %76 = tpu.matmul %11, %2, %cst_24 {dimension_numbers = #tpu.dot_dimension_numbers<[1], [0], [0], [1], [0, 0, 1, 1], [], []>} : vector<16x16xf32>, vector<16x1920xf32>, vector<16x1920xf32> -> vector<16x1920xf32>
    %cst_25 = arith.constant dense<0.000000e+00> : vector<16x1920xf32>
    %77 = tpu.matmul %12, %54, %cst_25 {dimension_numbers = #tpu.dot_dimension_numbers<[1], [0], [0], [1], [0, 0, 1, 1], [], []>} : vector<16x9xf32>, vector<9x1920xf32>, vector<16x1920xf32> -> vector<16x1920xf32>
    %78 = arith.addf %76, %77 : vector<16x1920xf32>
    %79 = arith.addf %78, %75 : vector<16x1920xf32>
    %80 = math.tanh %79 : vector<16x1920xf32>
    %c0_26 = arith.constant 0 : index
    %c0_27 = arith.constant 0 : index
    %81 = vector.load %arg11[%c0_26, %c0_27] : memref<16x1920xf32, #tpu.memory_space<vmem>>, vector<16x1920xf32>
    tpu.vector_store %arg11[%c0_26, %c0_27], %80 {strides = array<i32>} : memref<16x1920xf32, #tpu.memory_space<vmem>>, vector<16x1920xf32>,
    %cst_28 = arith.constant dense<0.000000e+00> : vector<5x1920xf32>
    %82 = tpu.matmul %15, %80, %cst_28 {dimension_numbers = #tpu.dot_dimension_numbers<[1], [0], [0], [1], [0, 0, 1, 1], [], []>} : vector<5x16xf32>, vector<16x1920xf32>, vector<5x1920xf32> -> vector<5x1920xf32>
    %83 = arith.mulf %82, %8 : vector<5x1920xf32>
    %84 = arith.addf %83, %9 : vector<5x1920xf32>
    %cst_29 = arith.constant dense<0.000000e+00> : vector<32x16xf32>
    %85 = tpu.matmul %71, %80, %cst_29 {dimension_numbers = #tpu.dot_dimension_numbers<[1], [1], [0], [0], [0, 0, 1, 0], [], []>} : vector<32x1920xf32>, vector<16x1920xf32>, vector<32x16xf32> -> vector<32x16xf32>
    %cst_30 = arith.constant 0.0166666675 : f32
    %86 = vector.broadcast %cst_30 : f32 to vector<32x16xf32>
    %87 = arith.mulf %85, %86 : vector<32x16xf32>
    %cst_31 = arith.constant dense<0.000000e+00> : vector<32x8xf32>
    %88 = tpu.matmul %87, %16, %cst_31 {dimension_numbers = #tpu.dot_dimension_numbers<[1], [1], [0], [0], [0, 0, 1, 0], [], []>} : vector<32x16xf32>, vector<8x16xf32>, vector<32x8xf32> -> vector<32x8xf32>
    %89 = vector.broadcast %21 : vector<1x8xf32> to vector<32x8xf32>
    %90 = arith.addf %88, %89 : vector<32x8xf32>
    %91 = vector.broadcast %22 : vector<1x8xf32> to vector<32x8xf32>
    %92 = arith.mulf %90, %91 : vector<32x8xf32>
    %c0_32 = arith.constant 0 : index
    %c0_33 = arith.constant 0 : index
    %93 = vector.load %arg10[%c0_32, %c0_33] : memref<32x8xf32, #tpu.memory_space<vmem>>, vector<32x8xf32>
    tpu.vector_store %arg10[%c0_32, %c0_33], %92 {strides = array<i32>} : memref<32x8xf32, #tpu.memory_space<vmem>>, vector<32x8xf32>,
    %94 = vector.extract_strided_slice %84 {offsets = [0, 0], sizes = [1, 1920], strides = [1, 1]} : vector<5x1920xf32> to vector<1x1920xf32>
    %cst_34 = arith.constant 1.200000e+03 : f32
    %95 = vector.broadcast %cst_34 : f32 to vector<1x1920xf32>
    %96 = arith.mulf %94, %95 : vector<1x1920xf32>
    %97 = arith.addf %23, %96 : vector<1x1920xf32>
    %cst_35 = arith.constant 2.531600e+02 : f32
    %98 = vector.broadcast %cst_35 : f32 to vector<1x1920xf32>
    %99 = arith.subf %97, %98 : vector<1x1920xf32>
    %cst_36 = arith.constant 5.000000e-02 : f32
    %100 = vector.broadcast %cst_36 : f32 to vector<1x1920xf32>
    %101 = arith.mulf %99, %100 : vector<1x1920xf32>
    %cst_37 = arith.constant 0.000000e+00 : f32
    %cst_38 = arith.constant 1.000000e+00 : f32
    %102 = vector.broadcast %cst_37 : f32 to vector<1x1920xf32>
    %103 = arith.maximumf %102, %101 : vector<1x1920xf32>
    %104 = vector.broadcast %cst_38 : f32 to vector<1x1920xf32>
    %105 = arith.minimumf %104, %103 : vector<1x1920xf32>
    %106 = vector.extract_strided_slice %84 {offsets = [2, 0], sizes = [1, 1920], strides = [1, 1]} : vector<5x1920xf32> to vector<1x1920xf32>
    %cst_39 = arith.constant 1.200000e+03 : f32
    %107 = vector.broadcast %cst_39 : f32 to vector<1x1920xf32>
    %108 = arith.mulf %106, %107 : vector<1x1920xf32>
    %109 = arith.addf %26, %108 : vector<1x1920xf32>
    %110 = arith.mulf %105, %109 : vector<1x1920xf32>
    %111 = arith.subf %110, %24 : vector<1x1920xf32>
    %cst_40 = arith.constant 8.33333353E-4 : f32
    %112 = vector.broadcast %cst_40 : f32 to vector<1x1920xf32>
    %113 = arith.mulf %111, %112 : vector<1x1920xf32>
    %cst_41 = arith.constant 1.000000e+00 : f32
    %114 = vector.broadcast %cst_41 : f32 to vector<1x1920xf32>
    %115 = arith.subf %114, %105 : vector<1x1920xf32>
    %116 = arith.mulf %115, %109 : vector<1x1920xf32>
    %117 = arith.subf %116, %25 : vector<1x1920xf32>
    %cst_42 = arith.constant 8.33333353E-4 : f32
    %118 = vector.broadcast %cst_42 : f32 to vector<1x1920xf32>
    %119 = arith.mulf %117, %118 : vector<1x1920xf32>
    %120 = vector.extract_strided_slice %84 {offsets = [0, 0], sizes = [2, 1920], strides = [1, 1]} : vector<5x1920xf32> to vector<2x1920xf32>
    %c0_43 = arith.constant 0 : index
    %c0_44 = arith.constant 0 : index
    %121 = vector.load %arg9[%c0_43, %c0_44] : memref<6x1920xf32, #tpu.memory_space<vmem>>, vector<2x1920xf32>
    tpu.vector_store %arg9[%c0_43, %c0_44], %120 {strides = array<i32>} : memref<6x1920xf32, #tpu.memory_space<vmem>>, vector<2x1920xf32>,
    %c2 = arith.constant 2 : index
    %c0_45 = arith.constant 0 : index
    %122 = vector.load %arg9[%c2, %c0_45] : memref<6x1920xf32, #tpu.memory_space<vmem>>, vector<1x1920xf32>
    tpu.vector_store %arg9[%c2, %c0_45], %113 {strides = array<i32>} : memref<6x1920xf32, #tpu.memory_space<vmem>>, vector<1x1920xf32>,
    %c3 = arith.constant 3 : index
    %c0_46 = arith.constant 0 : index
    %123 = vector.load %arg9[%c3, %c0_46] : memref<6x1920xf32, #tpu.memory_space<vmem>>, vector<1x1920xf32>
    tpu.vector_store %arg9[%c3, %c0_46], %119 {strides = array<i32>} : memref<6x1920xf32, #tpu.memory_space<vmem>>, vector<1x1920xf32>,
    %124 = vector.extract_strided_slice %84 {offsets = [3, 0], sizes = [2, 1920], strides = [1, 1]} : vector<5x1920xf32> to vector<2x1920xf32>
    %c4 = arith.constant 4 : index
    %c0_47 = arith.constant 0 : index
    %125 = vector.load %arg9[%c4, %c0_47] : memref<6x1920xf32, #tpu.memory_space<vmem>>, vector<2x1920xf32>
    tpu.vector_store %arg9[%c4, %c0_47], %124 {strides = array<i32>} : memref<6x1920xf32, #tpu.memory_space<vmem>>, vector<2x1920xf32>,
    return
  }
  func.func @transform_0(%arg0: i32) -> (i32, i32) {
    %c0_i32 = arith.constant 0 : i32
    %c0_i32_0 = arith.constant 0 : i32
    return %c0_i32, %arg0 : i32, i32
  }
  func.func @transform_1(%arg0: i32) -> (i32, i32) {
    %c0_i32 = arith.constant 0 : i32
    %c0_i32_0 = arith.constant 0 : i32
    return %arg0, %c0_i32 : i32, i32
  }
  func.func @transform_2(%arg0: i32) -> (i32, i32) {
    %c0_i32 = arith.constant 0 : i32
    %c0_i32_0 = arith.constant 0 : i32
    return %c0_i32, %arg0 : i32, i32
  }
  func.func @transform_3(%arg0: i32) -> (i32, i32) {
    %c0_i32 = arith.constant 0 : i32
    %c0_i32_0 = arith.constant 0 : i32
    %c0_i32_1 = arith.constant 0 : i32
    return %c0_i32, %c0_i32_0 : i32, i32
  }
  func.func @transform_4(%arg0: i32) -> (i32, i32) {
    %c0_i32 = arith.constant 0 : i32
    %c0_i32_0 = arith.constant 0 : i32
    %c0_i32_1 = arith.constant 0 : i32
    return %c0_i32, %c0_i32_0 : i32, i32
  }
  func.func @transform_5(%arg0: i32) -> (i32, i32) {
    %c0_i32 = arith.constant 0 : i32
    %c0_i32_0 = arith.constant 0 : i32
    %c0_i32_1 = arith.constant 0 : i32
    return %c0_i32, %c0_i32_0 : i32, i32
  }
  func.func @transform_6(%arg0: i32) -> (i32, i32) {
    %c0_i32 = arith.constant 0 : i32
    %c0_i32_0 = arith.constant 0 : i32
    %c0_i32_1 = arith.constant 0 : i32
    return %c0_i32, %c0_i32_0 : i32, i32
  }
  func.func @transform_7(%arg0: i32) -> (i32, i32) {
    %c0_i32 = arith.constant 0 : i32
    %c0_i32_0 = arith.constant 0 : i32
    %c0_i32_1 = arith.constant 0 : i32
    return %c0_i32, %c0_i32_0 : i32, i32
  }
  func.func @transform_8(%arg0: i32) -> (i32, i32) {
    %c0_i32 = arith.constant 0 : i32
    %c0_i32_0 = arith.constant 0 : i32
    return %c0_i32, %arg0 : i32, i32
  }
  func.func @transform_9(%arg0: i32) -> (i32, i32) {
    %c0_i32 = arith.constant 0 : i32
    %c0_i32_0 = arith.constant 0 : i32
    return %arg0, %c0_i32 : i32, i32
  }
  func.func @transform_10(%arg0: i32) -> (i32, i32) {
    %c0_i32 = arith.constant 0 : i32
    %c0_i32_0 = arith.constant 0 : i32
    return %c0_i32, %arg0 : i32, i32
  }
}

</mosaic_0001>

<bundles_post_ra>
// kernel: new_model_forward.1
= control target key start
LH: loop header
LB: loop body
LE: loop exit
PB: predicated region body
PF: predicated region fallthrough
CT: control target
= control target key end

     0   :  { %s6824_s13 = smov 0   ;;  %s6826_s14 = smov 0   ;;  %s10522_s0 = inlined_call_operand.vmem [shape: f32[9,3840], index: 0, kind: input, shape index: {}]   ;;  %s10523_s1 = inlined_call_operand.vmem [shape: f32[64,17], index: 1, kind: input, shape index: {}]   ;;  %s10524_s2 = inlined_call_operand.vmem [shape: f32[16,3840], index: 2, kind: input, shape index: {}]   ;;  %s10525_s3 = inlined_call_operand.vmem [shape: f32[30,1920], index: 3, kind: input, shape index: {}]   ;;  %s10526_s4 = inlined_call_operand.vmem [shape: f32[16,42], index: 4, kind: input, shape index: {}]   ;;  %s10527_s5 = inlined_call_operand.vmem [shape: f32[13,16], index: 5, kind: input, shape index: {}]   ;;  %s10528_s6 = inlined_call_operand.vmem [shape: f32[16,1], index: 6, kind: input, shape index: {}]   ;;  %s10529_s7 = inlined_call_operand.vmem [shape: f32[4,17], index: 7, kind: input, shape index: {}]   ;;  %s10530_s8 = inlined_call_operand.vmem [shape: f32[6,3840], index: 8, kind: output, shape index: {0}]   ;;  %s10531_s9 = inlined_call_operand.vmem [shape: f32[64,8], index: 9, kind: output, shape index: {1}]   ;;  %s10532_s10 = inlined_call_operand.vmem [shape: f32[16,3840], index: 10, kind: output, shape index: {2}]  }
   0x1   :  { %s6828_s15 = smov 0  }
   0x2 LB: > { %s6840_s16 = sadd.s32 4294967295, %s6760_s15   ;;  %s6843_s17 = sadd.s32 1, %s6760_s15   ;;  %s6760_s15 = sphi %s6828_s15, %s11492_s15   ;;  %s6756_s14 = sphi %s6826_s14, %s11491_s14   ;;  %s6752_s13 = sphi %s6824_s13, %s11490_s13  }
   0x3   : > { %s25_s18 = ssub.s32 %s6760_s15, %s6843_s17  ;;  %s28_s19 = sadd.s32 1, %s6756_s14 }
   0x4   : > { %p26_p0 = scmp.eq.s32.totalorder %s25_s18, 0  ;;  %p35_p1 = scmp.ne.s32.totalorder %s6756_s14, %s6752_s13 }
   0x5   : > { %p36_p2 = scmp.eq.s32.totalorder %s6760_s15, 0  ;;  %p274_p3 = scmp.eq.s32.totalorder %s6840_s16, 1 }
   0x6   : > { %s6853_s20 = scalar_select %p26_p0, %s6756_s14, %s28_s19  }
   0x7   : > { %p6855_p4 = por %p36_p2, %p35_p1  ;;  %p6859_p5 = por %p274_p3, %p35_p1 }
   0x8   : > { %p6214_p6 = scmp.ge.s32.totalorder %s6760_s15, 2 }
   0xa   : > { %311 = sbr.rel (%p6214_p6) target bundleno = 55 (0x37), region = 36 }
   0xf   : > { %314 = sbr.rel (!%p6855_p4) target bundleno = 35 (0x23), region = 40  ;;  %s316_s23 = sand.u32 (%p6855_p4), 1, %s6756_s14  }
  0x10   : > { %s6481_s24 = smul.u32 (%p6855_p4), 120, %s6760_s15 }
  0x11   : > { %s6579_s25 = smul.u32 (%p6855_p4), 240, %s316_s23 }
  0x12   : > { %s6871_s28 = scalar_lea.vmem (%p6855_p4), %s10522_s0, %s6481_s24 }
  0x13   : > { %v334_v0 = vld [vmem:[%s6871_s28] sm:$0xff] (%p6855_p4)  ;;  %v336_v1 = vld [vmem:[%s6871_s28 + $0x8] sm:$0xff] (%p6855_p4)  ;;  %v338_v2 = vld [vmem:[%s6871_s28 + $0x10] sm:$0xff] (%p6855_p4)  ;;  %s6876_s29 = scalar_lea.vmem (%p6855_p4), [#allocation2], %s6579_s25 }
  0x14   : > { %335 = vst [vmem:[%s6876_s29] sm:$0xff] %v334_v0  ;;  %337 = vst [vmem:[%s6876_s29 + $0x8] sm:$0xff] %v336_v1  ;;  %v340_v3 = vld [vmem:[%s6871_s28 + $0x18] sm:$0xff]  ;;  %v342_v4 = vld [vmem:[%s6871_s28 + $0x20] sm:$0xff] }
  0x15   : > { %339 = vst [vmem:[%s6876_s29 + $0x10] sm:$0xff] %v338_v2  ;;  %v344_v5 = vld [vmem:[%s6871_s28 + $0x28] sm:$0xff]  ;;  %341 = vst [vmem:[%s6876_s29 + $0x18] sm:$0xff] %v340_v3  ;;  %v346_v6 = vld [vmem:[%s6871_s28 + $0x30] sm:$0xff] }
  0x16   : > { %343 = vst [vmem:[%s6876_s29 + $0x20] sm:$0xff] %v342_v4  ;;  %345 = vst [vmem:[%s6876_s29 + $0x28] sm:$0xff] %v344_v5  ;;  %v348_v7 = vld [vmem:[%s6871_s28 + $0x38] sm:$0xff]  ;;  %v350_v8 = vld [vmem:[%s6871_s28 + $0x40] sm:$0xff] }
  0x17   : > { %347 = vst [vmem:[%s6876_s29 + $0x30] sm:$0xff] %v346_v6  ;;  %349 = vst [vmem:[%s6876_s29 + $0x38] sm:$0xff] %v348_v7  ;;  %v352_v9 = vld [vmem:[%s6871_s28 + $0x48] sm:$0xff]  ;;  %v354_v10 = vld [vmem:[%s6871_s28 + $0x50] sm:$0xff] }
  0x18   : > { %351 = vst [vmem:[%s6876_s29 + $0x40] sm:$0xff] %v350_v8  ;;  %v356_v11 = vld [vmem:[%s6871_s28 + $0x58] sm:$0xff]  ;;  %353 = vst [vmem:[%s6876_s29 + $0x48] sm:$0xff] %v352_v9  ;;  %v358_v12 = vld [vmem:[%s6871_s28 + $0x60] sm:$0xff] }
  0x19   : > { %355 = vst [vmem:[%s6876_s29 + $0x50] sm:$0xff] %v354_v10  ;;  %357 = vst [vmem:[%s6876_s29 + $0x58] sm:$0xff] %v356_v11  ;;  %v360_v13 = vld [vmem:[%s6871_s28 + $0x68] sm:$0xff]  ;;  %v362_v14 = vld [vmem:[%s6871_s28 + $0x70] sm:$0xff] }
  0x1a   : > { %359 = vst [vmem:[%s6876_s29 + $0x60] sm:$0xff] %v358_v12  ;;  %361 = vst [vmem:[%s6876_s29 + $0x68] sm:$0xff] %v360_v13  ;;  %v364_v15 = vld [vmem:[%s6871_s28 + $0xf0] sm:$0xff]  ;;  %v366_v16 = vld [vmem:[%s6871_s28 + $0xf8] sm:$0xff] }
  0x1b   : > { %363 = vst [vmem:[%s6876_s29 + $0x70] sm:$0xff] %v362_v14  ;;  %v368_v17 = vld [vmem:[%s6871_s28 + $0x100] sm:$0xff]  ;;  %365 = vst [vmem:[%s6876_s29 + $0x78] sm:$0xff] %v364_v15  ;;  %v370_v18 = vld [vmem:[%s6871_s28 + $0x108] sm:$0xff] }
  0x1c   : > { %367 = vst [vmem:[%s6876_s29 + $0x80] sm:$0xff] %v366_v16  ;;  %369 = vst [vmem:[%s6876_s29 + $0x88] sm:$0xff] %v368_v17  ;;  %v372_v19 = vld [vmem:[%s6871_s28 + $0x110] sm:$0xff]  ;;  %v374_v20 = vld [vmem:[%s6871_s28 + $0x118] sm:$0xff] }
  0x1d   : > { %371 = vst [vmem:[%s6876_s29 + $0x90] sm:$0xff] %v370_v18  ;;  %373 = vst [vmem:[%s6876_s29 + $0x98] sm:$0xff] %v372_v19  ;;  %v376_v21 = vld [vmem:[%s6871_s28 + $0x120] sm:$0xff]  ;;  %v378_v22 = vld [vmem:[%s6871_s28 + $0x128] sm:$0xff] }
  0x1e   : > { %375 = vst [vmem:[%s6876_s29 + $0xa0] sm:$0xff] %v374_v20  ;;  %v380_v23 = vld [vmem:[%s6871_s28 + $0x130] sm:$0xff]  ;;  %377 = vst [vmem:[%s6876_s29 + $0xa8] sm:$0xff] %v376_v21  ;;  %v382_v24 = vld [vmem:[%s6871_s28 + $0x138] sm:$0xff] }
  0x1f   : > { %379 = vst [vmem:[%s6876_s29 + $0xb0] sm:$0xff] %v378_v22  ;;  %381 = vst [vmem:[%s6876_s29 + $0xb8] sm:$0xff] %v380_v23  ;;  %v384_v25 = vld [vmem:[%s6871_s28 + $0x140] sm:$0xff]  ;;  %v386_v26 = vld [vmem:[%s6871_s28 + $0x148] sm:$0xff] }
  0x20   : > { %383 = vst [vmem:[%s6876_s29 + $0xc0] sm:$0xff] %v382_v24  ;;  %385 = vst [vmem:[%s6876_s29 + $0xc8] sm:$0xff] %v384_v25  ;;  %v388_v27 = vld [vmem:[%s6871_s28 + $0x150] sm:$0xff]  ;;  %v390_v28 = vld [vmem:[%s6871_s28 + $0x158] sm:$0xff] }
  0x21   : > { %387 = vst [vmem:[%s6876_s29 + $0xd0] sm:$0xff] %v386_v26  ;;  %v392_v29 = vld [vmem:[%s6871_s28 + $0x160] sm:$0xff]  ;;  %389 = vst [vmem:[%s6876_s29 + $0xd8] sm:$0xff] %v388_v27 }
  0x22   : > { %391 = vst [vmem:[%s6876_s29 + $0xe0] sm:$0xff] %v390_v28  ;;  %393 = vst [vmem:[%s6876_s29 + $0xe8] sm:$0xff] %v392_v29 }
  0x23 PF: > { %408 = sbr.rel (!%p6855_p4) target bundleno = 55 (0x37), region = 67  ;;  %s410_s30 = sand.u32 (%p6855_p4), 1, %s6756_s14  }
  0x24   : > { %s6482_s11 = smul.u32 (%p6855_p4), 120, %s6760_s15 }
  0x25   : > { %s6580_s12 = smul.u32 (%p6855_p4), 240, %s410_s30 }
  0x26   : > { %s6942_s23 = scalar_lea.vmem (%p6855_p4), %s10524_s2, %s6482_s11 }
  0x27   : > { %v428_v30 = vld [vmem:[%s6942_s23] sm:$0xff] (%p6855_p4)  ;;  %v430_v31 = vld [vmem:[%s6942_s23 + $0x8] sm:$0xff] (%p6855_p4)  ;;  %v432_v32 = vld [vmem:[%s6942_s23 + $0x10] sm:$0xff] (%p6855_p4)  ;;  %s6947_s21 = scalar_lea.vmem (%p6855_p4), [#allocation3], %s6580_s12 }
  0x28   : > { %429 = vst [vmem:[%s6947_s21] sm:$0xff] %v428_v30  ;;  %431 = vst [vmem:[%s6947_s21 + $0x8] sm:$0xff] %v430_v31  ;;  %v434_v33 = vld [vmem:[%s6942_s23 + $0x18] sm:$0xff]  ;;  %v436_v34 = vld [vmem:[%s6942_s23 + $0x20] sm:$0xff] }
  0x29   : > { %433 = vst [vmem:[%s6947_s21 + $0x10] sm:$0xff] %v432_v32  ;;  %v438_v35 = vld [vmem:[%s6942_s23 + $0x28] sm:$0xff]  ;;  %435 = vst [vmem:[%s6947_s21 + $0x18] sm:$0xff] %v434_v33  ;;  %v440_v36 = vld [vmem:[%s6942_s23 + $0x30] sm:$0xff] }
  0x2a   : > { %437 = vst [vmem:[%s6947_s21 + $0x20] sm:$0xff] %v436_v34  ;;  %439 = vst [vmem:[%s6947_s21 + $0x28] sm:$0xff] %v438_v35  ;;  %v442_v37 = vld [vmem:[%s6942_s23 + $0x38] sm:$0xff]  ;;  %v444_v38 = vld [vmem:[%s6942_s23 + $0x40] sm:$0xff] }
  0x2b   : > { %441 = vst [vmem:[%s6947_s21 + $0x30] sm:$0xff] %v440_v36  ;;  %443 = vst [vmem:[%s6947_s21 + $0x38] sm:$0xff] %v442_v37  ;;  %v446_v39 = vld [vmem:[%s6942_s23 + $0x48] sm:$0xff]  ;;  %v448_v40 = vld [vmem:[%s6942_s23 + $0x50] sm:$0xff] }
  0x2c   : > { %445 = vst [vmem:[%s6947_s21 + $0x40] sm:$0xff] %v444_v38  ;;  %v450_v41 = vld [vmem:[%s6942_s23 + $0x58] sm:$0xff]  ;;  %447 = vst [vmem:[%s6947_s21 + $0x48] sm:$0xff] %v446_v39  ;;  %v452_v42 = vld [vmem:[%s6942_s23 + $0x60] sm:$0xff] }
  0x2d   : > { %449 = vst [vmem:[%s6947_s21 + $0x50] sm:$0xff] %v448_v40  ;;  %451 = vst [vmem:[%s6947_s21 + $0x58] sm:$0xff] %v450_v41  ;;  %v454_v43 = vld [vmem:[%s6942_s23 + $0x68] sm:$0xff]  ;;  %v456_v44 = vld [vmem:[%s6942_s23 + $0x70] sm:$0xff] }
  0x2e   : > { %453 = vst [vmem:[%s6947_s21 + $0x60] sm:$0xff] %v452_v42  ;;  %455 = vst [vmem:[%s6947_s21 + $0x68] sm:$0xff] %v454_v43  ;;  %v458_v45 = vld [vmem:[%s6942_s23 + $0xf0] sm:$0xff]  ;;  %v460_v46 = vld [vmem:[%s6942_s23 + $0xf8] sm:$0xff] }
  0x2f   : > { %457 = vst [vmem:[%s6947_s21 + $0x70] sm:$0xff] %v456_v44  ;;  %v462_v47 = vld [vmem:[%s6942_s23 + $0x100] sm:$0xff]  ;;  %459 = vst [vmem:[%s6947_s21 + $0x78] sm:$0xff] %v458_v45  ;;  %v464_v48 = vld [vmem:[%s6942_s23 + $0x108] sm:$0xff] }
  0x30   : > { %461 = vst [vmem:[%s6947_s21 + $0x80] sm:$0xff] %v460_v46  ;;  %463 = vst [vmem:[%s6947_s21 + $0x88] sm:$0xff] %v462_v47  ;;  %v466_v49 = vld [vmem:[%s6942_s23 + $0x110] sm:$0xff]  ;;  %v468_v50 = vld [vmem:[%s6942_s23 + $0x118] sm:$0xff] }
  0x31   : > { %465 = vst [vmem:[%s6947_s21 + $0x90] sm:$0xff] %v464_v48  ;;  %467 = vst [vmem:[%s6947_s21 + $0x98] sm:$0xff] %v466_v49  ;;  %v470_v51 = vld [vmem:[%s6942_s23 + $0x120] sm:$0xff]  ;;  %v472_v52 = vld [vmem:[%s6942_s23 + $0x128] sm:$0xff] }
  0x32   : > { %469 = vst [vmem:[%s6947_s21 + $0xa0] sm:$0xff] %v468_v50  ;;  %v474_v53 = vld [vmem:[%s6942_s23 + $0x130] sm:$0xff]  ;;  %471 = vst [vmem:[%s6947_s21 + $0xa8] sm:$0xff] %v470_v51  ;;  %v476_v54 = vld [vmem:[%s6942_s23 + $0x138] sm:$0xff] }
  0x33   : > { %473 = vst [vmem:[%s6947_s21 + $0xb0] sm:$0xff] %v472_v52  ;;  %475 = vst [vmem:[%s6947_s21 + $0xb8] sm:$0xff] %v474_v53  ;;  %v478_v55 = vld [vmem:[%s6942_s23 + $0x140] sm:$0xff]  ;;  %v480_v56 = vld [vmem:[%s6942_s23 + $0x148] sm:$0xff] }
  0x34   : > { %477 = vst [vmem:[%s6947_s21 + $0xc0] sm:$0xff] %v476_v54  ;;  %479 = vst [vmem:[%s6947_s21 + $0xc8] sm:$0xff] %v478_v55  ;;  %v482_v57 = vld [vmem:[%s6942_s23 + $0x150] sm:$0xff]  ;;  %v484_v58 = vld [vmem:[%s6942_s23 + $0x158] sm:$0xff] }
  0x35   : > { %481 = vst [vmem:[%s6947_s21 + $0xd0] sm:$0xff] %v480_v56  ;;  %v486_v59 = vld [vmem:[%s6942_s23 + $0x160] sm:$0xff]  ;;  %483 = vst [vmem:[%s6947_s21 + $0xd8] sm:$0xff] %v482_v57 }
  0x36   : > { %485 = vst [vmem:[%s6947_s21 + $0xe0] sm:$0xff] %v484_v58  ;;  %487 = vst [vmem:[%s6947_s21 + $0xe8] sm:$0xff] %v486_v59 }
  0x37 PF: > { %p6217_p7 = scmp.ge.s32.totalorder %s6760_s15, 1  ;;  %p492_p8 = scmp.lt.s32.totalorder %s6760_s15, 3 }
  0x39   : > { %p493_p9 = pnand %p6217_p7, %p492_p8 }
  0x3b   : > { %496 = sbr.rel (%p493_p9) target bundleno = 1229 (0x4cd), region = 90 }
  0x40   : > { %v706_v60 = vld [vmem:[%s10526_s4] sm:$0xff]  ;;  %s6218_s26 = sshll.u32 %s6840_s16, 2  ;;  %v10541_v61 = vlaneseq  ;;  %s6762_s27 = smov 103   ;;  %v707_v63 = vld [vmem:[%s10526_s4 + $0x8] sm:$0xff]  ;;  %v6763_v2 = vmov 0   ;;  %vm1736_vm0 = vcmask 138240  }
  0x41   : > { %1732 = vrot.lane.b32.xlu0 %v706_v60, %s6762_s27  ;;  %p563_p10 = scmp.lt.s32.totalorder %s6218_s26, 7  ;;  %v710_v62 = vld [vmem:[%s10528_s6] sm:$0xff]  ;;  %6613 = vset.pattern.permute.xlu1 %v6763_v2  ;;  %v711_v6 = vld [vmem:[%s10528_s6 + $0x8] sm:$0xff]  ;;  %v10710_v25 = vmov 0  ;;  %v10544_v27 = vmov 1.0   ;;  %v10713_v32 = vmov 0 }
  0x42   : > { %v7019_v0 = vshrl.u32 %v10541_v61, 7  ;;  %v7022_v1 = vand.u32 127, %v10541_v61  ;;  %6614 = vset.pattern.permute.xlu0 %v6763_v2  ;;  %v712_v3 = vld [vmem:[%s10529_s7] sm:$0xf]  ;;  %1722 = vperm.xlu1 %6613, %v710_v62   ;;  %v10716_v34 = vmov 0  ;;  %v10719_v36 = vmov 0 }
  0x43   : > { %s11494_s26 = smov (!%p563_p10, %s6218_s26), 7  ;;  %v10722_v37 = vmov 0  ;;  %v10725_v42 = vmov 0  ;;  %v10728_v44 = vmov 0  ;;  %v10731_v53 = vmov 0  ;;  %s499_s28 = sand.u32 1, %s6752_s13  }
  0x44   : > { %10709 = vst [vmem:[#allocation5_spill] sm:$0xff] %v7019_v0  ;;  %v1384_v4 = vsub.s32 0, %v7019_v0  ;;  %v1392_v5 = vsub.s32 1, %v7019_v0  ;;  %s6219_s23 = sshll.u32 %s11494_s26, 3  ;;  %v1399_v7 = vadd.s32 24, %v7019_v0  ;;  %v7037_v8 = vadd.s32 128, %v7022_v1 }
  0x45   : > { %1734 = vrot.lane.b32.xlu0 %v707_v63, %s6762_s27  ;;  %s566_s25 = scalar_lea.vmem %s10523_s1, %s6219_s23  ;;  %v1398_v11 = vadd.s32 16, %v7019_v0  ;;  %s6764_s27 = smov 112   ;;  %v7059_v26 = vadd.s32 640, %v7022_v1  ;;  %v1405_v38 = vadd.s32 512, %v7022_v1  ;;  %v895_v45 = vadd.s32 8, %v7019_v0 }
  0x46   : > { %v1385_v9 = vrot.slane %v712_v3, %v1384_v4  ;;  %v1393_v10 = vrot.slane %v712_v3, %v1392_v5  ;;  %v615_v12 = vld [vmem:[%s566_s25 + $0x18] sm:$0xff]  ;;  %v614_v13 = vld [vmem:[%s566_s25 + $0x10] sm:$0xff]  ;;  %v613_v14 = vld [vmem:[%s566_s25 + $0x8] sm:$0xff]  ;;  %1727 = vperm.xlu1 %6613, %v711_v6   ;;  %v7045_v15 = vmul.u32 60, %v1399_v7  ;;  %v7134_v50 = vmul.u32 60, %v7019_v0  ;;  %s7242_s29 = smul.u32 240, %s499_s28 }
  0x47   : > { %v7051_v20 = vmul.u32 60, %v1398_v11  ;;  %v612_v24 = vld [vmem:[%s566_s25] sm:$0xff]  ;;  %v7126_v46 = vmul.u32 60, %v895_v45  ;;  %v10734_v54 = vmov 0  ;;  %v10737_v55 = vmov 0  ;;  %s569_s21 = smul.u32 15, %s6840_s16 }
  0x48   : > { %v1389_v16 = vsub.f32 %v615_v12, %v1385_v9  ;;  %v1388_v17 = vsub.f32 %v614_v13, %v1385_v9  ;;  %v1466_v18 = vsub.s32 %v7037_v8, %v7045_v15  ;;  %v1465_v19 = vsub.s32 %v7022_v1, %v7045_v15  ;;  %s7245_s30 = scalar_lea.vmem [#allocation2], %s7242_s29  ;;  %s9077_s13 = scalar_lea.vmem [#allocation3], %s7242_s29 }
  0x49   : > { %2449 = vrot.lane.b32.xlu0 %v706_v60, %s6764_s27  ;;  %v1387_v23 = vsub.f32 %v613_v14, %v1385_v9  ;;  %v1451_v28 = vsub.s32 %v7037_v8, %v7051_v20  ;;  %v1450_v29 = vsub.s32 %v7022_v1, %v7051_v20  ;;  %v1386_v31 = vsub.f32 %v612_v24, %v1385_v9  ;;  %s9293_s24 = scalar_lea.vmem [#allocation4], %s7242_s29  ;;  %p9842_p11 = scmp.lt.s32.totalorder %s569_s21, 29 }
  0x4a   : > { %v1397_v21 = vmul.f32 %v1393_v10, %v1389_v16  ;;  %v1396_v22 = vmul.f32 %v1393_v10, %v1388_v17  ;;  %2451 = vrot.lane.b32.xlu1 %v707_v63, %s6764_s27  ;;  %vm1526_vm1 = vcmp.ge.s32.totalorder %v1466_v18, 0  ;;  %vm1586_vm2 = vcmp.lt.s32.totalorder %v1466_v18, 60  ;;  %v7248_v17 = vld [vmem:[%s7245_s30 + $0x18] sm:$0xff]  ;;  %s6483_s26 = smul.u32 (%p6859_p5), 120, %s6840_s16 }
  0x4b   : > { %vm7054_vm3 = vmand %vm1526_vm1, %vm1586_vm2  ;;  %vm1525_vm4 = vcmp.ge.s32.totalorder %v1465_v19, 0  ;;  %vm1585_vm5 = vcmp.lt.s32.totalorder %v1465_v19, 60  ;;  %v1395_v30 = vmul.f32 %v1393_v10, %v1387_v23  ;;  %vm1511_vm7 = vcmp.ge.s32.totalorder %v1451_v28, 0  ;;  %v7253_v18 = vld [vmem:[%s10525_s3 + $0x18] sm:$0xff]  ;;  %s11496_s21 = smov (!%p9842_p11, %s569_s21), 29 }
  0x4c   : > { %6518 = vmatprep.subr.msk.mxu0 %vm1736_vm0, %v1397_v21  ;;  %v10711_v25 = vsel %vm7054_vm3, 4294967295, %v10710_v25  ;;  %6229 = vmatprep.subr.msk.mxu1 %vm7054_vm3, %v10544_v27  ;;  %vm7070_vm6 = vmand %vm1525_vm4, %vm1585_vm5  ;;  %vm1571_vm8 = vcmp.lt.s32.totalorder %v1451_v28, 60  ;;  %v1470_v33 = vsub.s32 %v7059_v26, %v7045_v15  ;;  %vm1510_vm10 = vcmp.ge.s32.totalorder %v1450_v29, 0  ;;  %v7265_v28 = vld [vmem:[%s10525_s3 + $0x10] sm:$0xff]  ;;  %s6220_s19 = sshll.u32 %s11496_s21, 3 }
  0x4d   : > { %10712 = vst [vmem:[#allocation6_spill] sm:$0xff] %v10711_v25  ;;  %6519 = vmatpush3.xpose.msk.msra.mxu0 %vm1736_vm0, %v1397_v21  ;;  %v10714_v32 = vsel %vm7070_vm6, 4294967295, %v10713_v32  ;;  %6230 = vmatpush1.msk.msra.mxu1 %vm7070_vm6, %v10544_v27  ;;  %vm7079_vm9 = vmand %vm1511_vm7, %vm1571_vm8  ;;  %vm1570_vm11 = vcmp.lt.s32.totalorder %v1450_v29, 60  ;;  %v1394_v35 = vmul.f32 %v1393_v10, %v1386_v31  ;;  %v1469_v39 = vsub.s32 %v1405_v38, %v7045_v15  ;;  %v7276_v31 = vld [vmem:[%s10525_s3 + $0x90] sm:$0xff]  ;;  %s9975_s15 = scalar_lea.vmem %s10530_s8, %s6220_s19  ;;  %s10456_s19 = scalar_lea.vmem (%p6859_p5), %s10532_s10, %s6483_s26 }
  0x4e   : > { %6520 = vmatprep.subr.msk.mxu0 %vm1736_vm0, %v1396_v22  ;;  %10715 = vst [vmem:[#allocation7_spill] sm:$0xff] %v10714_v32  ;;  %v10717_v34 = vsel %vm7079_vm9, 4294967295, %v10716_v34  ;;  %6231 = vmatprep.subr.msk.mxu1 %vm7079_vm9, %v10544_v27  ;;  %vm7088_vm12 = vmand %vm1510_vm10, %vm1570_vm11  ;;  %vm1530_vm13 = vcmp.ge.s32.totalorder %v1470_v33, 0  ;;  %vm1590_vm14 = vcmp.lt.s32.totalorder %v1470_v33, 60  ;;  %v1455_v40 = vsub.s32 %v7059_v26, %v7051_v20 }
  0x4f   : > { %10718 = vst [vmem:[#allocation8_spill] sm:$0xff] %v10717_v34  ;;  %v10720_v36 = vsel %vm7088_vm12, 4294967295, %v10719_v36  ;;  %6232 = vmatpush1.msk.msra.mxu1 %vm7088_vm12, %v10544_v27  ;;  %vm7097_vm15 = vmand %vm1530_vm13, %vm1590_vm14  ;;  %vm1529_vm1 = vcmp.ge.s32.totalorder %v1469_v39, 0  ;;  %vm1589_vm2 = vcmp.lt.s32.totalorder %v1469_v39, 60  ;;  %v1454_v47 = vsub.s32 %v1405_v38, %v7051_v20 }
  0x50   : > { %10721 = vst [vmem:[#allocation9_spill] sm:$0xff] %v10720_v36  ;;  %v10723_v37 = vsel %vm7097_vm15, 4294967295, %v10722_v37  ;;  %vm1515_vm4 = vcmp.ge.s32.totalorder %v1455_v40, 0  ;;  %vm1575_vm5 = vcmp.lt.s32.totalorder %v1455_v40, 60  ;;  %vm7110_vm7 = vmand %vm1529_vm1, %vm1589_vm2  ;;  %v1436_v48 = vsub.s32 %v7037_v8, %v7126_v46 }
  0x51   : > { %6521 = vmatpush3.xpose.msk.msra.mxu0 %vm1736_vm0, %v1396_v22  ;;  %10724 = vst [vmem:[#allocation10_spill] sm:$0xff] %v10723_v37  ;;  %v10726_v42 = vsel %vm7110_vm7, 4294967295, %v10725_v42  ;;  %vm7114_vm8 = vmand %vm1515_vm4, %vm1575_vm5  ;;  %v1440_v49 = vsub.s32 %v7059_v26, %v7126_v46  ;;  %vm1574_vm10 = vcmp.lt.s32.totalorder %v1454_v47, 60  ;;  %v1435_v51 = vsub.s32 %v7022_v1, %v7126_v46 }
  0x52   : > { %6522 = vmatprep.subr.msk.mxu0 %vm1736_vm0, %v1395_v30  ;;  %10727 = vst [vmem:[#allocation11_spill] sm:$0xff] %v10726_v42  ;;  %v10729_v44 = vsel %vm7114_vm8, 4294967295, %v10728_v44  ;;  %v1439_v52 = vsub.s32 %v1405_v38, %v7126_v46  ;;  %vm1496_vm13 = vcmp.ge.s32.totalorder %v1436_v48, 0  ;;  %vm1556_vm14 = vcmp.lt.s32.totalorder %v1436_v48, 60  ;;  %v7295_v48 = vld [vmem:[%s10525_s3 + $0x88] sm:$0xff]  ;;  %v7360_v42 = vld [vmem:[%s10525_s3 + $0x38] sm:$0xff] }
  0x53   : > { %10730 = vst [vmem:[#allocation12_spill] sm:$0xff] %v10729_v44  ;;  %vm1500_vm1 = vcmp.ge.s32.totalorder %v1440_v49, 0  ;;  %vm1560_vm2 = vcmp.lt.s32.totalorder %v1440_v49, 60  ;;  %vm7146_vm4 = vmand %vm1496_vm13, %vm1556_vm14  ;;  %vm1495_vm5 = vcmp.ge.s32.totalorder %v1435_v51, 0  ;;  %v1421_v56 = vsub.s32 %v7037_v8, %v7134_v50 }
  0x54   : > { %v10735_v54 = vsel %vm7146_vm4, 4294967295, %v10734_v54  ;;  %6233 = vmatprep.subr.msk.mxu1 %vm7146_vm4, %v10544_v27  ;;  %v1425_v57 = vsub.s32 %v7059_v26, %v7134_v50  ;;  %v1420_v58 = vsub.s32 %v7022_v1, %v7134_v50  ;;  %v1424_v59 = vsub.s32 %v1405_v38, %v7134_v50  ;;  %v7260_v26 = vld [vmem:[%s7245_s30 + $0x10] sm:$0xff] }
  0x55   : > { %6523 = vmatpush3.xpose.msk.msra.mxu0 %vm1736_vm0, %v1395_v30  ;;  %10736 = vst [vmem:[#allocation14_spill] sm:$0xff] %v10735_v54  ;;  %v10740_v60 = vmov 0  ;;  %v1404_v62 = vadd.s32 384, %v7022_v1  ;;  %v1410_v63 = vadd.s32 1152, %v7022_v1  ;;  %v10743_v2 = vmov 0  ;;  %10764 = vst [vmem:[#allocation24_spill] sm:$0xff] %v7260_v26 }
  0x56   : > { %6524 = vmatprep.subr.msk.mxu0 %vm1736_vm0, %v1394_v35  ;;  %vm1481_vm14 = vcmp.ge.s32.totalorder %v1421_v56, 0  ;;  %v10746_v3 = vmov 0  ;;  %vm1484_vm6 = vcmp.ge.s32.totalorder %v1424_v59, 0  ;;  %v10749_v4 = vmov 0 }
  0x57   : > { %v10542_v5 = vmov 0.0   ;;  %v1468_v6 = vsub.s32 %v1404_v62, %v7045_v15  ;;  %v1474_v7 = vsub.s32 %v1410_v63, %v7045_v15  ;;  %v10752_v8 = vmov 0 }
  0x58   : > { %1899 = vmatprep.mubr.f32.mxu1 %v10542_v5  ;;  %v10755_v9 = vmov 0  ;;  %v10758_v10 = vmov 0  ;;  %v10761_v11 = vmov 0  ;;  %v7230_v12 = vsub.s32 %v1404_v62, %v7126_v46 }
  0x59   : > { %6525 = vmatpush3.xpose.msk.msra.mxu0 %vm1736_vm0, %v1394_v35  ;;  %vm1594_vm3 = vcmp.lt.s32.totalorder %v1474_v7, 60  ;;  %v7233_v13 = vsub.s32 %v1410_v63, %v7126_v46  ;;  %v7236_v14 = vsub.s32 %v1404_v62, %v7134_v50  ;;  %v7239_v16 = vsub.s32 %v1410_v63, %v7134_v50 }
  0x5a   : > { %6249 = vmatprep.subr.msk.mxu0 %vm7097_vm15, %v10544_v27  ;;  %vm1499_vm15 = vcmp.ge.s32.totalorder %v1439_v52, 0  ;;  %v776_v19 = vsub.f32 0.0, %v7248_v17  ;;  %v806_v21 = vrot.slane %v7253_v18, 6  ;;  %v1403_v23 = vadd.s32 256, %v7022_v1 }
  0x5b   : > { %v1409_v24 = vadd.s32 1024, %v7022_v1  ;;  %v7268_v29 = vsub.s32 3, %v7019_v0  ;;  %v7271_v30 = vsub.s32 2, %v7019_v0  ;;  %v775_v39 = vsub.f32 0.0, %v7260_v26 }
  0x5c   : > { %v836_v22 = vmul.f32 %v806_v21, %v776_v19  ;;  %v7279_v35 = vsub.s32 %v1403_v23, %v7045_v15  ;;  %v805_v40 = vrot.slane %v7265_v28, 6  ;;  %v1414_v45 = vadd.s32 1664, %v7022_v1 }
  0x5d   : > { %10765 = vst [vmem:[#allocation25_spill] sm:$0xff] %v7268_v29  ;;  %10766 = vst [vmem:[#allocation26_spill] sm:$0xff] %v7271_v30  ;;  %v7282_v38 = vsub.s32 %v1409_v24, %v7045_v15  ;;  %v7298_v49 = vsub.s32 %v1410_v63, %v7051_v20  ;;  %v7318_v63 = vld [vmem:[%s10525_s3 + $0x108] sm:$0xff]  ;;  %v1412_v44 = vadd.s32 1408, %v7022_v1  ;;  %v810_v25 = vrot.slane %v7360_v42, 6 }
  0x5e   : > { %v854_v33 = vmul.f32 1.442695, %v836_v22  ;;  %v835_v21 = vmul.f32 %v805_v40, %v775_v39  ;;  %v7331_v61 = vsub.s32 %v1414_v45, %v7045_v15  ;;  %v7349_v40 = vsub.s32 %v1414_v45, %v7051_v20 }
  0x5f   : > { %v1223_v26 = vrot.slane %v7295_v48, 3  ;;  %vm10929_vm9 = vcmp.eq.s32.totalorder %v7019_v0, 2 }
  0x60   : > { %6615 = vpow2.f32 %v854_v33  ;;  %10767 = vst [vmem:[#allocation27_spill] sm:$0xff] %v7349_v40 }
  0xb3   : > { %v1733_v41 = vpop.permute.xlu0 %1732 }
  0xb4   : > { %6526 = vmatprep.mubr.msk.f32.mxu0 %vm1736_vm0, %v1733_v41  ;;  %v7287_v41 = vsub.s32 %v1404_v62, %v7051_v20  ;;  %v600_v62 = vld [vmem:[%s7245_s30 + $0x90] sm:$0x1] }
  0xb7   : > { %v1735_v43 = vpop.permute.xlu0 %1734 }
  0xb8   : > { %6527 = vmatmul.mubr.msk.f32.vlgmr.msra.gmra.mxu0 %vm1736_vm0, %v1735_v43  ;;  %vm1514_vm0 = vcmp.ge.s32.totalorder %v1454_v47, 0  ;;  %v1408_v43 = vadd.s32 896, %v7022_v1  ;;  %v1407_v47 = vadd.s32 768, %v7022_v1 }
  0xb9   : > { %6250 = vmatpush1.msk.msra.mxu0 %vm7110_vm7, %v10544_v27  ;;  %vm7139_vm11 = vmand %vm1514_vm0, %vm1574_vm10  ;;  %vm1555_vm7 = vcmp.lt.s32.totalorder %v1435_v51, 60  ;;  %2053 = vmatprep.mubr.f32.mxu0 %v10542_v5  ;;  %v7301_v51 = vsub.s32 %v1403_v23, %v7051_v20 }
  0xba   : > { %6251 = vmatprep.subr.msk.mxu0 %vm7114_vm8, %v10544_v27  ;;  %v10732_v53 = vsel %vm7139_vm11, 4294967295, %v10731_v53  ;;  %vm1559_vm8 = vcmp.lt.s32.totalorder %v1439_v52, 60  ;;  %vm7153_vm0 = vmand %vm1500_vm1, %vm1560_vm2  ;;  %vm1541_vm1 = vcmp.lt.s32.totalorder %v1421_v56, 60  ;;  %vm1485_vm2 = vcmp.ge.s32.totalorder %v1425_v57, 0 }
  0xbb   : > { %10733 = vst [vmem:[#allocation13_spill] sm:$0xff] %v10732_v53  ;;  %6252 = vmatpush1.msk.msra.mxu0 %vm7139_vm11, %v10544_v27  ;;  %v10738_v55 = vsel %vm7153_vm0, 4294967295, %v10737_v55  ;;  %vm7167_vm10 = vmand %vm1495_vm5, %vm1555_vm7  ;;  %vm1545_vm11 = vcmp.lt.s32.totalorder %v1425_v57, 60  ;;  %vm1480_vm5 = vcmp.ge.s32.totalorder %v1420_v58, 0  ;;  %v1413_v52 = vadd.s32 1536, %v7022_v1 }
  0xbc   : > { %10739 = vst [vmem:[#allocation15_spill] sm:$0xff] %v10738_v55  ;;  %6253 = vmatprep.subr.msk.mxu0 %vm7153_vm0, %v10544_v27  ;;  %v10741_v60 = vsel %vm7167_vm10, 4294967295, %v10740_v60  ;;  %6234 = vmatpush1.msk.msra.mxu1 %vm7167_vm10, %v10544_v27  ;;  %vm7176_vm13 = vmand %vm1499_vm15, %vm1559_vm8  ;;  %vm1540_vm0 = vcmp.lt.s32.totalorder %v1420_v58, 60  ;;  %vm1544_vm8 = vcmp.lt.s32.totalorder %v1424_v59, 60  ;;  %v10552_v56 = vrot.slane %v7276_v31, 2 }
  0xbd   : > { %10742 = vst [vmem:[#allocation16_spill] sm:$0xff] %v10741_v60  ;;  %v10744_v2 = vsel %vm7176_vm13, 4294967295, %v10743_v2  ;;  %6254 = vmatpush1.msk.msra.mxu0 %vm7176_vm13, %v10544_v27  ;;  %vm7183_vm7 = vmand %vm1481_vm14, %vm1541_vm1  ;;  %vm1528_vm1 = vcmp.ge.s32.totalorder %v1468_v6, 0  ;;  %vm1534_vm13 = vcmp.ge.s32.totalorder %v1474_v7, 0  ;;  %v7306_v57 = vsub.s32 %v1409_v24, %v7051_v20 }
  0xbe   : > { %10745 = vst [vmem:[#allocation17_spill] sm:$0xff] %v10744_v2  ;;  %v10747_v3 = vsel %vm7183_vm7, 4294967295, %v10746_v3  ;;  %6235 = vmatprep.subr.msk.mxu1 %vm7183_vm7, %v10544_v27  ;;  %vm7190_vm15 = vmand %vm1485_vm2, %vm1545_vm11  ;;  %vm1588_vm2 = vcmp.lt.s32.totalorder %v1468_v6, 60  ;;  %v7309_v58 = vsub.s32 %v1403_v23, %v7126_v46  ;;  %v7312_v59 = vsub.s32 %v1409_v24, %v7126_v46  ;;  %v7400_v2 = vld [vmem:[%s10525_s3 + $0xb0] sm:$0xff] }
  0xbf   : > { %10748 = vst [vmem:[#allocation18_spill] sm:$0xff] %v10747_v3  ;;  %v10750_v4 = vsel %vm7190_vm15, 4294967295, %v10749_v4  ;;  %6255 = vmatprep.subr.msk.mxu0 %vm7190_vm15, %v10544_v27  ;;  %vm7200_vm14 = vmand %vm1480_vm5, %vm1540_vm0  ;;  %v7321_v6 = vsub.s32 %v1403_v23, %v7134_v50  ;;  %v7324_v7 = vsub.s32 %v1409_v24, %v7134_v50  ;;  %v7328_v22 = vsub.s32 %v1408_v43, %v7045_v15  ;;  %v599_v23 = vld [vmem:[%s7245_s30 + $0x88] sm:$0x1]  ;;  %v7343_v24 = vld [vmem:[%s10525_s3 + $0x100] sm:$0xff] }
  0xc0   : > { %10751 = vst [vmem:[#allocation19_spill] sm:$0xff] %v10750_v4  ;;  %v10753_v8 = vsel %vm7200_vm14, 4294967295, %v10752_v8  ;;  %6236 = vmatpush1.msk.msra.mxu1 %vm7200_vm14, %v10544_v27  ;;  %vm7208_vm11 = vmand %vm1484_vm6, %vm1544_vm8  ;;  %v7334_v5 = vsub.s32 %v1407_v47, %v7045_v15  ;;  %v7337_v33 = vsub.s32 %v1408_v43, %v7051_v20  ;;  %v7346_v39 = vsub.s32 %v1413_v52, %v7045_v15 }
  0xc1   : > { %10754 = vst [vmem:[#allocation20_spill] sm:$0xff] %v10753_v8  ;;  %v10756_v9 = vsel %vm7208_vm11, 4294967295, %v10755_v9  ;;  %6256 = vmatpush1.msk.msra.mxu0 %vm7208_vm11, %v10544_v27  ;;  %vm7215_vm0 = vmand %vm1528_vm1, %vm1588_vm2  ;;  %v7363_v37 = vsub.s32 %v1407_v47, %v7051_v20  ;;  %v7366_v53 = vsub.s32 %v1413_v52, %v7051_v20  ;;  %v852_v55 = vmul.f32 1.442695, %v835_v21 }
  0xc2   : > { %10757 = vst [vmem:[#allocation21_spill] sm:$0xff] %v10756_v9  ;;  %v10759_v10 = vsel %vm7215_vm0, 4294967295, %v10758_v10  ;;  %6239 = vmatprep.subr.msk.mxu1 %vm7215_vm0, %v10544_v27  ;;  %vm7222_vm6 = vmand %vm1534_vm13, %vm1594_vm3  ;;  %v7379_v9 = vsub.s32 %v1414_v45, %v7126_v46  ;;  %v7382_v4 = vsub.s32 %v1407_v47, %v7126_v46  ;;  %v7387_v36 = vsub.s32 %v1413_v52, %v7126_v46 }
  0xc3   : > { %10760 = vst [vmem:[#allocation22_spill] sm:$0xff] %v10759_v10  ;;  %v10762_v11 = vsel %vm7222_vm6, 4294967295, %v10761_v11  ;;  %6269 = vmatprep.subr.msk.mxu0 %vm7222_vm6, %v10544_v27  ;;  %v1189_v27 = vsub.f32 %v600_v62, %v10552_v56  ;;  %10769 = vst [vmem:[#allocation29_spill] sm:$0xff] %v7363_v37  ;;  %v7370_v10 = vadd.s32 1280, %v7022_v1  ;;  %v7373_v62 = vsub.s32 %v1408_v43, %v7126_v46 }
  0xc4   : > { %10763 = vst [vmem:[#allocation23_spill] sm:$0xff] %v10762_v11  ;;  %v7355_v11 = vld [vmem:[%s7245_s30 + $0x38] sm:$0xff]  ;;  %10770 = vst [vmem:[#allocation30_spill] sm:$0xff] %v7366_v53  ;;  %v10772_v56 = vrot.slane %v7295_v48, 2  ;;  %v7390_v34 = vsub.s32 %v1408_v43, %v7134_v50  ;;  %v10778_v21 = vrot.slane %v7318_v63, 3  ;;  %v7403_v60 = vsub.s32 %v1407_v47, %v7134_v50 }
  0xc5   : > { %10768 = vst [vmem:[#allocation28_spill] sm:$0xff] %v7355_v11  ;;  %10771 = vst [vmem:[#allocation31_spill] sm:$0xff] %v7373_v62  ;;  %v780_v32 = vsub.f32 0.0, %v7355_v11  ;;  %v7406_v54 = vsub.s32 %v1413_v52, %v7134_v50  ;;  %v7409_v43 = vsub.s32 %v1412_v44, %v7045_v15  ;;  %v7424_v47 = vsub.s32 %v1412_v44, %v7051_v20 }
  0xc6   : > { %v1188_v19 = vsub.f32 %v599_v23, %v10772_v56  ;;  %10773 = vst [vmem:[#allocation32_spill] sm:$0xff] %v7379_v9  ;;  %10774 = vst [vmem:[#allocation33_spill] sm:$0xff] %v7382_v4  ;;  %v7393_v56 = vsub.s32 %v1414_v45, %v7134_v50  ;;  %v1310_v23 = vmul.f32 %v10778_v21, %v1189_v27  ;;  %v7416_v27 = vld [vmem:[%s7245_s30 + $0x30] sm:$0xff]  ;;  %v10786_v8 = vrot.slane %v7343_v24, 3 }
  0xc7   : > { %10775 = vst [vmem:[#allocation34_spill] sm:$0xff] %v7387_v36  ;;  %10776 = vst [vmem:[#allocation35_spill] sm:$0xff] %v7390_v34  ;;  %v7413_v45 = vsub.s32 %v7370_v10, %v7045_v15  ;;  %v7421_v21 = vld [vmem:[%s10525_s3 + $0x30] sm:$0xff]  ;;  %v7428_v52 = vsub.s32 %v7370_v10, %v7051_v20  ;;  %6617 = vpow2.f32 %v852_v55  ;;  %v7451_v55 = vld [vmem:[%s10525_s3 + $0x8] sm:$0xff]  ;;  %v1105_v11 = vrot.slane %v7253_v18, 2 }
  0xc8   : > { %10777 = vst [vmem:[#allocation36_spill] sm:$0xff] %v7393_v56  ;;  %10779 = vst [vmem:[#allocation37_spill] sm:$0xff] %v7403_v60  ;;  %v1309_v3 = vmul.f32 %v10786_v8, %v1188_v19  ;;  %vm1340_vm3 = vcmp.ne.f32.partialorder %v1310_v23, %v1310_v23  ;;  %v7454_v8 = vsub.s32 %v1412_v44, %v7134_v50  ;;  %v604_v19 = vld [vmem:[%s7245_s30 + $0xb0] sm:$0x1]  ;;  %v7467_v60 = vld [vmem:[%s7245_s30] sm:$0xff]  ;;  %v1226_v18 = vrot.slane %v7276_v31, 3 }
  0xc9   : > { %10780 = vst [vmem:[#allocation38_spill] sm:$0xff] %v7406_v54  ;;  %10781 = vst [vmem:[#allocation39_spill] sm:$0xff] %v7409_v43  ;;  %v7438_v43 = vsub.s32 %v1412_v44, %v7126_v46  ;;  %v7446_v54 = vld [vmem:[%s7245_s30 + $0x8] sm:$0xff]  ;;  %v7472_v44 = vld [vmem:[%s10525_s3] sm:$0xff]  ;;  %v804_v34 = vrot.slane %v7451_v55, 6  ;;  %v1102_v36 = vrot.slane %v7265_v28, 2 }
  0xca   : > { %10782 = vst [vmem:[#allocation40_spill] sm:$0xff] %v7413_v45  ;;  %10783 = vst [vmem:[#allocation41_spill] sm:$0xff] %v7416_v27  ;;  %v7435_v45 = vld [vmem:[%s10525_s3 + $0xa8] sm:$0xff]  ;;  %v774_v56 = vsub.f32 0.0, %v7446_v54  ;;  %v10792_v4 = vrot.slane %v7400_v2, 2  ;;  %v773_v40 = vsub.f32 0.0, %v7467_v60  ;;  %vm10795_vm6 = vcmp.ne.f32.partialorder %v1309_v3, %v1309_v3 }
  0xcb   : > { %10784 = vst [vmem:[#allocation42_spill] sm:$0xff] %v7424_v47  ;;  %10785 = vst [vmem:[#allocation43_spill] sm:$0xff] %v7428_v52  ;;  %v7442_v47 = vsub.s32 %v7370_v10, %v7126_v46  ;;  %v840_v52 = vmul.f32 %v810_v25, %v780_v32  ;;  %v779_v25 = vsub.f32 0.0, %v7416_v27  ;;  %v809_v32 = vrot.slane %v7421_v21, 6  ;;  %v7485_v27 = vld [vmem:[%s10525_s3 + $0x120] sm:$0xff] }
  0xcc   : > { %10787 = vst [vmem:[#allocation44_spill] sm:$0xff] %v7438_v43  ;;  %10789 = vst [vmem:[#allocation46_spill] sm:$0xff] %v7446_v54  ;;  %v7460_v43 = vld [vmem:[%s10525_s3 + $0x128] sm:$0xff]  ;;  %v1193_v9 = vsub.f32 %v604_v19, %v10792_v4  ;;  %v803_v54 = vrot.slane %v7472_v44, 6  ;;  %v1415_v28 = vadd.s32 1792, %v7022_v1  ;;  %v7519_v1 = vsel %vm10795_vm6, 0.0, %v1309_v3 }
  0xcd   : > { %10788 = vst [vmem:[#allocation45_spill] sm:$0xff] %v7442_v47  ;;  %10790 = vst [vmem:[#allocation47_spill] sm:$0xff] %v7454_v8  ;;  %v7474_v8 = vpop.eup %6615  ;;  %v603_v47 = vld [vmem:[%s7245_s30 + $0xa8] sm:$0x1]  ;;  %v862_v53 = vmul.f32 1.442695, %v840_v52  ;;  %v839_v37 = vmul.f32 %v809_v32, %v779_v25  ;;  %v834_v32 = vmul.f32 %v804_v34, %v774_v56 }
  0xce   : > { %10791 = vst [vmem:[#allocation48_spill] sm:$0xff] %v7467_v60  ;;  %v881_v4 = vsub.f32 1.0, %v7474_v8  ;;  %v10793_v52 = vrot.slane %v7435_v45, 2  ;;  %v7509_v25 = vsel %vm1340_vm3, 0.0, %v1310_v23  ;;  %v7514_v8 = vsub.s32 %v7370_v10, %v7134_v50  ;;  %10796 = vst [vmem:[#allocation50_spill] sm:$0xff] %v7519_v1  ;;  %v7531_v34 = vld [vmem:[%s10525_s3 + $0x80] sm:$0xff] }
  0xcf   : > { %10794 = vst [vmem:[#allocation49_spill] sm:$0xff] %v7509_v25  ;;  %vm10798_vm2 = vcmask 1045504   ;;  %v10799_v23 = vrot.slane %v7460_v43, 3  ;;  %6619 = vpow2.f32 %v862_v53  ;;  %v10800_v3 = vrot.slane %v7318_v63, 3  ;;  %v7667_v25 = vld [vmem:[%s7245_s30 + $0x50] sm:$0xff]  ;;  %v10889_v60 = vld [vmem:[#allocation24_spill] sm:$0xff] }
  0xd0   : > { %v1192_v19 = vsub.f32 %v603_v47, %v10793_v52  ;;  %v10797_v47 = vrot.slane %v7276_v31, 2  ;;  %vm10801_vm6 = vcmask 1044480   ;;  %v860_v53 = vmul.f32 1.442695, %v839_v37  ;;  %10837 = vst [vmem:[#allocation62_spill] sm:$0xff] %v7667_v25 }
  0xd1   : > { %v1314_v62 = vmul.f32 %v10799_v23, %v1193_v9  ;;  %v7538_v10 = vsel %vm10801_vm6, %v1226_v18, %v10800_v3  ;;  %v833_v9 = vmul.f32 %v803_v54, %v773_v40  ;;  %v915_v56 = vrot.slane %v881_v4, %v7268_v29  ;;  %vm10804_vm3 = vmmov %vm10801_vm6  ;;  %v598_v23 = vld [vmem:[%s7245_s30 + $0x80] sm:$0x1]  ;;  %v7585_v3 = vld [vmem:[%s10525_s3 + $0xf8] sm:$0xff] }
  0xd2   : > { %v7524_v52 = vsel %vm10798_vm2, %v1105_v11, %v10797_v47  ;;  %v10802_v11 = vrot.slane %v7295_v48, 2  ;;  %v10803_v47 = vrot.slane %v7343_v24, 3  ;;  %v7554_v18 = vsub.s32 %v1415_v28, %v7045_v15  ;;  %v7572_v15 = vld [vmem:[%s10525_s3 + $0x78] sm:$0xff] }
  0xd3   : > { %v10806_v48 = vrot.slane %v7485_v27, 3  ;;  %v7563_v37 = vsub.s32 %v1415_v28, %v7051_v20  ;;  %v7566_v54 = vsub.s32 %v1415_v28, %v7126_v46  ;;  %v850_v24 = vmul.f32 1.442695, %v834_v32 }
  0xd4   : > { %v7543_v31 = vsel %vm10798_vm2, %v1102_v36, %v10802_v11  ;;  %v7551_v63 = vsel %vm10804_vm3, %v1223_v26, %v10803_v47  ;;  %10805 = vst [vmem:[#allocation51_spill] sm:$0xff] %v7554_v18  ;;  %v10590_v26 = vrot.slane %v7531_v34, 2  ;;  %v7574_v40 = vpop.eup %6617  ;;  %v1117_v20 = vrot.slane %v7360_v42, 2  ;;  %v7631_v47 = vld [vmem:[%s7245_s30 + $0x58] sm:$0xff]  ;;  %v10888_v18 = vld [vmem:[#allocation29_spill] sm:$0xff] }
  0xd5   : > { %v7558_v36 = vmul.f32 %v10806_v48, %v1192_v19  ;;  %10807 = vst [vmem:[#allocation52_spill] sm:$0xff] %v7563_v37  ;;  %10808 = vst [vmem:[#allocation53_spill] sm:$0xff] %v7566_v54  ;;  %v1238_v46 = vrot.slane %v7400_v2, 3  ;;  %v1114_v19 = vrot.slane %v7421_v21, 2  ;;  %v1005_v32 = vrot.slane %v881_v4, %v7271_v30  ;;  %v7636_v48 = vld [vmem:[%s10525_s3 + $0x58] sm:$0xff] }
  0xd6   : > { %6621 = vpow2.f32 %v860_v53  ;;  %v1235_v42 = vrot.slane %v7435_v45, 3  ;;  %v848_v11 = vmul.f32 1.442695, %v833_v9  ;;  %vm10809_vm6 = vcmp.lt.s32.totalorder %v7279_v35, 60  ;;  %10821 = vst [vmem:[#allocation57_spill] sm:$0xff] %v7631_v47 }
  0xd7   : > { %vm10810_vm5 = vcmp.ge.s32.totalorder %v7279_v35, 0  ;;  %v10811_v21 = vmov 0  ;;  %vm10814_vm1 = vcmp.lt.s32.totalorder %v7282_v38, 60  ;;  %vm10815_vm13 = vcmp.ge.s32.totalorder %v7282_v38, 0  ;;  %v7620_v38 = vld [vmem:[%s10525_s3 + $0xf0] sm:$0xff] }
  0xd8   : > { %vm7595_vm2 = vmand %vm10810_vm5, %vm10809_vm6  ;;  %v10816_v4 = vmov 0  ;;  %vm10819_vm11 = vcmp.eq.s32.totalorder %v7019_v0, 3  ;;  %v7615_v53 = vsub.s32 %v1415_v28, %v7134_v50  ;;  %v597_v28 = vld [vmem:[%s7245_s30 + $0x78] sm:$0x1]  ;;  %6623 = vpow2.f32 %v850_v24 }
  0xd9   : > { %v10812_v21 = vsel %vm7595_vm2, 4294967295, %v10811_v21  ;;  %vm7603_vm3 = vmand %vm10815_vm13, %vm10814_vm1  ;;  %v963_v35 = vsel %vm10819_vm11, %v915_v56, %v7248_v17  ;;  %v1187_v56 = vsub.f32 %v598_v23, %v10590_v26  ;;  %vm10822_vm11 = vcmp.lt.s32.totalorder %v7287_v41, 60 }
  0xda   : > { %10813 = vst [vmem:[#allocation54_spill] sm:$0xff] %v10812_v21  ;;  %v10817_v4 = vsel %vm7603_vm3, 4294967295, %v10816_v4  ;;  %10820 = vst [vmem:[#allocation56_spill] sm:$0xff] %v7615_v53  ;;  %vm10823_vm6 = vcmp.ge.s32.totalorder %v7287_v41, 0  ;;  %v10824_v17 = vmov 0  ;;  %vm10827_vm8 = vcmp.ne.f32.partialorder %v1314_v62, %v1314_v62  ;;  %v7949_v21 = vld [vmem:[%s7245_s30 + $0x40] sm:$0xff] }
  0xdb   : > { %10818 = vst [vmem:[#allocation55_spill] sm:$0xff] %v10817_v4  ;;  %vm7642_vm13 = vmand %vm10823_vm6, %vm10822_vm11  ;;  %v7649_v24 = vsel %vm10827_vm8, 0.0, %v1314_v62  ;;  %v10829_v23 = vrot.slane %v7400_v2, 2  ;;  %vm10830_vm0 = vcmask 1045504   ;;  %v10831_v50 = vrot.slane %v7460_v43, 3  ;;  %v7672_v62 = vld [vmem:[%s10525_s3 + $0x50] sm:$0xff] }
  0xdc   : > { %v10825_v17 = vsel %vm7642_vm13, 4294967295, %v10824_v17  ;;  %10828 = vst [vmem:[#allocation59_spill] sm:$0xff] %v7649_v24  ;;  %vm10832_vm15 = vcmask 1044480   ;;  %v10834_v9 = vrot.slane %v7435_v45, 2  ;;  %vm10835_vm11 = vmmov %vm10830_vm0  ;;  %vm10839_vm8 = vcmp.ge.s32.totalorder %v7298_v49, 0  ;;  %v7895_v4 = vld [vmem:[%s10525_s3 + $0x48] sm:$0xff] }
  0xdd   : > { %10826 = vst [vmem:[#allocation58_spill] sm:$0xff] %v10825_v17  ;;  %v7654_v26 = vsel %vm10830_vm0, %v1117_v20, %v10829_v23  ;;  %v7659_v41 = vsel %vm10832_vm15, %v1238_v46, %v10831_v50  ;;  %vm10838_vm0 = vcmp.lt.s32.totalorder %v7298_v49, 60  ;;  %v10840_v2 = vmov 0  ;;  %vm10845_vm5 = vmmov %vm10832_vm15  ;;  %v7695_v46 = vld [vmem:[%s7245_s30 + $0x28] sm:$0xff]  ;;  %v7718_v23 = vld [vmem:[%s7245_s30 + $0x20] sm:$0xff] }
  0xde   : > { %10833 = vst [vmem:[#allocation60_spill] sm:$0xff] %v7659_v41  ;;  %v7664_v1 = vsel %vm10835_vm11, %v1114_v19, %v10834_v9  ;;  %vm7678_vm6 = vmand %vm10839_vm8, %vm10838_vm0  ;;  %vm10843_vm1 = vcmp.eq.s32.totalorder %v7019_v0, 2  ;;  %v10844_v45 = vrot.slane %v7485_v27, 3  ;;  %6625 = vpow2.f32 %v848_v11  ;;  %v7700_v19 = vld [vmem:[%s10525_s3 + $0x28] sm:$0xff]  ;;  %v1723_v9 = vpop.permute.xlu1 %1722 }
  0xdf   : > { %10836 = vst [vmem:[#allocation61_spill] sm:$0xff] %v7664_v1  ;;  %v10841_v2 = vsel %vm7678_vm6, 4294967295, %v10840_v2  ;;  %v7686_v43 = vsel %vm10843_vm1, %v1005_v32, %v963_v35  ;;  %10847 = vst [vmem:[#allocation65_spill] sm:$0xff] %v7695_v46  ;;  %vm10849_vm0 = vcmp.lt.s32.totalorder %v7301_v51, 60  ;;  %vm10850_vm1 = vcmp.ge.s32.totalorder %v7301_v51, 0  ;;  %v7723_v51 = vld [vmem:[%s10525_s3 + $0x20] sm:$0xff] }
  0xe0   : > { %10842 = vst [vmem:[#allocation63_spill] sm:$0xff] %v10841_v2  ;;  %v7691_v20 = vsel %vm10845_vm5, %v1235_v42, %v10844_v45  ;;  %10848 = vst [vmem:[#allocation66_spill] sm:$0xff] %v7700_v19  ;;  %v10851_v27 = vmov 0  ;;  %v10854_v32 = vrot.slane %v7572_v15, 2  ;;  %v1099_v11 = vrot.slane %v7451_v55, 2  ;;  %v10879_v1 = vld [vmem:[#allocation27_spill] sm:$0xff] }
  0xe1   : > { %10846 = vst [vmem:[#allocation64_spill] sm:$0xff] %v7691_v20  ;;  %vm7706_vm8 = vmand %vm10850_vm1, %vm10849_vm0  ;;  %v784_v35 = vsub.f32 0.0, %v7631_v47  ;;  %v814_v50 = vrot.slane %v7636_v48, 6  ;;  %vm10857_vm0 = vcmp.lt.s32.totalorder %v7306_v57, 60  ;;  %vm10858_vm1 = vcmp.ge.s32.totalorder %v7306_v57, 0  ;;  %v7766_v20 = vpop.eup %6619 }
  0xe2   : > { %v10852_v27 = vsel %vm7706_vm8, 4294967295, %v10851_v27  ;;  %v1186_v42 = vsub.f32 %v597_v28, %v10854_v32  ;;  %10855 = vst [vmem:[#allocation68_spill] sm:$0xff] %v7718_v23  ;;  %10856 = vst [vmem:[#allocation69_spill] sm:$0xff] %v7723_v51  ;;  %v10859_v28 = vmov 0  ;;  %v10862_v55 = vsub.f32 1.0, %v7574_v40 }
  0xe3   : > { %10853 = vst [vmem:[#allocation67_spill] sm:$0xff] %v10852_v27  ;;  %vm7731_vm5 = vmand %vm10858_vm1, %vm10857_vm0  ;;  %v10863_v49 = vrot.slane %v7585_v3, 3  ;;  %v783_v47 = vsub.f32 0.0, %v7667_v25  ;;  %v813_v57 = vrot.slane %v7672_v62, 6  ;;  %vm10864_vm0 = vcmp.lt.s32.totalorder %v7230_v12, 60 }
  0xe4   : > { %v10860_v28 = vsel %vm7731_vm5, 4294967295, %v10859_v28  ;;  %v911_v32 = vrot.slane %v10862_v55, %v7268_v29  ;;  %vm10865_vm1 = vcmp.ge.s32.totalorder %v7230_v12, 0  ;;  %v10866_v53 = vmov 0  ;;  %v7762_v55 = vld [vmem:[%s10525_s3 + $0xa0] sm:$0xff]  ;;  %vm10892_vm7 = vmmov %vm10835_vm11  ;;  %10922 = vst [vmem:[#allocation80_spill] sm:$0xff] %v7895_v4 }
  0xe5   : > { %10861 = vst [vmem:[#allocation70_spill] sm:$0xff] %v10860_v28  ;;  %v7742_v24 = vmul.f32 %v10863_v49, %v1187_v56  ;;  %vm7750_vm12 = vmand %vm10865_vm1, %vm10864_vm0  ;;  %v1174_v56 = vsub.f32 %v7686_v43, %v7524_v52  ;;  %v1220_v49 = vrot.slane %v7531_v34, 3  ;;  %v778_v12 = vsub.f32 0.0, %v7695_v46  ;;  %v7978_v28 = vld [vmem:[%s10525_s3 + $0x98] sm:$0xff] }
  0xe6   : > { %v10867_v53 = vsel %vm7750_vm12, 4294967295, %v10866_v53  ;;  %v808_v25 = vrot.slane %v7700_v19, 6  ;;  %vm10869_vm0 = vcmp.lt.s32.totalorder %v7233_v13, 60  ;;  %vm10870_vm1 = vcmp.ge.s32.totalorder %v7233_v13, 0 }
  0xe7   : > { %10868 = vst [vmem:[#allocation71_spill] sm:$0xff] %v10867_v53  ;;  %vm7772_vm15 = vmand %vm10870_vm1, %vm10869_vm0  ;;  %v10871_v52 = vmov 0  ;;  %v1096_v43 = vrot.slane %v7472_v44, 2  ;;  %v1217_v46 = vrot.slane %v7572_v15, 3  ;;  %v777_v19 = vsub.f32 0.0, %v7718_v23  ;;  %v8003_v53 = vld [vmem:[%s10525_s3 + $0x148] sm:$0xff] }
  0xe8   : > { %v10872_v52 = vsel %vm7772_vm15, 4294967295, %v10871_v52  ;;  %v807_v37 = vrot.slane %v7723_v51, 6  ;;  %vm10874_vm0 = vcmp.lt.s32.totalorder %v7309_v58, 60  ;;  %vm10875_vm1 = vcmp.ge.s32.totalorder %v7309_v58, 0 }
  0xe9   : > { %10873 = vst [vmem:[#allocation72_spill] sm:$0xff] %v10872_v52  ;;  %vm7788_vm10 = vmand %vm10875_vm1, %vm10874_vm0  ;;  %v10876_v13 = vmov 0  ;;  %v10880_v44 = vsub.f32 1.0, %v7574_v40  ;;  %v10881_v51 = vrot.slane %v7620_v38, 3  ;;  %vm10883_vm4 = vcmp.lt.s32.totalorder %v7312_v59, 60 }
  0xea   : > { %v10877_v13 = vsel %vm7788_vm10, 4294967295, %v10876_v13  ;;  %vm10884_vm0 = vcmp.ge.s32.totalorder %v7312_v59, 0  ;;  %v10885_v58 = vmov 0  ;;  %vm10890_vm14 = vcmp.eq.s32.totalorder %v7019_v0, 3 }
  0xeb   : > { %10878 = vst [vmem:[#allocation73_spill] sm:$0xff] %v10877_v13  ;;  %v1001_v23 = vrot.slane %v10880_v44, %v7271_v30  ;;  %vm7805_vm1 = vmand %vm10884_vm0, %vm10883_vm4  ;;  %v962_v40 = vsel %vm10890_vm14, %v911_v32, %v10889_v60  ;;  %v7826_v44 = vld [vmem:[%s10525_s3 + $0x70] sm:$0xff]  ;;  %vm10896_vm4 = vcmask 261120   ;;  %vm10899_vm0 = vcmp.ge.s32.totalorder %v7236_v14, 0 }
  0xec   : > { %v10886_v58 = vsel %vm7805_vm1, 4294967295, %v10885_v58  ;;  %10895 = vst [vmem:[#allocation75_spill] sm:$0xff] %v7826_v44  ;;  %vm10897_vm14 = vmmov %vm10896_vm4  ;;  %v10900_v60 = vmov 0  ;;  %v10904_v32 = vrot.slane %v7585_v3, 3  ;;  %v838_v59 = vmul.f32 %v808_v25, %v778_v12  ;;  %v10913_v3 = vld [vmem:[#allocation31_spill] sm:$0xff] }
  0xed   : > { %10887 = vst [vmem:[#allocation74_spill] sm:$0xff] %v10886_v58  ;;  %vm10914_vm1 = vcmp.ne.f32.partialorder %v7558_v36, %v7558_v36  ;;  %v10964_v52 = vmov 0  ;;  %v608_v13 = vld [vmem:[%s7245_s30 + $0xd0] sm:$0x1] }
  0xee   : > { %v7877_v25 = vsel %vm10914_vm1, 0.0, %v7558_v36  ;;  %v7897_v36 = vpop.eup %6621  ;;  %vm10924_vm1 = vcmp.ge.s32.totalorder %v7321_v6, 0  ;;  %v858_v17 = vmul.f32 1.442695, %v838_v59  ;;  %v10953_v59 = vld [vmem:[#allocation35_spill] sm:$0xff] }
  0xef   : > { %10915 = vst [vmem:[#allocation31_spill] sm:$0xff] %v7877_v25  ;;  %v7956_v27 = vpop.eup %6623  ;;  %v812_v25 = vrot.slane %v7895_v4, 6  ;;  %v781_v4 = vsub.f32 0.0, %v7949_v21 }
 0x178   : > { %v7725_v45 = vpop.f32.mrf.mxu0 }
 0x17a   : > { %v1819_v54 = vpop.f32.mrf.mxu0 }
 0x17b   : > { %v7782_v41 = vadd.f32 %v1819_v54, %v1723_v9  ;;  %v7799_v54 = vmul.f32 %v10881_v51, %v1186_v42  ;;  %v844_v9 = vmul.f32 %v814_v50, %v784_v35  ;;  %v10891_v42 = vrot.slane %v7531_v34, 2  ;;  %v7821_v51 = vld [vmem:[%s7245_s30 + $0x70] sm:$0xff]  ;;  %v10903_v34 = vld [vmem:[#allocation30_spill] sm:$0xff] }
 0x17c   : > { %v843_v50 = vmul.f32 %v813_v57, %v783_v47  ;;  %10894 = vst [vmem:[#allocation24_spill] sm:$0xff] %v7821_v51  ;;  %v7843_v47 = vmul.f32 %v7538_v10, %v1174_v56  ;;  %v10910_v10 = vmov 0  ;;  %v10916_v56 = vrot.slane %v7572_v15, 2  ;;  %v10928_v15 = vld [vmem:[#allocation32_spill] sm:$0xff] }
 0x17d   : > { %10882 = vst [vmem:[#allocation27_spill] sm:$0xff] %v7799_v54  ;;  %v7817_v35 = vsel %vm10892_vm7, %v1099_v11, %v10891_v42  ;;  %v1728_v54 = vpop.permute.xlu1 %1727  ;;  %6237 = vmatmul.mubr.msk.f32.vlgmr.msra.gmra.mxu1 %vm10896_vm4, %v7782_v41  ;;  %6257 = vmatmul.mubr.msk.f32.vlgmr.msra.gmra.mxu0 %vm10897_vm14, %v7782_v41  ;;  %vm10898_vm7 = vcmp.lt.s32.totalorder %v7236_v14, 60  ;;  %vm10905_vm4 = vcmask 1044480   ;;  %v602_v14 = vld [vmem:[%s7245_s30 + $0xa0] sm:$0x1]  ;;  %v7855_v42 = vld [vmem:[%s10525_s3 + $0x118] sm:$0xff] }
 0x17e   : > { %10893 = vst [vmem:[#allocation29_spill] sm:$0xff] %v7817_v35  ;;  %vm7836_vm11 = vmand %vm10899_vm0, %vm10898_vm7  ;;  %v7849_v57 = vsel %vm10905_vm4, %v1220_v49, %v10904_v32  ;;  %v10907_v35 = vmov 1.0   ;;  %vm10908_vm14 = vcmp.lt.s32.totalorder %v7239_v16, 60  ;;  %vm10909_vm7 = vcmp.ge.s32.totalorder %v7239_v16, 0  ;;  %v7890_v11 = vld [vmem:[%s7245_s30 + $0x48] sm:$0xff] }
 0x17f   : > { %v10901_v60 = vsel %vm7836_vm11, 4294967295, %v10900_v60  ;;  %10906 = vst [vmem:[#allocation30_spill] sm:$0xff] %v7849_v57  ;;  %6240 = vmatpush1.msk.msra.mxu1 %vm7595_vm2, %v10907_v35  ;;  %6270 = vmatpush1.msk.msra.mxu0 %vm7603_vm3, %v10907_v35  ;;  %vm7867_vm0 = vmand %vm10909_vm7, %vm10908_vm14  ;;  %vm10917_vm3 = vcmask 1045504   ;;  %v10918_v16 = vrot.slane %v7620_v38, 3  ;;  %v837_v32 = vmul.f32 %v807_v37, %v777_v19 }
 0x180   : > { %10902 = vst [vmem:[#allocation76_spill] sm:$0xff] %v10901_v60  ;;  %v10911_v10 = vsel %vm7867_vm0, 4294967295, %v10910_v10  ;;  %v7882_v49 = vsel %vm10917_vm3, %v1096_v43, %v10916_v56  ;;  %vm10919_vm14 = vmmov %vm10905_vm4  ;;  %6241 = vmatprep.subr.msk.mxu1 %vm7642_vm13, %v10907_v35  ;;  %6271 = vmatprep.subr.msk.mxu0 %vm7678_vm6, %v10907_v35  ;;  %vm10923_vm3 = vcmp.lt.s32.totalorder %v7321_v6, 60  ;;  %v10925_v37 = vmov 0 }
 0x181   : > { %10912 = vst [vmem:[#allocation77_spill] sm:$0xff] %v10911_v10  ;;  %v7887_v12 = vsel %vm10919_vm14, %v1217_v46, %v10918_v16  ;;  %10921 = vst [vmem:[#allocation79_spill] sm:$0xff] %v7890_v11  ;;  %v7917_v38 = vsel %vm10929_vm9, %v1001_v23, %v962_v40  ;;  %v7922_v46 = vld [vmem:[%s10525_s3 + $0xd0] sm:$0xff]  ;;  %v870_v19 = vmul.f32 1.442695, %v844_v9  ;;  %v787_v6 = vsub.f32 0.0, %v7821_v51  ;;  %6242 = vmatpush1.msk.msra.mxu1 %vm7706_vm8, %v10907_v35 }
 0x182   : > { %10920 = vst [vmem:[#allocation78_spill] sm:$0xff] %v7887_v12  ;;  %vm7909_vm7 = vmand %vm10924_vm1, %vm10923_vm3  ;;  %v817_v43 = vrot.slane %v7826_v44, 6  ;;  %v7927_v56 = vadd.f32 %v7725_v45, %v1728_v54  ;;  %v10930_v16 = vmov 0.0   ;;  %vm10931_vm9 = vcmp.lt.s32.totalorder %v7324_v7, 60  ;;  %v10936_v9 = vld [vmem:[#allocation33_spill] sm:$0xff]  ;;  %6272 = vmatpush1.msk.msra.mxu0 %vm7731_vm5, %v10907_v35  ;;  %6243 = vmatprep.subr.msk.mxu1 %vm7750_vm12, %v10907_v35  ;;  %v8006_v44 = vpop.eup %6625 }
 0x183   : > { %v10926_v37 = vsel %vm7909_vm7, 4294967295, %v10925_v37  ;;  %1905 = vmatprep.mubr.f32.mxu1 %v10930_v16  ;;  %vm10932_vm3 = vcmp.ge.s32.totalorder %v7324_v7, 0  ;;  %v10933_v23 = vmov 0  ;;  %v10937_v45 = vrot.slane %v7762_v55, 2  ;;  %10938 = vst [vmem:[#allocation33_spill] sm:$0xff] %v7949_v21  ;;  %v7954_v7 = vld [vmem:[%s10525_s3 + $0x40] sm:$0xff]  ;;  %2059 = vmatprep.mubr.f32.mxu0 %v10930_v16 }
 0x184   : > { %10927 = vst [vmem:[#allocation81_spill] sm:$0xff] %v10926_v37  ;;  %vm7937_vm1 = vmand %vm10932_vm3, %vm10931_vm9  ;;  %v868_v2 = vmul.f32 1.442695, %v843_v50  ;;  %vm10940_vm9 = vcmp.lt.s32.totalorder %v7328_v22, 60  ;;  %vm10941_vm3 = vcmp.ge.s32.totalorder %v7328_v22, 0  ;;  %v10942_v50 = vmov 0  ;;  %6273 = vmatprep.subr.msk.mxu0 %vm7772_vm15, %v10907_v35  ;;  %6244 = vmatpush1.msk.msra.mxu1 %vm7788_vm10, %v10907_v35 }
 0x185   : > { %v10934_v23 = vsel %vm7937_vm1, 4294967295, %v10933_v23  ;;  %v7945_v54 = vsub.f32 %v602_v14, %v10937_v45  ;;  %10939 = vst [vmem:[#allocation82_spill] sm:$0xff] %v7954_v7  ;;  %vm7966_vm14 = vmand %vm10941_vm3, %vm10940_vm9  ;;  %v10945_v14 = vld [vmem:[#allocation34_spill] sm:$0xff]  ;;  %v10946_v45 = vsub.f32 1.0, %v7766_v20  ;;  %v782_v22 = vsub.f32 0.0, %v7890_v11  ;;  %6245 = vmatprep.subr.msk.mxu1 %vm7836_vm11, %v10907_v35  ;;  %v8166_v12 = vld [vmem:[%s10525_s3 + $0x60] sm:$0xff] }
 0x186   : > { %10935 = vst [vmem:[#allocation32_spill] sm:$0xff] %v10934_v23  ;;  %v10943_v50 = vsel %vm7966_vm14, 4294967295, %v10942_v50  ;;  %vm10947_vm9 = vcmask 261120   ;;  %vm10948_vm3 = vcmp.lt.s32.totalorder %v7331_v61, 60  ;;  %vm10949_vm4 = vcmp.ge.s32.totalorder %v7331_v61, 0  ;;  %6246 = vmatpush1.msk.msra.mxu1 %vm7909_vm7, %v10907_v35  ;;  %v8100_v37 = vld [vmem:[%s7245_s30 + $0x68] sm:$0xff] }
 0x187   : > { %10944 = vst [vmem:[#allocation83_spill] sm:$0xff] %v10943_v50  ;;  %v931_v40 = vrot.slane %v10946_v45, %v7268_v29  ;;  %6238 = vmatmul.mubr.msk.f32.gmra.mxu1 %vm10947_vm9, %v7927_v56  ;;  %vm7991_vm6 = vmand %vm10949_vm4, %vm10948_vm3  ;;  %v10950_v45 = vmov 0  ;;  %v1173_v11 = vsub.f32 %v7917_v38, %v7543_v31  ;;  %v856_v51 = vmul.f32 1.442695, %v837_v32  ;;  %v10960_v38 = vld [vmem:[#allocation36_spill] sm:$0xff]  ;;  %v8026_v32 = vld [vmem:[%s10525_s3 + $0x110] sm:$0xff]  ;;  %6259 = vmatprep.subr.msk.mxu1 %vm7966_vm14, %v10907_v35 }
 0x188   : > { %v10951_v45 = vsel %vm7991_vm6, 4294967295, %v10950_v45  ;;  %vm10954_vm4 = vmmov %vm10947_vm9  ;;  %vm10955_vm9 = vcmp.lt.s32.totalorder %v7334_v5, 60  ;;  %vm10956_vm3 = vcmp.ge.s32.totalorder %v7334_v5, 0  ;;  %v10957_v31 = vmov 0  ;;  %1976 = vmatprep.mubr.f32.mxu1 %v10930_v16  ;;  %v8161_v50 = vld [vmem:[%s7245_s30 + $0x60] sm:$0xff] }
 0x189   : > { %10952 = vst [vmem:[#allocation34_spill] sm:$0xff] %v10951_v45  ;;  %6258 = vmatmul.mubr.msk.f32.gmra.mxu0 %vm10954_vm4, %v7927_v56  ;;  %vm8017_vm5 = vmand %vm10956_vm3, %vm10955_vm9  ;;  %6627 = vpow2.f32 %v870_v19  ;;  %v847_v61 = vmul.f32 %v817_v43, %v787_v6  ;;  %v811_v5 = vrot.slane %v7954_v7, 6  ;;  %vm10961_vm4 = vnez %v10886_v58  ;;  %v10967_v19 = vld [vmem:[#allocation37_spill] sm:$0xff]  ;;  %v601_v58 = vld [vmem:[%s7245_s30 + $0x98] sm:$0x1] }
 0x18a   : > { %v10958_v31 = vsel %vm8017_vm5, 4294967295, %v10957_v31  ;;  %6274 = vmatpush1.msk.msra.mxu0 %vm10961_vm4, %v10907_v35  ;;  %vm10962_vm9 = vcmp.lt.s32.totalorder %v7346_v39, 60  ;;  %vm10963_vm3 = vcmp.ge.s32.totalorder %v7346_v39, 0  ;;  %v10968_v6 = vsub.f32 1.0, %v7766_v20  ;;  %v10974_v20 = vld [vmem:[#allocation38_spill] sm:$0xff]  ;;  %2207 = vmatprep.mubr.f32.mxu0 %v10930_v16 }
 0x18b   : > { %10959 = vst [vmem:[#allocation35_spill] sm:$0xff] %v10958_v31  ;;  %vm8040_vm2 = vmand %vm10963_vm3, %vm10962_vm9  ;;  %6629 = vpow2.f32 %v868_v2  ;;  %6275 = vmatprep.subr.msk.mxu0 %vm7867_vm0, %v10907_v35  ;;  %vm10969_vm9 = vcmp.lt.s32.totalorder %v7337_v33, 60  ;;  %vm10970_vm3 = vcmp.ge.s32.totalorder %v7337_v33, 0  ;;  %v10971_v39 = vmov 0  ;;  %v10975_v2 = vld [vmem:[#allocation28_spill] sm:$0xff]  ;;  %v8078_v33 = vld [vmem:[%s10525_s3 + $0xc8] sm:$0xff] }
 0x18c   : > { %v10965_v52 = vsel %vm8040_vm2, 4294967295, %v10964_v52  ;;  %v1021_v43 = vrot.slane %v10968_v6, %v7271_v30  ;;  %vm8062_vm8 = vmand %vm10970_vm3, %vm10969_vm9  ;;  %vm10976_vm13 = vcmp.eq.s32.totalorder %v7019_v0, 3  ;;  %6631 = vpow2.f32 %v858_v17  ;;  %10984 = vst [vmem:[#allocation28_spill] sm:$0xff] %v8100_v37  ;;  %6276 = vmatpush1.msk.msra.mxu0 %vm7937_vm1, %v10907_v35 }
 0x18d   : > { %10966 = vst [vmem:[#allocation36_spill] sm:$0xff] %v10965_v52  ;;  %v10972_v39 = vsel %vm8062_vm8, 4294967295, %v10971_v39  ;;  %v967_v6 = vsel %vm10976_vm13, %v931_v40, %v10975_v2  ;;  %v842_v10 = vmul.f32 %v812_v25, %v782_v22  ;;  %vm10977_vm13 = vcmp.lt.s32.totalorder %v10879_v1, 60  ;;  %v10982_v2 = vld [vmem:[#allocation39_spill] sm:$0xff]  ;;  %6289 = vmatprep.subr.msk.mxu0 %vm7991_vm6, %v10907_v35 }
 0x18e   : > { %10973 = vst [vmem:[#allocation37_spill] sm:$0xff] %v10972_v39  ;;  %vm10978_vm9 = vcmp.ge.s32.totalorder %v10879_v1, 0  ;;  %v10979_v40 = vmov 0  ;;  %v10983_v17 = vsub.f32 1.0, %v7897_v36  ;;  %6633 = vpow2.f32 %v856_v51  ;;  %v8105_v1 = vld [vmem:[%s10525_s3 + $0x68] sm:$0xff]  ;;  %v10991_v51 = vld [vmem:[#allocation40_spill] sm:$0xff] }
 0x18f   : > { %vm8088_vm3 = vmand %vm10978_vm9, %vm10977_vm13  ;;  %10985 = vst [vmem:[#allocation39_spill] sm:$0xff] %v8105_v1  ;;  %vm10986_vm13 = vcmp.lt.s32.totalorder %v10888_v18, 60  ;;  %vm10987_vm9 = vcmp.ge.s32.totalorder %v10888_v18, 0  ;;  %v8122_v21 = vmul.f32 %v7551_v63, %v1173_v11  ;;  %v10992_v22 = vrot.slane %v7922_v46, 2  ;;  %v8131_v18 = vld [vmem:[%s10525_s3 + $0x140] sm:$0xff] }
 0x190   : > { %v10980_v40 = vsel %vm8088_vm3, 4294967295, %v10979_v40  ;;  %v927_v25 = vrot.slane %v10983_v17, %v7268_v29  ;;  %vm8115_vm0 = vmand %vm10987_vm9, %vm10986_vm13  ;;  %v10988_v17 = vmov 0  ;;  %v876_v60 = vmul.f32 1.442695, %v847_v61 }
 0x191   : > { %10981 = vst [vmem:[#allocation38_spill] sm:$0xff] %v10980_v40  ;;  %v10989_v17 = vsel %vm8115_vm0, 4294967295, %v10988_v17  ;;  %v8126_v23 = vsub.f32 %v608_v13, %v10992_v22  ;;  %v841_v7 = vmul.f32 %v811_v5, %v781_v4  ;;  %vm10993_vm13 = vcmask 261120   ;;  %v10999_v13 = vld [vmem:[#allocation42_spill] sm:$0xff] }
 0x192   : > { %10990 = vst [vmem:[#allocation84_spill] sm:$0xff] %v10989_v17  ;;  %6247 = vmatmul.mubr.msk.f32.vlgmr.msra.gmra.mxu1 %vm10993_vm13, %v7782_v41  ;;  %vm10994_vm9 = vcmp.lt.s32.totalorder %v10903_v34, 60  ;;  %vm10995_vm15 = vcmp.ge.s32.totalorder %v10903_v34, 0  ;;  %v10996_v63 = vmov 0  ;;  %vm11000_vm12 = vcmp.eq.s32.totalorder %v7019_v0, 2 }
 0x193   : > { %vm8142_vm4 = vmand %vm10995_vm15, %vm10994_vm9  ;;  %v8150_v4 = vsel %vm11000_vm12, %v1021_v43, %v967_v6  ;;  %v11001_v11 = vsub.f32 1.0, %v7956_v27  ;;  %v11002_v5 = vrot.slane %v7978_v28, 2  ;;  %vm11004_vm15 = vcmp.lt.s32.totalorder %v10913_v3, 60  ;;  %v11009_v43 = vld [vmem:[#allocation43_spill] sm:$0xff]  ;;  %6260 = vmatpush1.msk.msra.mxu1 %vm8017_vm5, %v10907_v35  ;;  %1982 = vmatprep.mubr.f32.mxu1 %v10930_v16 }
 0x194   : > { %v10997_v63 = vsel %vm8142_vm4, 4294967295, %v10996_v63  ;;  %vm11003_vm12 = vmmov %vm10993_vm13  ;;  %vm11005_vm13 = vcmp.ge.s32.totalorder %v10913_v3, 0  ;;  %v11010_v6 = vsub.f32 1.0, %v7897_v36  ;;  %v866_v22 = vmul.f32 1.442695, %v842_v10  ;;  %v11016_v10 = vld [vmem:[#allocation44_spill] sm:$0xff]  ;;  %6261 = vmatprep.subr.msk.mxu1 %vm8062_vm8, %v10907_v35 }
 0x195   : > { %10998 = vst [vmem:[#allocation40_spill] sm:$0xff] %v10997_v63  ;;  %v907_v61 = vrot.slane %v11001_v11, %v7268_v29  ;;  %v8157_v34 = vsub.f32 %v601_v58, %v11002_v5  ;;  %6277 = vmatmul.mubr.msk.f32.vlgmr.msra.gmra.mxu0 %vm11003_vm12, %v7782_v41  ;;  %vm8177_vm9 = vmand %vm11005_vm13, %vm11004_vm15  ;;  %v11006_v58 = vmov 0  ;;  %v607_v5 = vld [vmem:[%s7245_s30 + $0xc8] sm:$0x1]  ;;  %v786_v45 = vsub.f32 0.0, %v8100_v37  ;;  %v11017_v36 = vld [vmem:[#allocation41_spill] sm:$0xff]  ;;  %6262 = vmatpush1.msk.msra.mxu1 %vm8115_vm0, %v10907_v35 }
 0x196   : > { %v11007_v58 = vsel %vm8177_vm9, 4294967295, %v11006_v58  ;;  %v1017_v11 = vrot.slane %v11010_v6, %v7271_v30  ;;  %v816_v57 = vrot.slane %v8105_v1, 6  ;;  %6290 = vmatpush1.msk.msra.mxu0 %vm8040_vm2, %v10907_v35  ;;  %vm11011_vm12 = vcmp.lt.s32.totalorder %v10928_v15, 60  ;;  %v11033_v1 = vld [vmem:[#allocation46_spill] sm:$0xff]  ;;  %2213 = vmatprep.mubr.f32.mxu0 %v10930_v16 }
 0x197   : > { %11008 = vst [vmem:[#allocation42_spill] sm:$0xff] %v11007_v58  ;;  %vm11012_vm15 = vcmp.ge.s32.totalorder %v10928_v15, 0  ;;  %v11013_v3 = vmov 0  ;;  %vm11018_vm6 = vcmp.eq.s32.totalorder %v7019_v0, 3  ;;  %v11019_v52 = vsub.f32 1.0, %v7956_v27  ;;  %6291 = vmatprep.subr.msk.mxu0 %vm8088_vm3, %v10907_v35  ;;  %6263 = vmatprep.subr.msk.mxu1 %vm8177_vm9, %v10907_v35 }
 0x198   : > { %vm8199_vm13 = vmand %vm11012_vm15, %vm11011_vm12  ;;  %v966_v6 = vsel %vm11018_vm6, %v927_v25, %v11017_v36  ;;  %v11020_v37 = vsub.f32 1.0, %v8006_v44  ;;  %vm11021_vm6 = vcmp.lt.s32.totalorder %v10936_v9, 60  ;;  %vm11022_vm12 = vcmp.ge.s32.totalorder %v10936_v9, 0  ;;  %6292 = vmatpush1.msk.msra.mxu0 %vm8142_vm4, %v10907_v35 }
 0x199   : > { %v11014_v3 = vsel %vm8199_vm13, 4294967295, %v11013_v3  ;;  %v997_v31 = vrot.slane %v11019_v52, %v7271_v30  ;;  %vm8225_vm15 = vmand %vm11022_vm12, %vm11021_vm6  ;;  %v11023_v27 = vmov 0  ;;  %v11026_v52 = vld [vmem:[#allocation45_spill] sm:$0xff]  ;;  %6635 = vpow2.f32 %v876_v60  ;;  %v11032_v60 = vld [vmem:[#allocation47_spill] sm:$0xff]  ;;  %6293 = vmatprep.subr.msk.mxu0 %vm8199_vm13, %v10907_v35 }
 0x19a   : > { %11015 = vst [vmem:[#allocation43_spill] sm:$0xff] %v11014_v3  ;;  %v903_v15 = vrot.slane %v11020_v37, %v7268_v29  ;;  %v11024_v27 = vsel %vm8225_vm15, 4294967295, %v11023_v27  ;;  %v864_v37 = vmul.f32 1.442695, %v841_v7  ;;  %v785_v25 = vsub.f32 0.0, %v8161_v50  ;;  %6264 = vmatpush1.msk.msra.mxu1 %vm8225_vm15, %v10907_v35 }
 0x19b   : > { %11025 = vst [vmem:[#allocation44_spill] sm:$0xff] %v11024_v27  ;;  %v815_v36 = vrot.slane %v8166_v12, 6  ;;  %vm11027_vm6 = vcmp.lt.s32.totalorder %v10945_v14, 60  ;;  %vm11028_vm12 = vcmp.ge.s32.totalorder %v10945_v14, 0  ;;  %v11029_v9 = vmov 0 }
 0x19c   : > { %vm8241_vm2 = vmand %vm11028_vm12, %vm11027_vm6  ;;  %v1178_v7 = vsub.f32 %v8150_v4, %v7654_v26  ;;  %vm11034_vm3 = vcmp.eq.s32.totalorder %v7019_v0, 3  ;;  %v11035_v17 = vrot.slane %v8078_v33, 2  ;;  %v1129_v14 = vrot.slane %v7636_v48, 2 }
 0x19d   : > { %v11030_v9 = vsel %vm8241_vm2, 4294967295, %v11029_v9  ;;  %v961_v40 = vsel %vm11034_vm3, %v907_v61, %v11033_v1  ;;  %vm11036_vm6 = vcmp.lt.s32.totalorder %v10953_v59, 60  ;;  %vm11037_vm12 = vcmp.ge.s32.totalorder %v10953_v59, 0  ;;  %6294 = vmatpush1.msk.msra.mxu0 %vm8241_vm2, %v10907_v35 }
 0x19e   : > { %11031 = vst [vmem:[#allocation41_spill] sm:$0xff] %v11030_v9  ;;  %v1196_v39 = vsub.f32 %v607_v5, %v11035_v17  ;;  %vm8263_vm1 = vmand %vm11037_vm12, %vm11036_vm6  ;;  %v11038_v26 = vmov 0  ;;  %vm11041_vm10 = vcmp.eq.s32.totalorder %v7019_v0, 2  ;;  %v1250_v1 = vrot.slane %v7922_v46, 3 }
 0x19f   : > { %v11039_v26 = vsel %vm8263_vm1, 4294967295, %v11038_v26  ;;  %v8271_v48 = vsel %vm11041_vm10, %v1017_v11, %v966_v6  ;;  %6637 = vpow2.f32 %v866_v22  ;;  %v846_v17 = vmul.f32 %v816_v57, %v786_v45  ;;  %v8325_v6 = vpop.eup %6627  ;;  %6265 = vmatprep.subr.msk.mxu1 %vm8263_vm1, %v10907_v35 }
 0x1a0   : > { %11040 = vst [vmem:[#allocation45_spill] sm:$0xff] %v11039_v26  ;;  %vm11042_vm4 = vcmask 261120   ;;  %vm11043_vm6 = vcmp.lt.s32.totalorder %v10960_v38, 60  ;;  %vm11044_vm12 = vcmp.ge.s32.totalorder %v10960_v38, 0  ;;  %v11045_v59 = vmov 0 }
 0x1a1   : > { %6248 = vmatmul.mubr.msk.f32.gmra.mxu1 %vm11042_vm4, %v7927_v56  ;;  %vm8283_vm3 = vmand %vm11044_vm12, %vm11043_vm6  ;;  %v11048_v57 = vsub.f32 1.0, %v8006_v44  ;;  %v11049_v4 = vrot.slane %v7855_v42, 3  ;;  %v11050_v38 = vrot.slane %v8003_v53, 3  ;;  %v1126_v11 = vrot.slane %v7672_v62, 2  ;;  %6278 = vmatmul.mubr.msk.f32.gmra.mxu0 %vm11042_vm4, %v7927_v56 }
 0x1a2   : > { %v11046_v59 = vsel %vm8283_vm3, 4294967295, %v11045_v59  ;;  %vm11051_vm6 = vcmp.lt.s32.totalorder %v10967_v19, 60  ;;  %vm11052_vm12 = vcmp.ge.s32.totalorder %v10967_v19, 0  ;;  %v11053_v44 = vmov 0  ;;  %v11063_v19 = vld [vmem:[#allocation51_spill] sm:$0xff]  ;;  %6295 = vmatprep.subr.msk.mxu0 %vm8283_vm3, %v10907_v35  ;;  %2130 = vmatprep.mubr.f32.mxu1 %v10930_v16 }
 0x1a3   : > { %11047 = vst [vmem:[#allocation47_spill] sm:$0xff] %v11046_v59  ;;  %v993_v45 = vrot.slane %v11048_v57, %v7271_v30  ;;  %v8295_v61 = vmul.f32 %v11049_v4, %v7945_v54  ;;  %v8300_v22 = vmul.f32 %v11050_v38, %v8126_v23  ;;  %vm8312_vm5 = vmand %vm11052_vm12, %vm11051_vm6  ;;  %v8320_v62 = vsel %vm11041_vm10, %v997_v31, %v961_v40  ;;  %v11056_v23 = vld [vmem:[#allocation48_spill] sm:$0xff]  ;;  %v11064_v40 = vld [vmem:[#allocation61_spill] sm:$0xff]  ;;  %v8360_v4 = vpop.eup %6629 }
 0x1a4   : > { %v11054_v44 = vsel %vm8312_vm5, 4294967295, %v11053_v44  ;;  %vm11057_vm4 = vcmp.eq.s32.totalorder %v7019_v0, 3  ;;  %6639 = vpow2.f32 %v864_v37  ;;  %v845_v5 = vmul.f32 %v815_v36, %v785_v25  ;;  %6266 = vmatpush1.msk.msra.mxu1 %vm8312_vm5, %v10907_v35  ;;  %2361 = vmatprep.mubr.f32.mxu0 %v10930_v16  ;;  %v611_v59 = vld [vmem:[%s7245_s30 + $0xe8] sm:$0x1] }
 0x1a5   : > { %11055 = vst [vmem:[#allocation46_spill] sm:$0xff] %v11054_v44  ;;  %v960_v54 = vsel %vm11057_vm4, %v903_v15, %v11056_v23  ;;  %vm11058_vm6 = vcmp.lt.s32.totalorder %v10974_v20, 60  ;;  %vm11059_vm10 = vcmp.ge.s32.totalorder %v10974_v20, 0  ;;  %v11060_v31 = vmov 0  ;;  %v8660_v44 = vpop.permute.xlu0 %2449 }
 0x1a6   : > { %vm8337_vm12 = vmand %vm11059_vm10, %vm11058_vm6  ;;  %v1177_v15 = vsub.f32 %v8271_v48, %v11064_v40  ;;  %vm11065_vm13 = vcmp.ne.f32.partialorder %v7742_v24, %v7742_v24  ;;  %v11066_v20 = vrot.slane %v8026_v32, 3  ;;  %v11067_v36 = vrot.slane %v8131_v18, 3  ;;  %v11074_v48 = vld [vmem:[#allocation27_spill] sm:$0xff] }
 0x1a7   : > { %v11061_v31 = vsel %vm8337_vm12, 4294967295, %v11060_v31  ;;  %v8349_v37 = vsel %vm11065_vm13, 0.0, %v7742_v24  ;;  %vm11068_vm13 = vcmp.lt.s32.totalorder %v10982_v2, 60  ;;  %vm11069_vm6 = vcmp.ge.s32.totalorder %v10982_v2, 0  ;;  %v8394_v2 = vld [vmem:[%s10525_s3 + $0xc0] sm:$0xff]  ;;  %6296 = vmatpush1.msk.msra.mxu0 %vm8337_vm12, %v10907_v35 }
 0x1a8   : > { %11062 = vst [vmem:[#allocation48_spill] sm:$0xff] %v11061_v31  ;;  %v8354_v25 = vmul.f32 %v11066_v20, %v8157_v34  ;;  %v8358_v57 = vmul.f32 %v11067_v36, %v1196_v39  ;;  %vm8372_vm10 = vmand %vm11069_vm6, %vm11068_vm13  ;;  %v11070_v24 = vmov 0  ;;  %v11073_v39 = vld [vmem:[#allocation60_spill] sm:$0xff]  ;;  %v11075_v38 = vrot.slane %v7922_v46, 2  ;;  %v8396_v36 = vpop.eup %6631 }
 0x1a9   : > { %v11071_v24 = vsel %vm8372_vm10, 4294967295, %v11070_v24  ;;  %v8377_v34 = vmul.f32 %v11073_v39, %v1178_v7  ;;  %vm11076_vm14 = vcmask 1045504   ;;  %v11077_v40 = vrot.slane %v8003_v53, 3  ;;  %v11084_v46 = vld [vmem:[#allocation52_spill] sm:$0xff]  ;;  %6279 = vmatprep.subr.msk.mxu1 %vm8372_vm10, %v10907_v35 }
 0x1aa   : > { %11072 = vst [vmem:[#allocation51_spill] sm:$0xff] %v11071_v24  ;;  %v8384_v23 = vsel %vm11076_vm14, %v1129_v14, %v11075_v38  ;;  %vm11078_vm2 = vcmask 1044480   ;;  %v874_v7 = vmul.f32 1.442695, %v846_v17  ;;  %vm11079_vm14 = vcmp.lt.s32.totalorder %v10991_v51, 60  ;;  %v11085_v14 = vld [vmem:[#allocation29_spill] sm:$0xff] }
 0x1ab   : > { %v8389_v20 = vsel %vm11078_vm2, %v1250_v1, %v11077_v40  ;;  %vm11080_vm13 = vcmp.ge.s32.totalorder %v10991_v51, 0  ;;  %v11081_v53 = vmov 0  ;;  %v1172_v1 = vsub.f32 %v8320_v62, %v11085_v14  ;;  %v11087_v38 = vld [vmem:[#allocation66_spill] sm:$0xff]  ;;  %v8420_v51 = vpop.eup %6633 }
 0x1ac   : > { %vm8406_vm2 = vmand %vm11080_vm13, %vm11079_vm14  ;;  %vm11086_vm3 = vcmp.eq.s32.totalorder %v7019_v0, 2  ;;  %v1247_v39 = vrot.slane %v8078_v33, 3  ;;  %v1111_v40 = vrot.slane %v11087_v38, 2  ;;  %vm11088_vm14 = vcmp.lt.s32.totalorder %v10999_v13, 60 }
 0x1ad   : > { %v11082_v53 = vsel %vm8406_vm2, 4294967295, %v11081_v53  ;;  %v8416_v17 = vsel %vm11086_vm3, %v993_v45, %v960_v54  ;;  %vm11089_vm13 = vcmp.ge.s32.totalorder %v10999_v13, 0  ;;  %v11090_v62 = vmov 0  ;;  %v11101_v13 = vld [vmem:[#allocation53_spill] sm:$0xff] }
 0x1ae   : > { %11083 = vst [vmem:[#allocation61_spill] sm:$0xff] %v11082_v53  ;;  %vm8430_vm6 = vmand %vm11089_vm13, %vm11088_vm14  ;;  %v11093_v54 = vrot.slane %v8078_v33, 2  ;;  %vm11094_vm3 = vcmask 1045504   ;;  %v1232_v38 = vrot.slane %v7762_v55, 3  ;;  %v872_v63 = vmul.f32 1.442695, %v845_v5 }
 0x1af   : > { %v11091_v62 = vsel %vm8430_vm6, 4294967295, %v11090_v62  ;;  %vm11095_vm4 = vcmask 261120   ;;  %vm11096_vm14 = vcmp.lt.s32.totalorder %v11009_v43, 60  ;;  %vm11097_vm13 = vcmp.ge.s32.totalorder %v11009_v43, 0  ;;  %v11103_v45 = vld [vmem:[#allocation69_spill] sm:$0xff]  ;;  %v8465_v43 = vld [vmem:[%s10525_s3 + $0xe8] sm:$0xff] }
 0x1b0   : > { %11092 = vst [vmem:[#allocation60_spill] sm:$0xff] %v11091_v62  ;;  %v8438_v14 = vsel %vm11094_vm3, %v1126_v11, %v11093_v54  ;;  %6267 = vmatmul.mubr.msk.f32.vlgmr.msra.gmra.mxu1 %vm11095_vm4, %v7782_v41  ;;  %vm8450_vm12 = vmand %vm11097_vm13, %vm11096_vm14  ;;  %v11098_v33 = vmov 0  ;;  %v11102_v11 = vld [vmem:[#allocation64_spill] sm:$0xff]  ;;  %v1108_v24 = vrot.slane %v11103_v45, 2  ;;  %6297 = vmatmul.mubr.msk.f32.vlgmr.msra.gmra.mxu0 %vm11095_vm4, %v7782_v41  ;;  %vm11104_vm14 = vcmp.lt.s32.totalorder %v11016_v10, 60 }
 0x1b1   : > { %v11099_v33 = vsel %vm8450_vm12, 4294967295, %v11098_v33  ;;  %v8457_v5 = vmul.f32 %v11102_v11, %v1177_v15  ;;  %6280 = vmatpush1.msk.msra.mxu1 %vm8406_vm2, %v10907_v35  ;;  %vm11105_vm13 = vcmp.ge.s32.totalorder %v11016_v10, 0  ;;  %v11106_v15 = vmov 0  ;;  %v606_v54 = vld [vmem:[%s7245_s30 + $0xc0] sm:$0x1]  ;;  %v8488_v53 = vld [vmem:[%s10525_s3 + $0x138] sm:$0xff]  ;;  %2136 = vmatprep.mubr.f32.mxu1 %v10930_v16 }
 0x1b2   : > { %11100 = vst [vmem:[#allocation27_spill] sm:$0xff] %v11099_v33  ;;  %vm8476_vm0 = vmand %vm11105_vm13, %vm11104_vm14  ;;  %v1171_v45 = vsub.f32 %v8416_v17, %v7882_v49  ;;  %v1229_v9 = vrot.slane %v7978_v28, 3  ;;  %6641 = vpow2.f32 %v874_v7  ;;  %6281 = vmatprep.subr.msk.mxu1 %vm8430_vm6, %v10907_v35  ;;  %vm11109_vm4 = vcmp.lt.s32.totalorder %v11026_v52, 60  ;;  %v11114_v10 = vld [vmem:[#allocation30_spill] sm:$0xff]  ;;  %2367 = vmatprep.mubr.f32.mxu0 %v10930_v16 }
 0x1b3   : > { %v11107_v15 = vsel %vm8476_vm0, 4294967295, %v11106_v15  ;;  %vm11110_vm14 = vcmp.ge.s32.totalorder %v11026_v52, 0  ;;  %v11111_v49 = vmov 0  ;;  %v8503_v17 = vmul.f32 %v11114_v10, %v1172_v1  ;;  %6282 = vmatpush1.msk.msra.mxu1 %vm8450_vm12, %v10907_v35  ;;  %v8553_v52 = vpop.eup %6635 }
 0x1b4   : > { %11108 = vst [vmem:[#allocation52_spill] sm:$0xff] %v11107_v15  ;;  %vm8498_vm13 = vmand %vm11110_vm14, %vm11109_vm4  ;;  %v11115_v7 = vrot.slane %v8131_v18, 3  ;;  %vm11116_vm3 = vcmask 1044480   ;;  %v11117_v3 = vrot.slane %v7762_v55, 2  ;;  %vm11118_vm2 = vcmask 1045504   ;;  %v11124_v55 = vld [vmem:[#allocation56_spill] sm:$0xff]  ;;  %6283 = vmatprep.subr.msk.mxu1 %vm8476_vm0, %v10907_v35  ;;  %v8607_v31 = vpop.eup %6637 }
 0x1b5   : > { %v11112_v49 = vsel %vm8498_vm13, 4294967295, %v11111_v49  ;;  %vm11119_vm4 = vcmp.lt.s32.totalorder %v11032_v60, 60  ;;  %vm11120_vm14 = vcmp.ge.s32.totalorder %v11032_v60, 0  ;;  %v11121_v18 = vmov 0  ;;  %vm11127_vm12 = vmmov %vm11116_vm3  ;;  %v11137_v15 = vld [vmem:[#allocation49_spill] sm:$0xff]  ;;  %6284 = vmatpush1.msk.msra.mxu1 %vm8498_vm13, %v10907_v35  ;;  %v8658_v58 = vpop.eup %6639 }
 0x1b6   : > { %11113 = vst [vmem:[#allocation29_spill] sm:$0xff] %v11112_v49  ;;  %v8510_v11 = vsel %vm11116_vm3, %v1247_v39, %v11115_v7  ;;  %v8515_v62 = vsel %vm11118_vm2, %v1111_v40, %v11117_v3  ;;  %vm8526_vm8 = vmand %vm11120_vm14, %vm11119_vm4  ;;  %v11125_v3 = vsub.f32 1.0, %v8325_v6  ;;  %v11126_v39 = vrot.slane %v7855_v42, 3  ;;  %v8545_v40 = vld [vmem:[%s10525_s3 + $0x160] sm:$0xff]  ;;  %v8551_v7 = vld [vmem:[%s10525_s3 + $0xb8] sm:$0xff] }
 0x1b7   : > { %v11122_v18 = vsel %vm8526_vm8, 4294967295, %v11121_v18  ;;  %6643 = vpow2.f32 %v872_v63  ;;  %vm11128_vm4 = vcmask 261120   ;;  %v11132_v63 = vsub.f32 1.0, %v8360_v4  ;;  %6285 = vmatprep.subr.msk.mxu1 %vm8526_vm8, %v10907_v35 }
 0x1b8   : > { %11123 = vst [vmem:[#allocation66_spill] sm:$0xff] %v11122_v18  ;;  %v947_v1 = vrot.slane %v11125_v3, %v7268_v29  ;;  %v8540_v60 = vsel %vm11127_vm12, %v1232_v38, %v11126_v39  ;;  %6268 = vmatmul.mubr.msk.f32.gmra.mxu1 %vm11128_vm4, %v7927_v56  ;;  %vm11129_vm12 = vcmp.ne.f32.partialorder %v7843_v47, %v7843_v47  ;;  %v11133_v3 = vrot.slane %v7978_v28, 2  ;;  %vm11134_vm4 = vmmov %vm11118_vm2 }
 0x1b9   : > { %vm8563_vm14 = vmneg %vm11129_vm12  ;;  %v943_v38 = vrot.slane %v11132_v63, %v7268_v29  ;;  %v11135_v10 = vrot.slane %v8394_v2, 2  ;;  %vm11136_vm12 = vcmask 261120   ;;  %vm11138_vm10 = vcmask 1040384   ;;  %2284 = vmatprep.mubr.f32.mxu1 %v10930_v16 }
 0x1ba   : > { %v8575_v39 = vsel %vm11134_vm4, %v1108_v24, %v11133_v3  ;;  %6298 = vmatmul.mubr.msk.f32.gmra.mxu0 %vm11136_vm12, %v7927_v56  ;;  %6313 = vmatprep.subr.msk.mxu0 %vm11138_vm10, %v11137_v15  ;;  %vm11139_vm3 = vcmp.lt.s32.totalorder %v7514_v8, 60  ;;  %vm11140_vm2 = vcmp.ge.s32.totalorder %v7514_v8, 0  ;;  %v11141_v28 = vmov 0  ;;  %v11144_v24 = vld [vmem:[#allocation78_spill] sm:$0xff] }
 0x1bb   : > { %v1195_v33 = vsub.f32 %v606_v54, %v11135_v10  ;;  %vm8589_vm6 = vmand %vm11140_vm2, %vm11139_vm3  ;;  %v8596_v54 = vmul.f32 %v11144_v24, %v1171_v45  ;;  %v11145_v10 = vsub.f32 1.0, %v8396_v36  ;;  %v11146_v15 = vrot.slane %v8026_v32, 3  ;;  %v11148_v45 = vld [vmem:[#allocation50_spill] sm:$0xff]  ;;  %2645 = vmatprep.mubr.f32.mxu0 %v10930_v16 }
 0x1bc   : > { %v11142_v28 = vsel %vm8589_vm6, 4294967295, %v11141_v28  ;;  %vm11147_vm10 = vcmask 1044480   ;;  %v1259_v8 = vrot.slane %v8465_v43, 3  ;;  %vm11149_vm3 = vcmask 1040384   ;;  %6286 = vmatpush1.msk.msra.mxu1 %vm8589_vm6, %v10907_v35 }
 0x1bd   : > { %11143 = vst [vmem:[#allocation53_spill] sm:$0xff] %v11142_v28  ;;  %v923_v63 = vrot.slane %v11145_v10, %v7268_v29  ;;  %v8604_v3 = vsel %vm11147_vm10, %v1229_v9, %v11146_v15  ;;  %6314 = vmatpush1.msk.msra.mxu0 %vm11149_vm3, %v11148_v45  ;;  %vm11150_vm2 = vcmp.ne.f32.partialorder %v8122_v21, %v8122_v21  ;;  %v11153_v9 = vsub.f32 1.0, %v8325_v6  ;;  %v11160_v45 = vld [vmem:[#allocation57_spill] sm:$0xff] }
 0x1be   : > { %vm8617_vm12 = vmneg %vm11150_vm2  ;;  %v11154_v10 = vsub.f32 1.0, %v8420_v51  ;;  %v1260_v49 = vrot.slane %v8545_v40, 3  ;;  %6316 = vmatprep.subr.msk.mxu0 %vm8563_vm14, %v7843_v47  ;;  %vm11155_vm10 = vcmp.lt.s32.totalorder %v11063_v19, 60  ;;  %vm11156_vm3 = vcmp.ge.s32.totalorder %v11063_v19, 0  ;;  %v605_v47 = vld [vmem:[%s7245_s30 + $0xb8] sm:$0x1] }
 0x1bf   : > { %v1037_v24 = vrot.slane %v11153_v9, %v7271_v30  ;;  %vm8639_vm2 = vmand %vm11156_vm3, %vm11155_vm10  ;;  %v11157_v6 = vmov 0  ;;  %vm11161_vm4 = vcmp.eq.s32.totalorder %v7019_v0, 3  ;;  %v11162_v9 = vsub.f32 1.0, %v8360_v4  ;;  %v8655_v19 = vld [vmem:[%s10525_s3 + $0x130] sm:$0xff]  ;;  %6318 = vmatpush1.msk.msra.mxu0 %vm8617_vm12, %v8122_v21 }
 0x1c0   : > { %v919_v15 = vrot.slane %v11154_v10, %v7268_v29  ;;  %v11158_v6 = vsel %vm8639_vm2, 4294967295, %v11157_v6  ;;  %v971_v40 = vsel %vm11161_vm4, %v947_v1, %v11160_v45  ;;  %v11163_v27 = vrot.slane %v8465_v43, 2  ;;  %vm11166_vm10 = vmmov %vm11161_vm4  ;;  %6529 = vmatprep.subr.msk.mxu1 %vm8639_vm2, %v10907_v35 }
 0x1c1   : > { %11159 = vst [vmem:[#allocation64_spill] sm:$0xff] %v11158_v6  ;;  %v1033_v10 = vrot.slane %v11162_v9, %v7271_v30  ;;  %v892_v18 = vsub.f32 1.0, %v8553_v52  ;;  %vm11164_vm14 = vcmp.ne.f32.partialorder %v11074_v48, %v11074_v48  ;;  %v11167_v52 = vsub.f32 1.0, %v8396_v36  ;;  %v11174_v36 = vld [vmem:[#allocation65_spill] sm:$0xff]  ;;  %vm11175_vm0 = vmmov %vm11166_vm10 }
 0x1c2   : > { %v1200_v42 = vsub.f32 %v611_v59, %v11163_v27  ;;  %v8670_v27 = vsel %vm11164_vm14, 0.0, %v11074_v48  ;;  %v11165_v59 = vld [vmem:[#allocation62_spill] sm:$0xff]  ;;  %v11168_v45 = vrot.slane %v8488_v53, 3  ;;  %vm11169_vm3 = vcmp.lt.s32.totalorder %v11084_v46, 60 }
 0x1c3   : > { %v970_v4 = vsel %vm11166_vm10, %v943_v38, %v11165_v59  ;;  %v1013_v1 = vrot.slane %v11167_v52, %v7271_v30  ;;  %vm11170_vm14 = vcmp.ge.s32.totalorder %v11084_v46, 0  ;;  %v11171_v48 = vmov 0 }
 0x1c4   : > { %v8682_v9 = vmul.f32 %v11168_v45, %v1195_v33  ;;  %vm8692_vm4 = vmand %vm11170_vm14, %vm11169_vm3  ;;  %v965_v21 = vsel %vm11175_vm0, %v923_v63, %v11174_v36  ;;  %v11176_v33 = vsub.f32 1.0, %v8420_v51  ;;  %v887_v46 = vsub.f32 1.0, %v8607_v31  ;;  %v11179_v63 = vld [vmem:[#allocation68_spill] sm:$0xff]  ;;  %v8745_v36 = vpop.permute.xlu1 %2451 }
 0x1c5   : > { %v11172_v48 = vsel %vm8692_vm4, 4294967295, %v11171_v48  ;;  %vm11177_vm12 = vcmask 261120   ;;  %vm11178_vm14 = vcmp.eq.s32.totalorder %v7019_v0, 2  ;;  %v964_v51 = vsel %vm11175_vm0, %v919_v15, %v11179_v63  ;;  %v11206_v63 = vld [vmem:[#allocation24_spill] sm:$0xff] }
 0x1c6   : > { %11173 = vst [vmem:[#allocation69_spill] sm:$0xff] %v11172_v48  ;;  %v1009_v38 = vrot.slane %v11176_v33, %v7271_v30  ;;  %6287 = vmatmul.mubr.msk.f32.vlgmr.msra.gmra.mxu1 %vm11177_vm12, %v7782_v41  ;;  %v1061_v32 = vsel %vm11178_vm14, %v1037_v24, %v971_v40  ;;  %v11180_v59 = vrot.slane %v8551_v7, 2  ;;  %v1242_v52 = vrot.slane %v8655_v19, 3  ;;  %v641_v19 = vld [vmem:[%s9077_s13 + $0xc8] sm:$0xff] }
 0x1c7   : > { %vm11181_vm12 = vcmask 72704   ;;  %6530 = vmatpush3.msk.msra.mxu1 %vm8639_vm2, %v10907_v35  ;;  %vm11182_vm3 = vcmp.lt.s32.totalorder %v11101_v13, 60  ;;  %vm11183_vm14 = vcmp.ge.s32.totalorder %v11101_v13, 0  ;;  %v11184_v24 = vmov 0  ;;  %2290 = vmatprep.mubr.f32.mxu1 %v10930_v16 }
 0x1c8   : > { %v1194_v31 = vsub.f32 %v605_v47, %v11180_v59  ;;  %6319 = vmatmul.mubr.msk.f32.vlgmr.msra.gmra.mxu0 %vm11181_vm12, %v8660_v44  ;;  %vm8731_vm13 = vmand %vm11183_vm14, %vm11182_vm3  ;;  %vm11187_vm0 = vcmp.eq.s32.totalorder %v7019_v0, 2  ;;  %v959_v40 = vrot.slane %v892_v18, %v7268_v29  ;;  %vm11188_vm10 = vcmask 1044480   ;;  %6531 = vmatprep.subr.msk.mxu1 %vm8692_vm4, %v10907_v35 }
 0x1c9   : > { %v11185_v24 = vsel %vm8731_vm13, 4294967295, %v11184_v24  ;;  %v1060_v15 = vsel %vm11187_vm0, %v1033_v10, %v970_v4  ;;  %v8739_v47 = vsel %vm11188_vm10, %v1259_v8, %v1260_v49  ;;  %v886_v45 = vsub.f32 1.0, %v8658_v58  ;;  %vm11189_vm3 = vmmov %vm11187_vm0  ;;  %v11190_v8 = vld [vmem:[#allocation75_spill] sm:$0xff]  ;;  %6532 = vmatpush3.msk.msra.mxu1 %vm8692_vm4, %v10907_v35  ;;  %2651 = vmatprep.mubr.f32.mxu0 %v10930_v16 }
 0x1ca   : > { %11186 = vst [vmem:[#allocation30_spill] sm:$0xff] %v11185_v24  ;;  %v1055_v13 = vsel %vm11189_vm3, %v1013_v1, %v965_v21  ;;  %v8752_v10 = vmul.f32 %v1260_v49, %v1200_v42  ;;  %v1138_v4 = vrot.slane %v11190_v8, 2  ;;  %vm11191_vm10 = vcmp.ne.f32.partialorder %v8295_v61, %v8295_v61  ;;  %vm11192_vm14 = vmmov %vm11187_vm0  ;;  %v8769_v21 = vpop.eup %6641  ;;  %6533 = vmatprep.subr.msk.mxu1 %vm8731_vm13, %v10907_v35 }
 0x1cb   : > { %v8763_v58 = vsel %vm11191_vm10, 0.0, %v8295_v61  ;;  %v1182_v1 = vsub.f32 %v1061_v32, %v8384_v23  ;;  %v1054_v49 = vsel %vm11192_vm14, %v1009_v38, %v964_v51  ;;  %v939_v42 = vrot.slane %v887_v46, %v7268_v29  ;;  %6534 = vmatpush3.msk.msra.mxu1 %vm8731_vm13, %v10907_v35 }
 0x1cc   : > { %vm11193_vm0 = vcmask 261120   ;;  %vm11194_vm3 = vcmp.lt.s32.totalorder %v11124_v55, 60  ;;  %vm11195_vm10 = vcmp.ge.s32.totalorder %v11124_v55, 0  ;;  %v11196_v61 = vmov 0  ;;  %v11201_v55 = vld [vmem:[#allocation59_spill] sm:$0xff] }
 0x1cd   : > { %6288 = vmatmul.mubr.msk.f32.gmra.mxu1 %vm11193_vm0, %v7927_v56  ;;  %vm8780_vm12 = vmand %vm11195_vm10, %vm11194_vm3  ;;  %vm11199_vm14 = vcmp.ne.f32.partialorder %v8300_v22, %v8300_v22  ;;  %v1181_v33 = vsub.f32 %v1060_v15, %v8438_v14  ;;  %v8793_v38 = vmul.f32 %v1242_v52, %v1194_v31  ;;  %v1049_v32 = vrot.slane %v892_v18, %v7271_v30  ;;  %v11208_v18 = vld [vmem:[#allocation80_spill] sm:$0xff]  ;;  %v8813_v15 = vpop.eup %6643 }
 0x1ce   : > { %v11197_v61 = vsel %vm8780_vm12, 4294967295, %v11196_v61  ;;  %v8788_v23 = vsel %vm11199_vm14, 0.0, %v8300_v22  ;;  %vm11200_vm0 = vcmask 72704   ;;  %vm11202_vm3 = vcmask 1040384   ;;  %6535 = vmatprep.subr.msk.mxu1 %vm8780_vm12, %v10907_v35 }
 0x1cf   : > { %11198 = vst [vmem:[#allocation56_spill] sm:$0xff] %v11197_v61  ;;  %6320 = vmatmul.mubr.msk.f32.gmra.mxu0 %vm11200_vm0, %v8745_v36  ;;  %6329 = vmatprep.subr.msk.mxu0 %vm11202_vm3, %v11201_v55  ;;  %vm11203_vm10 = vcmp.ne.f32.partialorder %v8377_v34, %v8377_v34  ;;  %v1176_v14 = vsub.f32 %v1055_v13, %v8515_v62  ;;  %vm11207_vm14 = vcmp.eq.s32.totalorder %v7019_v0, 3  ;;  %v1123_v59 = vrot.slane %v11208_v18, 2  ;;  %v11215_v18 = vld [vmem:[#allocation31_spill] sm:$0xff] }
 0x1d0   : > { %vm8803_vm2 = vmneg %vm11203_vm10  ;;  %v974_v51 = vsel %vm11207_vm14, %v959_v40, %v11206_v63  ;;  %v935_v31 = vrot.slane %v886_v45, %v7268_v29  ;;  %vm11209_vm0 = vcmask 261120   ;;  %vm11210_vm3 = vcmp.ne.f32.partialorder %v8457_v5, %v8457_v5  ;;  %6536 = vmatpush3.msk.msra.mxu1 %vm8780_vm12, %v10907_v35  ;;  %2799 = vmatprep.mubr.f32.mxu0 %v10930_v16 }
 0x1d1   : > { %6537 = vmatprep.mubr.msk.f32.mxu1 %vm11209_vm0, %v7782_v41  ;;  %vm8823_vm10 = vmneg %vm11210_vm3  ;;  %v1175_v40 = vsub.f32 %v1054_v49, %v8575_v39  ;;  %v11213_v13 = vrot.slane %v8465_v43, 2  ;;  %vm11214_vm14 = vcmask 1045504   ;;  %v1029_v55 = vrot.slane %v887_v46, %v7271_v30  ;;  %v11217_v43 = vld [vmem:[#allocation79_spill] sm:$0xff]  ;;  %v11220_v49 = vld [vmem:[#allocation82_spill] sm:$0xff] }
 0x1d2   : > { %v1244_v63 = vrot.slane %v8394_v2, 3  ;;  %vm11216_vm4 = vcmask 1040384   ;;  %v8839_v41 = vmul.f32 %v8389_v20, %v1182_v1  ;;  %vm11218_vm3 = vcmp.eq.s32.totalorder %v7019_v0, 3 }
 0x1d3   : > { %v1140_v8 = vsel %vm11214_vm14, %v1138_v4, %v11213_v13  ;;  %6330 = vmatpush1.msk.msra.mxu0 %vm11216_vm4, %v11215_v18  ;;  %v969_v39 = vsel %vm11218_vm3, %v939_v42, %v11217_v43  ;;  %v891_v46 = vsub.f32 1.0, %v8769_v21  ;;  %v8854_v20 = vmul.f32 %v8510_v11, %v1181_v33  ;;  %v11226_v33 = vld [vmem:[#allocation33_spill] sm:$0xff] }
 0x1d4   : > { %6332 = vmatprep.subr.msk.mxu0 %vm8803_vm2, %v8377_v34  ;;  %vm11219_vm4 = vcmp.eq.s32.totalorder %v7019_v0, 2  ;;  %v1025_v1 = vrot.slane %v886_v45, %v7271_v30  ;;  %v1120_v42 = vrot.slane %v11220_v49, 2  ;;  %vm11221_vm2 = vcmp.ne.f32.partialorder %v8503_v17, %v8503_v17  ;;  %v610_v43 = vld [vmem:[%s7245_s30 + $0xe0] sm:$0x1]  ;;  %v609_v49 = vld [vmem:[%s7245_s30 + $0xd8] sm:$0x1] }
 0x1d5   : > { %v1064_v4 = vsel %vm11219_vm4, %v1049_v32, %v974_v51  ;;  %6334 = vmatpush1.msk.msra.mxu0 %vm8823_vm10, %v8457_v5  ;;  %vm8867_vm14 = vmneg %vm11221_vm2  ;;  %v8872_v11 = vmul.f32 %v8540_v60, %v1176_v14  ;;  %v11224_v45 = vrot.slane %v8394_v2, 2  ;;  %vm11225_vm3 = vcmask 1045504  }
 0x1d6   : > { %vm11227_vm4 = vcmp.eq.s32.totalorder %v7019_v0, 3  ;;  %v890_v32 = vsub.f32 1.0, %v8813_v15  ;;  %vm11228_vm10 = vmmov %vm11209_vm0  ;;  %vm11229_vm2 = vcmask 1040384   ;;  %vm11230_vm0 = vcmp.ne.f32.partialorder %v8596_v54, %v8596_v54  ;;  %v8935_v15 = vld [vmem:[%s10525_s3 + $0xd8] sm:$0xff] }
 0x1d7   : > { %v1125_v21 = vsel %vm11225_vm3, %v1123_v59, %v11224_v45  ;;  %v968_v5 = vsel %vm11227_vm4, %v935_v31, %v11226_v33  ;;  %6538 = vmatmul.mubr.msk.f32.vlgmr.msra.gmra.mxu1 %vm11228_vm10, %v7927_v56  ;;  %6305 = vmatprep.subr.msk.mxu1 %vm11229_vm2, %v8349_v37  ;;  %vm8888_vm13 = vmneg %vm11230_vm0  ;;  %vm11233_vm3 = vcmp.ne.f32.partialorder %v8354_v25, %v8354_v25  ;;  %vm11234_vm4 = vcmp.eq.s32.totalorder %v7019_v0, 2 }
 0x1d8   : > { %v1371_v2 = vsel %vm11233_vm3, 0.0, %v8354_v25  ;;  %v8897_v22 = vmul.f32 %v8604_v3, %v1175_v40  ;;  %v1059_v56 = vsel %vm11234_vm4, %v1029_v55, %v969_v39  ;;  %v11235_v37 = vrot.slane %v8488_v53, 3  ;;  %6306 = vmatpush1.msk.msra.mxu1 %vm11229_vm2, %v8670_v27  ;;  %v8917_v53 = vld [vmem:[%s10525_s3 + $0xe0] sm:$0xff]  ;;  %2568 = vmatprep.mubr.f32.mxu1 %v10930_v16  ;;  %v633_v55 = vld [vmem:[%s9077_s13 + $0x88] sm:$0xff] }
 0x1d9   : > { %vm11236_vm10 = vcmask 1044480   ;;  %vm11237_vm0 = vcmask 72704   ;;  %vm11238_vm3 = vcmp.ne.f32.partialorder %v8358_v57, %v8358_v57  ;;  %vm1333_vm12 = vcmp.ne.f32.partialorder %v8839_v41, %v8839_v41  ;;  %6308 = vmatprep.subr.msk.mxu1 %vm8867_vm14, %v8503_v17 }
 0x1da   : > { %v1246_v14 = vsel %vm11236_vm10, %v1244_v63, %v11235_v37  ;;  %6335 = vmatmul.mubr.msk.f32.vlgmr.msra.gmra.mxu0 %vm11237_vm0, %v8660_v44  ;;  %v1377_v25 = vsel %vm11238_vm3, 0.0, %v8358_v57  ;;  %v1185_v3 = vsub.f32 %v1064_v4, %v1140_v8  ;;  %v955_v51 = vrot.slane %v891_v46, %v7268_v29  ;;  %6310 = vmatpush1.msk.msra.mxu1 %vm8888_vm13, %v8596_v54  ;;  %vm8955_vm13 = vmneg %vm1333_vm12  ;;  %v9100_v54 = vld [vmem:[%s10526_s4] sm:$0xff] }
 0x1db   : > { %vm1332_vm4 = vcmp.ne.f32.partialorder %v8854_v20, %v8854_v20  ;;  %vm11239_vm10 = vcmp.eq.s32.totalorder %v7019_v0, 2  ;;  %v11240_v27 = vrot.slane %v8551_v7, 2  ;;  %vm11241_vm0 = vcmask 1045504   ;;  %2805 = vmatprep.mubr.f32.mxu0 %v10930_v16 }
 0x1dc   : > { %v1058_v57 = vsel %vm11239_vm10, %v1025_v1, %v968_v5  ;;  %v1241_v31 = vrot.slane %v8551_v7, 3  ;;  %vm1327_vm14 = vcmp.ne.f32.partialorder %v8872_v11, %v8872_v11  ;;  %vm11242_vm2 = vcmp.ne.f32.partialorder %v8682_v9, %v8682_v9 }
 0x1dd   : > { %v1122_v59 = vsel %vm11241_vm0, %v1120_v42, %v11240_v27  ;;  %v1376_v17 = vsel %vm11242_vm2, 0.0, %v8682_v9  ;;  %v1180_v7 = vsub.f32 %v1059_v56, %v1125_v21  ;;  %v951_v62 = vrot.slane %v890_v32, %v7268_v29  ;;  %v689_v9 = vld [vmem:[%s10525_s3 + $0x158] sm:$0xff]  ;;  %v688_v42 = vld [vmem:[%s10525_s3 + $0x150] sm:$0xff] }
 0x1de   : > { %vm11243_vm3 = vcmask 72704   ;;  %vm11244_vm10 = vcmask 1040384   ;;  %v1136_v40 = vrot.slane %v8917_v53, 2  ;;  %v1045_v13 = vrot.slane %v891_v46, %v7271_v30  ;;  %v11252_v46 = vld [vmem:[#allocation28_spill] sm:$0xff] }
 0x1df   : > { %6311 = vmatmul.mubr.msk.f32.vlgmr.msra.gmra.mxu1 %vm11243_vm3, %v8660_v44  ;;  %6321 = vmatprep.subr.msk.mxu1 %vm11244_vm10, %v8763_v58  ;;  %v11247_v58 = vld [vmem:[#allocation39_spill] sm:$0xff]  ;;  %vm11248_vm2 = vmmov %vm11243_vm3  ;;  %v8979_v63 = vmul.f32 %v8739_v47, %v1185_v3  ;;  %v1179_v18 = vsub.f32 %v1058_v57, %v1122_v59  ;;  %v1133_v39 = vrot.slane %v8935_v15, 2  ;;  %vm11258_vm0 = vcmp.ne.f32.partialorder %v8752_v10, %v8752_v10  ;;  %v631_v27 = vld [vmem:[%s9077_s13 + $0x78] sm:$0xff] }
 0x1e0   : > { %v1135_v8 = vrot.slane %v11247_v58, 2  ;;  %6336 = vmatmul.mubr.msk.f32.gmra.mxu0 %vm11248_vm2, %v8745_v36  ;;  %vm11249_vm12 = vmmov %vm11244_vm10  ;;  %vm11253_vm10 = vcmp.eq.s32.totalorder %v7019_v0, 3  ;;  %v1381_v47 = vsel %vm11258_vm0, 0.0, %v8752_v10  ;;  %vm11259_vm6 = vcmask 1044480   ;;  %2574 = vmatprep.mubr.f32.mxu1 %v10930_v16  ;;  %v617_v59 = vld [vmem:[%s9077_s13 + $0x8] sm:$0xff] }
 0x1e1   : > { %6345 = vmatprep.subr.msk.mxu0 %vm11249_vm12, %v8788_v23  ;;  %vm8974_vm3 = vmneg %vm1332_vm4  ;;  %v973_v4 = vsel %vm11253_vm10, %v955_v51, %v11252_v46  ;;  %v1243_v1 = vsel %vm11259_vm6, %v1241_v31, %v1242_v52  ;;  %v1041_v34 = vrot.slane %v890_v32, %v7271_v30  ;;  %v1132_v45 = vrot.slane %v8166_v12, 2  ;;  %2953 = vmatprep.mubr.f32.mxu0 %v10930_v16  ;;  %v632_v51 = vld [vmem:[%s9077_s13 + $0x80] sm:$0xff]  ;;  %v9115_v58 = vld [vmem:[%s10526_s4 + $0x8] sm:$0xff] }
 0x1e2   : > { %vm11254_vm2 = vmmov %vm11249_vm12  ;;  %vm1345_vm6 = vcmp.ne.f32.partialorder %v8793_v38, %v8793_v38  ;;  %v1301_v52 = vmul.f32 %v1246_v14, %v1180_v7  ;;  %v1257_v10 = vrot.slane %v689_v9, 3  ;;  %v972_v12 = vsel %vm11253_vm10, %v951_v62, %v8161_v50  ;;  %v636_v62 = vld [vmem:[%s9077_s13 + $0xa0] sm:$0xff]  ;;  %v635_v9 = vld [vmem:[%s9077_s13 + $0x98] sm:$0xff] }
 0x1e3   : > { %6322 = vmatpush1.msk.msra.mxu1 %vm11254_vm2, %v1371_v2  ;;  %vm11255_vm12 = vmmov %vm11254_vm2  ;;  %vm11264_vm2 = vcmask 1045504   ;;  %v1256_v5 = vrot.slane %v8917_v53, 3  ;;  %v1300_v50 = vmul.f32 %v1243_v1, %v1179_v18  ;;  %v1254_v32 = vrot.slane %v688_v42, 3  ;;  %v640_v18 = vld [vmem:[%s9077_s13 + $0xc0] sm:$0xff]  ;;  %v637_v23 = vld [vmem:[%s9077_s13 + $0xa8] sm:$0xff] }
 0x1e4   : > { %6346 = vmatpush1.msk.msra.mxu0 %vm11255_vm12, %v1377_v25  ;;  %vm8991_vm4 = vmneg %vm1327_vm14  ;;  %vm11260_vm14 = vcmp.ne.f32.partialorder %v8897_v22, %v8897_v22  ;;  %v1137_v33 = vsel %vm11264_vm2, %v1135_v8, %v1136_v40  ;;  %vm11265_vm12 = vcmask 72704   ;;  %v1375_v56 = vsel %vm1345_vm6, 0.0, %v8793_v38  ;;  %v634_v8 = vld [vmem:[%s9077_s13 + $0x90] sm:$0xff]  ;;  %v624_v46 = vld [vmem:[%s9077_s13 + $0x40] sm:$0xff] }
 0x1e5   : > { %6348 = vmatprep.subr.msk.mxu0 %vm8955_vm13, %v8839_v41  ;;  %vm9015_vm0 = vmneg %vm11260_vm14  ;;  %v1199_v41 = vsub.f32 %v610_v43, %v1136_v40  ;;  %vm11263_vm13 = vcmp.eq.s32.totalorder %v7019_v0, 2  ;;  %6312 = vmatmul.mubr.msk.f32.gmra.mxu1 %vm11265_vm12, %v8745_v36  ;;  %v621_v40 = vld [vmem:[%s9077_s13 + $0x28] sm:$0xff]  ;;  %v639_v43 = vld [vmem:[%s9077_s13 + $0xb8] sm:$0xff] }
 0x1e6   : > { %6350 = vmatpush1.msk.msra.mxu0 %vm8974_vm3, %v8854_v20  ;;  %v1063_v21 = vsel %vm11263_vm13, %v1045_v13, %v973_v4  ;;  %6324 = vmatprep.subr.msk.mxu1 %vm8991_vm4, %v8872_v11  ;;  %vm1336_vm3 = vcmp.ne.f32.partialorder %v8979_v63, %v8979_v63  ;;  %v1198_v20 = vsub.f32 %v609_v49, %v1133_v39  ;;  %vm11266_vm14 = vmmov %vm11265_vm12  ;;  %v1253_v11 = vrot.slane %v8935_v15, 3  ;;  %v616_v15 = vld [vmem:[%s9077_s13] sm:$0xff]  ;;  %v638_v4 = vld [vmem:[%s9077_s13 + $0xb0] sm:$0xff] }
 0x1e7   : > { %6351 = vmatmul.mubr.msk.f32.vlgmr.msra.gmra.mxu0 %vm11266_vm14, %v8660_v44  ;;  %6326 = vmatpush1.msk.msra.mxu1 %vm9015_vm0, %v8897_v22  ;;  %vm11267_vm10 = vmmov %vm11263_vm13  ;;  %vm1331_vm4 = vcmp.ne.f32.partialorder %v1301_v52, %v1301_v52  ;;  %v1184_v37 = vsub.f32 %v1063_v21, %v1137_v33  ;;  %v1320_v14 = vmul.f32 %v1257_v10, %v1199_v41  ;;  %vm11273_vm14 = vcmask 1044480   ;;  %v620_v13 = vld [vmem:[%s9077_s13 + $0x20] sm:$0xff]  ;;  %v643_v1 = vld [vmem:[%s9077_s13 + $0xd8] sm:$0xff] }
 0x1e8   : > { %v1062_v60 = vsel %vm11267_vm10, %v1041_v34, %v972_v12  ;;  %vm11268_vm13 = vmmov %vm11264_vm2  ;;  %2722 = vmatprep.mubr.f32.mxu1 %v10930_v16  ;;  %2959 = vmatprep.mubr.f32.mxu0 %v10930_v16  ;;  %vm11269_vm2 = vcmask 1040384   ;;  %v1258_v25 = vsel %vm11273_vm14, %v1256_v5, %v1257_v10  ;;  %vm11274_vm10 = vcmask 72704   ;;  %v622_v49 = vld [vmem:[%s9077_s13 + $0x30] sm:$0xff]  ;;  %v629_v42 = vld [vmem:[%s9077_s13 + $0x68] sm:$0xff] }
 0x1e9   : > { %v1134_v2 = vsel %vm11268_vm13, %v1132_v45, %v1133_v39  ;;  %6337 = vmatprep.subr.msk.mxu1 %vm11269_vm2, %v1376_v17  ;;  %vm11270_vm0 = vmmov %vm11269_vm2  ;;  %6327 = vmatmul.mubr.msk.f32.vlgmr.msra.gmra.mxu1 %vm11274_vm10, %v8660_v44  ;;  %vm1330_vm13 = vcmp.ne.f32.partialorder %v1300_v50, %v1300_v50  ;;  %v1319_v38 = vmul.f32 %v1254_v32, %v1198_v20  ;;  %v618_v39 = vld [vmem:[%s9077_s13 + $0x10] sm:$0xff]  ;;  %v628_v34 = vld [vmem:[%s9077_s13 + $0x60] sm:$0xff] }
 0x1ea   : > { %6540 = vmatprep.subr.msk.mxu0 %vm11270_vm0, %v1381_v47  ;;  %vm9059_vm12 = vmneg %vm1336_vm3  ;;  %v1183_v3 = vsub.f32 %v1062_v60, %v1134_v2  ;;  %6338 = vmatpush1.msk.msra.mxu1 %vm11270_vm0, %v1375_v56  ;;  %v1305_v57 = vmul.f32 %v1258_v25, %v1184_v37  ;;  %v642_v45 = vld [vmem:[%s9077_s13 + $0xd0] sm:$0xff]  ;;  %v645_v12 = vld [vmem:[%s9077_s13 + $0xe8] sm:$0xff] }
 0x1eb   : > { %vm11275_vm6 = vmmov %vm11270_vm0  ;;  %2728 = vmatprep.mubr.f32.mxu1 %v10930_v16  ;;  %v626_v10 = vld [vmem:[%s9077_s13 + $0x50] sm:$0xff] }
 0x1ec   : > { %6541 = vmatpush3.msk.msra.mxu0 %vm11275_vm6, %v1381_v47  ;;  %vm11276_vm2 = vmmov %vm11274_vm10  ;;  %vm3118_vm6 = vcmask 130048   ;;  %v644_v47 = vld [vmem:[%s9077_s13 + $0xe0] sm:$0xff]  ;;  %v630_v41 = vld [vmem:[%s9077_s13 + $0x70] sm:$0xff] }
 0x1ed   : > { %6352 = vmatmul.mubr.msk.f32.gmra.mxu0 %vm11276_vm2, %v8745_v36  ;;  %vm6339_vm3 = vmneg %vm1331_vm4  ;;  %6542 = vmatprep.subr.msk.mxu0 %vm9059_vm12, %v8979_v63 }
 0x1ee   : > { %vm11277_vm8 = vmmov %vm11273_vm14  ;;  %6543 = vmatpush3.msk.msra.mxu0 %vm9059_vm12, %v8979_v63  ;;  %6340 = vmatprep.subr.msk.mxu1 %vm6339_vm3, %v1301_v52  ;;  %vm1349_vm14 = vcmp.ne.f32.partialorder %v1319_v38, %v1319_v38  ;;  %vm1335_vm12 = vcmp.ne.f32.partialorder %v1305_v57, %v1305_v57  ;;  %v619_v63 = vld [vmem:[%s9077_s13 + $0x18] sm:$0xff] }
 0x1ef   : > { %v1255_v53 = vsel %vm11277_vm8, %v1253_v11, %v1254_v32  ;;  %vm11278_vm15 = vmmov %vm11276_vm2  ;;  %3151 = vmatprep.subr.mxu0 %v632_v51  ;;  %v1379_v7 = vsel %vm1349_vm14, 0.0, %v1319_v38  ;;  %v627_v52 = vld [vmem:[%s9077_s13 + $0x58] sm:$0xff] }
 0x1f0   : > { %6544 = vmatprep.mubr.msk.f32.mxu0 %vm11278_vm15, %v8660_v44  ;;  %vm6341_vm8 = vmneg %vm1330_vm13  ;;  %vm1350_vm15 = vcmp.ne.f32.partialorder %v1320_v14, %v1320_v14  ;;  %v1304_v31 = vmul.f32 %v1255_v53, %v1183_v3 }
 0x1f1   : > { %vm11279_vm4 = vmmov %vm11276_vm2  ;;  %6342 = vmatpush1.msk.msra.mxu1 %vm6341_vm8, %v1300_v50  ;;  %v1380_v17 = vsel %vm1350_vm15, 0.0, %v1320_v14 }
 0x1f2   : > { %6328 = vmatmul.mubr.msk.f32.gmra.mxu1 %vm11279_vm4, %v8745_v36  ;;  %vm11280_vm10 = vmmov %vm11276_vm2  ;;  %vm1334_vm13 = vcmp.ne.f32.partialorder %v1304_v31, %v1304_v31  ;;  %6353 = vmatprep.subr.msk.mxu1 %vm11270_vm0, %v1380_v17 }
 0x1f3   : > { %6545 = vmatmul.mubr.msk.f32.vlgmr.msra.gmra.mxu0 %vm11280_vm10, %v8745_v36  ;;  %2876 = vmatprep.mubr.f32.mxu1 %v10930_v16  ;;  %vm6355_vm3 = vmneg %vm1335_vm12 }
 0x1f4   : > { %3152 = vmatpush1.msra.mxu0 %v631_v27  ;;  %3187 = vmatprep.mubr.f32.mxu0 %v10930_v16  ;;  %vm11281_vm8 = vmmov %vm11270_vm0 }
 0x1f5   : > { %3153 = vmatprep.subr.mxu0 %v617_v59  ;;  %vm6357_vm15 = vmneg %vm1334_vm13 }
 0x1f6   : > { %3154 = vmatpush1.msra.mxu0 %v616_v15  ;;  %6343 = vmatmul.mubr.msk.f32.vlgmr.msra.gmra.mxu1 %vm11276_vm2, %v8660_v44  ;;  %vm11282_vm4 = vmmov %vm11276_vm2 }
 0x1f7   : > { %6366 = vmatmul.mubr.msk.f32.vlgmr.msra.gmra.mxu0 %vm3118_vm6, %v9100_v54  ;;  %6354 = vmatpush1.msk.msra.mxu1 %vm11281_vm8, %v1379_v7  ;;  %vm11283_vm14 = vmmov %vm11276_vm2 }
 0x1f8   : > { %2882 = vmatprep.mubr.f32.mxu1 %v10930_v16  ;;  %3193 = vmatprep.mubr.f32.mxu0 %v10930_v16  ;;  %vm11284_vm10 = vmmov %vm11276_vm2  ;;  %vm6767_vm2 = vmmov 0  }
 0x1f9   : > { %6356 = vmatprep.subr.msk.mxu1 %vm6355_vm3, %v1305_v57  ;;  %3305 = vmatprep.subr.mxu0 %v636_v62 }
 0x1fa   : > { %6344 = vmatmul.mubr.msk.f32.gmra.mxu1 %vm11282_vm4, %v8745_v36  ;;  %3306 = vmatpush1.msra.mxu0 %v635_v9 }
 0x1fb   : > { %6367 = vmatmul.mubr.msk.f32.gmra.mxu0 %vm3118_vm6, %v9115_v58  ;;  %6358 = vmatpush1.msk.msra.mxu1 %vm6357_vm15, %v1304_v31 }
 0x1fc   : > { %3307 = vmatprep.subr.mxu0 %v621_v40  ;;  %3030 = vmatprep.mubr.f32.mxu1 %v10930_v16 }
 0x1fd   : > { %3308 = vmatpush1.msra.mxu0 %v620_v13  ;;  %3341 = vmatprep.mubr.f32.mxu0 %v10930_v16 }
 0x1fe   : > { %6359 = vmatmul.mubr.msk.f32.vlgmr.msra.gmra.mxu1 %vm11283_vm14, %v8660_v44  ;;  %3228 = vmatprep.subr.mxu1 %v634_v8  ;;  %v625_v44 = vld [vmem:[%s9077_s13 + $0x48] sm:$0xff] }
 0x1ff   : > { %6370 = vmatmul.mubr.msk.f32.vlgmr.msra.gmra.mxu0 %vm3118_vm6, %v9100_v54  ;;  %3229 = vmatpush1.msra.mxu1 %v633_v55 }
 0x200   : > { %3036 = vmatprep.mubr.f32.mxu1 %v10930_v16  ;;  %3347 = vmatprep.mubr.f32.mxu0 %v10930_v16 }
 0x201   : > { %3230 = vmatprep.subr.mxu1 %v619_v63  ;;  %3459 = vmatprep.subr.mxu0 %v640_v18 }
 0x202   : > { %6360 = vmatmul.mubr.msk.f32.gmra.mxu1 %vm11284_vm10, %v8745_v36  ;;  %3460 = vmatpush1.msra.mxu0 %v639_v43  ;;  %v623_v36 = vld [vmem:[%s9077_s13 + $0x38] sm:$0xff] }
 0x203   : > { %6371 = vmatmul.mubr.msk.f32.gmra.mxu0 %vm3118_vm6, %v9115_v58  ;;  %3231 = vmatpush1.msra.mxu1 %v618_v39 }
 0x204   : > { %3461 = vmatprep.subr.mxu0 %v625_v44  ;;  %3264 = vmatprep.mubr.f32.mxu1 %v10930_v16 }
 0x205   : > { %3462 = vmatpush1.msra.mxu0 %v624_v46  ;;  %3495 = vmatprep.mubr.f32.mxu0 %v10930_v16 }
 0x206   : > { %6368 = vmatmul.mubr.msk.f32.vlgmr.msra.gmra.mxu1 %vm3118_vm6, %v9100_v54  ;;  %3382 = vmatprep.subr.mxu1 %v638_v4 }
 0x207   : > { %6374 = vmatmul.mubr.msk.f32.vlgmr.msra.gmra.mxu0 %vm3118_vm6, %v9100_v54  ;;  %3383 = vmatpush1.msra.mxu1 %v637_v23 }
 0x208   : > { %3270 = vmatprep.mubr.f32.mxu1 %v10930_v16  ;;  %3501 = vmatprep.mubr.f32.mxu0 %v10930_v16 }
 0x209   : > { %3384 = vmatprep.subr.mxu1 %v623_v36  ;;  %3613 = vmatprep.subr.mxu0 %v644_v47 }
 0x20a   : > { %6369 = vmatmul.mubr.msk.f32.gmra.mxu1 %vm3118_vm6, %v9115_v58  ;;  %3614 = vmatpush1.msra.mxu0 %v643_v1 }
 0x20b   : > { %6375 = vmatmul.mubr.msk.f32.gmra.mxu0 %vm3118_vm6, %v9115_v58  ;;  %3385 = vmatpush1.msra.mxu1 %v622_v49 }
 0x20c   : > { %3615 = vmatprep.subr.mxu0 %v629_v42  ;;  %3418 = vmatprep.mubr.f32.mxu1 %v10930_v16 }
 0x20d   : > { %3616 = vmatpush1.msra.mxu0 %v628_v34  ;;  %3649 = vmatprep.mubr.f32.mxu0 %v10930_v16 }
 0x20e   : > { %6372 = vmatmul.mubr.msk.f32.vlgmr.msra.gmra.mxu1 %vm3118_vm6, %v9100_v54  ;;  %3536 = vmatprep.subr.mxu1 %v642_v45 }
 0x20f   : > { %6378 = vmatmul.mubr.msk.f32.vlgmr.msra.gmra.mxu0 %vm3118_vm6, %v9100_v54  ;;  %3537 = vmatpush1.msra.mxu1 %v641_v19 }
 0x210   : > { %3424 = vmatprep.mubr.f32.mxu1 %v10930_v16  ;;  %3655 = vmatprep.mubr.f32.mxu0 %v10930_v16 }
 0x211   : > { %3538 = vmatprep.subr.mxu1 %v627_v52 }
 0x212   : > { %6373 = vmatmul.mubr.msk.f32.gmra.mxu1 %vm3118_vm6, %v9115_v58 }
 0x213   : > { %6379 = vmatmul.mubr.msk.f32.gmra.mxu0 %vm3118_vm6, %v9115_v58  ;;  %3539 = vmatpush1.msra.mxu1 %v626_v10 }
 0x214   : > { %3572 = vmatprep.mubr.f32.mxu1 %v10930_v16  ;;  %6547 = vmatprep.subr.mxu1 %v645_v12 }
 0x215   : > { %3965 = vmatprep.mubr.f32.mxu0 %v10930_v16 }
 0x216   : > { %6376 = vmatmul.mubr.msk.f32.vlgmr.msra.gmra.mxu1 %vm3118_vm6, %v9100_v54 }
 0x217   : > { %3578 = vmatprep.mubr.f32.mxu1 %v10930_v16  ;;  %6548 = vmatpush3.msra.mxu1 %v645_v12 }
 0x218   : > { %6549 = vmatprep.subr.mxu1 %v630_v41 }
 0x219   : > { %6550 = vmatpush3.msra.mxu1 %v630_v41 }
 0x21a   : > { %6377 = vmatmul.mubr.msk.f32.gmra.mxu1 %vm3118_vm6, %v9115_v58 }
 0x21b   : > { %6551 = vmatprep.mubr.msk.f32.mxu1 %vm3118_vm6, %v9100_v54 }
 0x21e   : > { %6552 = vmatmul.mubr.msk.f32.vlgmr.msra.gmra.mxu1 %vm3118_vm6, %v9115_v58 }
 0x21f   : > { %3894 = vmatprep.mubr.f32.mxu1 %v10930_v16 }
 0x23d   : > { %v1901_v21 = vpop.f32.mrf.mxu1  ;;  %v9189_v33 = vpop.f32.mrf.mxu0 }
 0x23f   : > { %v1903_v5 = vpop.f32.mrf.mxu1  ;;  %v9191_v50 = vpop.f32.mrf.mxu0 }
 0x247   : > { %v9193_v20 = vpop.f32.mrf.mxu1 }
 0x249   : > { %v9195_v32 = vpop.f32.mrf.mxu0  ;;  %v9197_v60 = vpop.f32.mrf.mxu1 }
 0x24b   : > { %v9199_v2 = vpop.f32.mrf.mxu0 }
 0x252   : > { %v9201_v11 = vpop.f32.mrf.mxu1 }
 0x254   : > { %v9205_v37 = vpop.f32.mrf.mxu1 }
 0x255   : > { %v9203_v56 = vpop.f32.mrf.mxu0 }
 0x257   : > { %v9207_v22 = vpop.f32.mrf.mxu0 }
 0x261   : > { %v9209_v14 = vpop.f32.mrf.mxu1  ;;  %v9211_v25 = vpop.f32.mrf.mxu0 }
 0x263   : > { %v9213_v38 = vpop.f32.mrf.mxu1  ;;  %v9215_v3 = vpop.f32.mrf.mxu0 }
 0x270   : > { %v9217_v53 = vpop.f32.mrf.mxu1  ;;  %v9219_v51 = vpop.f32.mrf.mxu0 }
 0x272   : > { %v9221_v57 = vpop.f32.mrf.mxu1  ;;  %v9223_v27 = vpop.f32.mrf.mxu0 }
 0x278   : > { %v9225_v59 = vpop.f32.mrf.mxu1 }
 0x27a   : > { %v9227_v31 = vpop.f32.mrf.mxu0  ;;  %v9229_v15 = vpop.f32.mrf.mxu1 }
 0x27c   : > { %v9231_v17 = vpop.f32.mrf.mxu0 }
 0x286   : > { %v9233_v7 = vpop.f32.mrf.mxu1 }
 0x288   : > { %v9235_v62 = vpop.f32.mrf.mxu0  ;;  %v9237_v54 = vpop.f32.mrf.mxu1 }
 0x28a   : > { %v9239_v9 = vpop.f32.mrf.mxu0 }
 0x28d   : > { %v9241_v40 = vpop.f32.mrf.mxu1 }
 0x28f   : > { %v9243_v13 = vpop.f32.mrf.mxu0  ;;  %v9245_v58 = vpop.f32.mrf.mxu1 }
 0x290   : > { %11285 = vst [vmem:[#allocation49_spill] sm:$0xff] %v9245_v58 }
 0x291   : > { %v9247_v8 = vpop.f32.mrf.mxu0 }
 0x297   : > { %v9249_v55 = vpop.f32.mrf.mxu1 }
 0x298   : > { %11286 = vst [vmem:[#allocation78_spill] sm:$0xff] %v9249_v55 }
 0x299   : > { %v9253_v18 = vpop.f32.mrf.mxu1 }
 0x29a   : > { %v9251_v63 = vpop.f32.mrf.mxu0  ;;  %11287 = vst [vmem:[#allocation50_spill] sm:$0xff] %v9253_v18 }
 0x29c   : > { %v9255_v43 = vpop.f32.mrf.mxu0 }
 0x29f   : > { %v2570_v39 = vpop.f32.mrf.mxu1 }
 0x2a0   : > { %v9257_v44 = vpop.f32.mrf.mxu0 }
 0x2a1   : > { %v2572_v46 = vpop.f32.mrf.mxu1 }
 0x2a2   : > { %v9259_v4 = vpop.f32.mrf.mxu0 }
 0x2a5   : > { %v2576_v23 = vpop.f32.mrf.mxu1 }
 0x2a7   : > { %v9261_v36 = vpop.f32.mrf.mxu0  ;;  %v2578_v47 = vpop.f32.mrf.mxu1 }
 0x2a9   : > { %v9263_v1 = vpop.f32.mrf.mxu0  ;;  %v2724_v49 = vpop.f32.mrf.mxu1 }
 0x2ab   : > { %v2726_v34 = vpop.f32.mrf.mxu1 }
 0x2ad   : > { %v9265_v42 = vpop.f32.mrf.mxu0 }
 0x2af   : > { %v9267_v45 = vpop.f32.mrf.mxu0 }
 0x2b0   : > { %11288 = vst [vmem:[#allocation57_spill] sm:$0xff] %v9267_v45 }
 0x2b2   : > { %v2730_v19 = vpop.f32.mrf.mxu1 }
 0x2b3   : > { %v9269_v52 = vpop.f32.mrf.mxu0 }
 0x2b4   : > { %11289 = vst [vmem:[#allocation62_spill] sm:$0xff] %v9269_v52  ;;  %v2732_v10 = vpop.f32.mrf.mxu1 }
 0x2b5   : > { %v9271_v12 = vpop.f32.mrf.mxu0 }
 0x2b6   : > { %11290 = vst [vmem:[#allocation65_spill] sm:$0xff] %v9271_v12  ;;  %v2878_v41 = vpop.f32.mrf.mxu1 }
 0x2b7   : > { %v3189_v29 = vpop.f32.mrf.mxu0 }
 0x2b8   : > { %v3190_v30 = vadd.f32 %v3189_v29, %v2570_v39  ;;  %v2880_v0 = vpop.f32.mrf.mxu1 }
 0x2b9   : > { %v3191_v6 = vpop.f32.mrf.mxu0 }
 0x2ba   : > { %v3737_v48 = vadd.f32 %v3190_v30, %v1901_v21  ;;  %v3192_v24 = vadd.f32 %v3191_v6, %v2572_v46  ;;  %v2884_v61 = vpop.f32.mrf.mxu1 }
 0x2bb   : > { %v3195_v28 = vpop.f32.mrf.mxu0 }
 0x2bc   : > { %6645 = vtanh.f32 %v3737_v48  ;;  %v3738_v26 = vadd.f32 %v3192_v24, %v1903_v5  ;;  %v3196_v35 = vadd.f32 %v3195_v28, %v2576_v23  ;;  %v2886_v18 = vpop.f32.mrf.mxu1 }
 0x2bd   : > { %v3197_v55 = vpop.f32.mrf.mxu0 }
 0x2be   : > { %6647 = vtanh.f32 %v3738_v26  ;;  %v3752_v52 = vadd.f32 %v3196_v35, %v9193_v20  ;;  %v3198_v58 = vadd.f32 %v3197_v55, %v2578_v47  ;;  %v9274_v45 = vpop.f32.mrf.mxu1 }
 0x2bf   : > { %v3343_v12 = vpop.f32.mrf.mxu0 }
 0x2c0   : > { %6649 = vtanh.f32 %v3752_v52  ;;  %v3753_v29 = vadd.f32 %v3198_v58, %v9197_v60  ;;  %v3344_v39 = vadd.f32 %v3343_v12, %v2724_v49  ;;  %v9277_v30 = vpop.f32.mrf.mxu1 }
 0x2c1   : > { %v3345_v6 = vpop.f32.mrf.mxu0 }
 0x2c2   : > { %6651 = vtanh.f32 %v3753_v29  ;;  %v3741_v48 = vadd.f32 %v3344_v39, %v9189_v33  ;;  %v3346_v28 = vadd.f32 %v3345_v6, %v2726_v34  ;;  %v9280_v24 = vpop.f32.mrf.mxu1 }
 0x2c3   : > { %v3349_v26 = vpop.f32.mrf.mxu0 }
 0x2c4   : > { %6653 = vtanh.f32 %v3741_v48  ;;  %v3742_v35 = vadd.f32 %v3346_v28, %v9191_v50  ;;  %v3350_v21 = vadd.f32 %v3349_v26, %v2730_v19  ;;  %v9283_v5 = vpop.f32.mrf.mxu1 }
 0x2c5   : > { %v3351_v20 = vpop.f32.mrf.mxu0 }
 0x2c6   : > { %6655 = vtanh.f32 %v3742_v35  ;;  %v3756_v60 = vadd.f32 %v3350_v21, %v9195_v32  ;;  %v3352_v58 = vadd.f32 %v3351_v20, %v2732_v10  ;;  %v3266_v55 = vpop.f32.mrf.mxu1 }
 0x2c7   : > { %v3267_v46 = vadd.f32 %v3266_v55, %v9235_v62  ;;  %v3497_v33 = vpop.f32.mrf.mxu0 }
 0x2c8   : > { %6657 = vtanh.f32 %v3756_v60  ;;  %v3757_v23 = vadd.f32 %v3352_v58, %v9199_v2  ;;  %v3498_v47 = vadd.f32 %v3497_v33, %v2878_v41  ;;  %v3268_v49 = vpop.f32.mrf.mxu1 }
 0x2c9   : > { %v9288_v34 = vpop.eup %6645  ;;  %v3739_v50 = vadd.f32 %v3267_v46, %v9201_v11  ;;  %v3269_v19 = vadd.f32 %v3268_v49, %v9239_v9  ;;  %v3499_v52 = vpop.f32.mrf.mxu0 }
 0x2ca   : > { %3797 = vst [vmem:[%s9293_s24] sm:$0xff] %v9288_v34  ;;  %6659 = vtanh.f32 %v3757_v23  ;;  %v3745_v32 = vadd.f32 %v3498_v47, %v9203_v56  ;;  %v3500_v62 = vadd.f32 %v3499_v52, %v2880_v0  ;;  %v3272_v2 = vpop.f32.mrf.mxu1 }
 0x2cb   : > { %v9298_v10 = vpop.eup %6647  ;;  %6661 = vtanh.f32 %v3739_v50  ;;  %v3740_v11 = vadd.f32 %v3269_v19, %v9205_v37  ;;  %v3273_v9 = vadd.f32 %v3272_v2, %v9243_v13  ;;  %v3503_v12 = vpop.f32.mrf.mxu0 }
 0x2cc   : > { %3798 = vst [vmem:[%s9293_s24 + $0x8] sm:$0xff] %v9298_v10  ;;  %6663 = vtanh.f32 %v3745_v32  ;;  %v3746_v41 = vadd.f32 %v3500_v62, %v9207_v22  ;;  %v3504_v29 = vadd.f32 %v3503_v12, %v2884_v61  ;;  %v3274_v39 = vpop.f32.mrf.mxu1 }
 0x2cd   : > { %v9305_v56 = vpop.eup %6649  ;;  %6665 = vtanh.f32 %v3740_v11  ;;  %v3754_v0 = vadd.f32 %v3273_v9, %v9209_v14  ;;  %v3275_v6 = vadd.f32 %v3274_v39, %v9247_v8  ;;  %v3505_v48 = vpop.f32.mrf.mxu0  ;;  %v11292_v39 = vld [vmem:[#allocation49_spill] sm:$0xff] }
 0x2ce   : > { %3812 = vst [vmem:[%s9293_s24 + $0x78] sm:$0xff] %v9305_v56  ;;  %6667 = vtanh.f32 %v3746_v41  ;;  %v3760_v37 = vadd.f32 %v3504_v29, %v9211_v25  ;;  %v3506_v13 = vadd.f32 %v3505_v48, %v2886_v18  ;;  %v3420_v28 = vpop.f32.mrf.mxu1 }
 0x2cf   : > { %v9312_v26 = vpop.eup %6651  ;;  %6669 = vtanh.f32 %v3754_v0  ;;  %v3755_v61 = vadd.f32 %v3275_v6, %v9213_v38  ;;  %v3421_v22 = vadd.f32 %v3420_v28, %v9251_v63  ;;  %v3651_v35 = vpop.f32.mrf.mxu0  ;;  %v11293_v6 = vld [vmem:[#allocation62_spill] sm:$0xff] }
 0x2d0   : > { %3813 = vst [vmem:[%s9293_s24 + $0x80] sm:$0xff] %v9312_v26  ;;  %6671 = vtanh.f32 %v3760_v37  ;;  %v3761_v14 = vadd.f32 %v3506_v13, %v9215_v3  ;;  %v3652_v8 = vadd.f32 %v3651_v35, %v9274_v45  ;;  %3858 = vmatprep.subr.mxu1 %v9312_v26  ;;  %v3422_v25 = vpop.f32.mrf.mxu1  ;;  %v9329_v3 = vld [vmem:[%s10527_s5] sm:$0xff]  ;;  %v11294_v28 = vld [vmem:[#allocation78_spill] sm:$0xff] }
 0x2d1   : > { %v9321_v18 = vpop.eup %6653  ;;  %6673 = vtanh.f32 %v3755_v61  ;;  %v3743_v21 = vadd.f32 %v3421_v22, %v9217_v53  ;;  %v3423_v38 = vadd.f32 %v3422_v25, %v9255_v43  ;;  %v3653_v63 = vpop.f32.mrf.mxu0  ;;  %3859 = vmatpush1.msra.mxu1 %v9305_v56  ;;  %v11295_v22 = vld [vmem:[#allocation65_spill] sm:$0xff]  ;;  %v11296_v25 = vld [vmem:[#allocation50_spill] sm:$0xff] }
 0x2d2   : > { %3801 = vst [vmem:[%s9293_s24 + $0x20] sm:$0xff] %v9321_v18  ;;  %6675 = vtanh.f32 %v3761_v14  ;;  %v3749_v45 = vadd.f32 %v3652_v8, %v9219_v51  ;;  %v3654_v20 = vadd.f32 %v3653_v63, %v9277_v30  ;;  %3860 = vmatprep.subr.mxu1 %v9298_v10  ;;  %v3426_v53 = vpop.f32.mrf.mxu1 }
 0x2d3   : > { %v9336_v43 = vpop.eup %6655  ;;  %6677 = vtanh.f32 %v3743_v21  ;;  %v3744_v60 = vadd.f32 %v3423_v38, %v9221_v57  ;;  %v3427_v58 = vadd.f32 %v3426_v53, %v9257_v44  ;;  %v3657_v55 = vpop.f32.mrf.mxu0  ;;  %3861 = vmatpush1.msra.mxu1 %v9288_v34 }
 0x2d4   : > { %3802 = vst [vmem:[%s9293_s24 + $0x28] sm:$0xff] %v9336_v43  ;;  %6679 = vtanh.f32 %v3749_v45  ;;  %v3750_v51 = vadd.f32 %v3654_v20, %v9223_v27  ;;  %v3658_v30 = vadd.f32 %v3657_v55, %v9280_v24  ;;  %v3428_v46 = vpop.f32.mrf.mxu1  ;;  %6382 = vmatmul.mubr.msk.f32.vlgmr.msra.gmra.mxu1 %vm3118_vm6, %v9329_v3 }
 0x2d5   : > { %v9347_v33 = vpop.eup %6657  ;;  %6681 = vtanh.f32 %v3744_v60  ;;  %v3758_v57 = vadd.f32 %v3427_v58, %v9225_v59  ;;  %v3429_v44 = vadd.f32 %v3428_v46, %v9259_v4  ;;  %v3659_v23 = vpop.f32.mrf.mxu0  ;;  %4036 = vmatprep.mubr.f32.mxu1 %v10930_v16 }
 0x2d6   : > { %3816 = vst [vmem:[%s9293_s24 + $0x98] sm:$0xff] %v9347_v33  ;;  %6683 = vtanh.f32 %v3750_v51  ;;  %v3764_v27 = vadd.f32 %v3658_v30, %v9227_v31  ;;  %v3660_v24 = vadd.f32 %v3659_v23, %v9283_v5  ;;  %v3574_v47 = vpop.f32.mrf.mxu1  ;;  %v11297_v51 = vmov 1.0   ;;  %v11298_v30 = vld [vmem:[#allocation18_spill] sm:$0xff]  ;;  %v11316_v23 = vld [vmem:[#allocation19_spill] sm:$0xff] }
 0x2d7   : > { %v9356_v49 = vpop.eup %6659  ;;  %6685 = vtanh.f32 %v3758_v57  ;;  %v3759_v59 = vadd.f32 %v3429_v44, %v9229_v15  ;;  %v3575_v4 = vadd.f32 %v3574_v47, %v9261_v36  ;;  %vm11299_vm12 = vnez %v11298_v30  ;;  %v11313_v57 = vld [vmem:[#allocation7_spill] sm:$0xff]  ;;  %v11322_v47 = vld [vmem:[#allocation73_spill] sm:$0xff] }
 0x2d8   : > { %v9360_v50 = vpop.eup %6661  ;;  %3817 = vst [vmem:[%s9293_s24 + $0xa0] sm:$0xff] %v9356_v49  ;;  %6687 = vtanh.f32 %v3764_v27  ;;  %v3765_v19 = vadd.f32 %v3660_v24, %v9231_v17  ;;  %4000 = vmatprep.subr.mxu1 %v9356_v49  ;;  %v3576_v31 = vpop.f32.mrf.mxu1  ;;  %vm11314_vm14 = vnez %v11313_v57  ;;  %vm11317_vm10 = vnez %v11316_v23  ;;  %v11318_v27 = vld [vmem:[#allocation71_spill] sm:$0xff]  ;;  %v11320_v24 = vld [vmem:[#allocation21_spill] sm:$0xff] }
 0x2d9   : > { %v9366_v5 = vpop.eup %6663  ;;  %3799 = vst [vmem:[%s9293_s24 + $0x10] sm:$0xff] %v9360_v50  ;;  %6689 = vtanh.f32 %v3759_v59  ;;  %v3747_v15 = vadd.f32 %v3575_v4, %v9233_v7  ;;  %v3577_v36 = vadd.f32 %v3576_v31, %v9263_v1  ;;  %4001 = vmatpush1.msra.mxu1 %v9347_v33  ;;  %v11326_v59 = vld [vmem:[#allocation15_spill] sm:$0xff]  ;;  %v11334_v31 = vld [vmem:[#allocation12_spill] sm:$0xff]  ;;  %v6768_v30 = vmov 1966171168  }
 0x2da   : > { %v9373_v52 = vpop.eup %6665  ;;  %3805 = vst [vmem:[%s9293_s24 + $0x40] sm:$0xff] %v9366_v5  ;;  %6691 = vtanh.f32 %v3765_v19  ;;  %4002 = vmatprep.subr.mxu1 %v9336_v43  ;;  %v3580_v17 = vpop.f32.mrf.mxu1  ;;  %v11328_v4 = vld [vmem:[#allocation67_spill] sm:$0xff]  ;;  %v11332_v19 = vld [vmem:[#allocation22_spill] sm:$0xff] }
 0x2db   : > { %v9378_v32 = vpop.eup %6667  ;;  %3800 = vst [vmem:[%s9293_s24 + $0x18] sm:$0xff] %v9373_v52  ;;  %6693 = vtanh.f32 %v3747_v15  ;;  %v3748_v7 = vadd.f32 %v3577_v36, %v9237_v54  ;;  %v3581_v1 = vadd.f32 %v3580_v17, %v9265_v42  ;;  %4003 = vmatpush1.msra.mxu1 %v9321_v18  ;;  %v11291_v42 = vld [vmem:[#allocation57_spill] sm:$0xff]  ;;  %v11336_v15 = vld [vmem:[#allocation54_spill] sm:$0xff]  ;;  %v11343_v17 = vld [vmem:[#allocation11_spill] sm:$0xff] }
 0x2dc   : > { %v9385_v62 = vpop.eup %6669  ;;  %3806 = vst [vmem:[%s9293_s24 + $0x48] sm:$0xff] %v9378_v32  ;;  %v3582_v2 = vpop.f32.mrf.mxu1  ;;  %6384 = vmatmul.mubr.msk.f32.vlgmr.msra.gmra.mxu1 %vm3118_vm6, %v9329_v3  ;;  %v11338_v36 = vld [vmem:[#allocation13_spill] sm:$0xff]  ;;  %v9737_v57 = vld [vmem:[%s10525_s3 + $0x190] sm:$0x3f] }
 0x2dd   : > { %v9391_v11 = vpop.eup %6671  ;;  %3814 = vst [vmem:[%s9293_s24 + $0x88] sm:$0xff] %v9385_v62  ;;  %6695 = vtanh.f32 %v3748_v7  ;;  %v3762_v54 = vadd.f32 %v3581_v1, %v9241_v40  ;;  %v3583_v9 = vadd.f32 %v3582_v2, %v11291_v42  ;;  %4178 = vmatprep.mubr.f32.mxu1 %v10930_v16  ;;  %v11347_v1 = vld [vmem:[#allocation77_spill] sm:$0xff]  ;;  %v11351_v2 = vld [vmem:[#allocation32_spill] sm:$0xff]  ;;  %v6708_v44 = vld [vmem:[%s10525_s3 + $0xf0] sm:$0xff] }
 0x2de   : > { %v9398_v12 = vpop.eup %6673  ;;  %3820 = vst [vmem:[%s9293_s24 + $0xb8] sm:$0xff] %v9391_v11  ;;  %v6553_v41 = vpop.f32.mrf.mxu1  ;;  %v11357_v42 = vld [vmem:[#allocation84_spill] sm:$0xff]  ;;  %v4413_v23 = vrot.slane %v6708_v44, 4  ;;  %v9776_v7 = vld [vmem:[%s10525_s3 + $0x180] sm:$0x3f] }
 0x2df   : > { %v9402_v29 = vpop.eup %6675  ;;  %3815 = vst [vmem:[%s9293_s24 + $0x90] sm:$0xff] %v9398_v12  ;;  %6697 = vtanh.f32 %v3762_v54  ;;  %v3763_v0 = vadd.f32 %v3583_v9, %v11292_v39  ;;  %v3734_v40 = vadd.f32 %v6553_v41, %v11293_v6  ;;  %3929 = vmatprep.subr.mxu0 %v9398_v12  ;;  %v11355_v54 = vld [vmem:[#allocation72_spill] sm:$0xff]  ;;  %v11359_v9 = vld [vmem:[#allocation74_spill] sm:$0xff]  ;;  %v11363_v41 = vld [vmem:[#allocation63_spill] sm:$0xff] }
 0x2e0   : > { %v9409_v48 = vpop.eup %6677  ;;  %3821 = vst [vmem:[%s9293_s24 + $0xc0] sm:$0xff] %v9402_v29  ;;  %4142 = vmatprep.subr.mxu1 %v9402_v29  ;;  %v3728_v37 = vpop.f32.mrf.mxu1  ;;  %3930 = vmatpush1.msra.mxu0 %v9385_v62  ;;  %v11367_v39 = vld [vmem:[#allocation70_spill] sm:$0xff] }
 0x2e1   : > { %v9415_v13 = vpop.eup %6679  ;;  %3803 = vst [vmem:[%s9293_s24 + $0x30] sm:$0xff] %v9409_v48  ;;  %6699 = vtanh.f32 %v3763_v0  ;;  %v3766_v61 = vadd.f32 %v11294_v28, %v3734_v40  ;;  %v3729_v35 = vadd.f32 %v3728_v37, %v11295_v22  ;;  %4143 = vmatpush1.msra.mxu1 %v9391_v11  ;;  %3931 = vmatprep.subr.mxu0 %v9373_v52  ;;  %v11369_v0 = vld [vmem:[#allocation23_spill] sm:$0xff]  ;;  %v11371_v6 = vld [vmem:[#allocation66_spill] sm:$0xff]  ;;  %v11377_v37 = vld [vmem:[#allocation52_spill] sm:$0xff] }
 0x2e2   : > { %v9423_v14 = vpop.eup %6681  ;;  %3809 = vst [vmem:[%s9293_s24 + $0x60] sm:$0xff] %v9415_v13  ;;  %4144 = vmatprep.subr.mxu1 %v9378_v32  ;;  %3932 = vmatpush1.msra.mxu0 %v9360_v50  ;;  %v11373_v40 = vld [vmem:[#allocation55_spill] sm:$0xff]  ;;  %v11381_v28 = vld [vmem:[#allocation29_spill] sm:$0xff]  ;;  %v11385_v22 = vld [vmem:[#allocation60_spill] sm:$0xff] }
 0x2e3   : > { %v9429_v8 = vpop.eup %6683  ;;  %3804 = vst [vmem:[%s9293_s24 + $0x38] sm:$0xff] %v9423_v14  ;;  %6701 = vtanh.f32 %v3766_v61  ;;  %v3751_v21 = vadd.f32 %v3729_v35, %v11296_v25  ;;  %4145 = vmatpush1.msra.mxu1 %v9366_v5  ;;  %6383 = vmatmul.mubr.msk.f32.vlgmr.msra.gmra.mxu0 %vm3118_vm6, %v9329_v3  ;;  %v11383_v61 = vld [vmem:[#allocation48_spill] sm:$0xff]  ;;  %v11387_v35 = vld [vmem:[#allocation43_spill] sm:$0xff] }
 0x2e4   : > { %v9437_v38 = vpop.eup %6685  ;;  %3810 = vst [vmem:[%s9293_s24 + $0x68] sm:$0xff] %v9429_v8  ;;  %6386 = vmatmul.mubr.msk.f32.vlgmr.msra.gmra.mxu1 %vm3118_vm6, %v9329_v3  ;;  %4107 = vmatprep.mubr.f32.mxu0 %v10930_v16  ;;  %v11393_v25 = vld [vmem:[#allocation51_spill] sm:$0xff]  ;;  %v9861_v44 = vld [vmem:[%s7245_s30 + $0x18] sm:$0xff] }
 0x2e5   : > { %v9444_v63 = vpop.eup %6687  ;;  %3818 = vst [vmem:[%s9293_s24 + $0xa8] sm:$0xff] %v9437_v38  ;;  %6703 = vtanh.f32 %v3751_v21  ;;  %4320 = vmatprep.mubr.f32.mxu1 %v10930_v16  ;;  %v11395_v21 = vld [vmem:[#allocation38_spill] sm:$0xff] }
 0x2e6   : > { %v6690_v45 = vpop.eup %6689  ;;  %3824 = vst [vmem:[%s9293_s24 + $0xd8] sm:$0xff] %v9444_v63 }
 0x2e7   : > { %v9451_v20 = vpop.eup %6691  ;;  %3819 = vst [vmem:[%s9293_s24 + $0xb0] sm:$0xff] %v6690_v45  ;;  %4071 = vmatprep.subr.mxu0 %v6690_v45 }
 0x2e8   : > { %v9454_v53 = vpop.eup %6693  ;;  %3825 = vst [vmem:[%s9293_s24 + $0xe0] sm:$0xff] %v9451_v20  ;;  %4284 = vmatprep.subr.mxu1 %v9451_v20  ;;  %4072 = vmatpush1.msra.mxu0 %v9437_v38 }
 0x2e9   : > { %3807 = vst [vmem:[%s9293_s24 + $0x50] sm:$0xff] %v9454_v53  ;;  %4285 = vmatpush1.msra.mxu1 %v9444_v63  ;;  %4073 = vmatprep.subr.mxu0 %v9423_v14 }
 0x2ea   : > { %v9464_v60 = vpop.eup %6695  ;;  %4286 = vmatprep.subr.mxu1 %v9429_v8  ;;  %4074 = vmatpush1.msra.mxu0 %v9409_v48 }
 0x2eb   : > { %3808 = vst [vmem:[%s9293_s24 + $0x58] sm:$0xff] %v9464_v60  ;;  %4287 = vmatpush1.msra.mxu1 %v9415_v13  ;;  %6385 = vmatmul.mubr.msk.f32.vlgmr.msra.gmra.mxu0 %vm3118_vm6, %v9329_v3 }
 0x2ec   : > { %v9473_v58 = vpop.eup %6697  ;;  %6388 = vmatmul.mubr.msk.f32.vlgmr.msra.gmra.mxu1 %vm3118_vm6, %v9329_v3  ;;  %4561 = vmatprep.subr.mxu1 %v9312_v26  ;;  %v11304_v26 = vld [vmem:[#allocation16_spill] sm:$0xff] }
 0x2ed   : > { %3822 = vst [vmem:[%s9293_s24 + $0xc8] sm:$0xff] %v9473_v58  ;;  %4562 = vmatpush1.xpose.msra.mxu1 %v9305_v56  ;;  %4249 = vmatprep.mubr.f32.mxu0 %v10930_v16  ;;  %vm11305_vm3 = vnez %v11304_v26  ;;  %v9718_v26 = vld [vmem:[%s10525_s3 + $0x168] sm:$0x3f] }
 0x2ee   : > { %v6700_v55 = vpop.eup %6699  ;;  %4563 = vmatprep.subr.mxu1 %v9298_v10  ;;  %6390 = vmatprep.mubr.msk.f32.mxu1 %vm11299_vm12, %v11297_v51  ;;  %v11300_v10 = vld [vmem:[#allocation20_spill] sm:$0xff]  ;;  %vm11321_vm12 = vnez %v11320_v24 }
 0x2ef   : > { %3823 = vst [vmem:[%s9293_s24 + $0xd0] sm:$0xff] %v6700_v55  ;;  %4213 = vmatprep.subr.mxu0 %v6700_v55  ;;  %vm11301_vm13 = vnez %v11300_v10  ;;  %v5223_v10 = vrot.slane %v9329_v3, 5  ;;  %v6709_v24 = vld [vmem:[%s10525_s3 + $0xf8] sm:$0xff] }
 0x2f0   : > { %v9487_v46 = vpop.eup %6701  ;;  %4214 = vmatpush1.msra.mxu0 %v9473_v58 }
 0x2f1   : > { %3826 = vst [vmem:[%s9293_s24 + $0xe8] sm:$0xff] %v9487_v46  ;;  %4564 = vmatpush1.xpose.msra.mxu1 %v9288_v34  ;;  %4215 = vmatprep.subr.mxu0 %v9464_v60  ;;  %v11302_v34 = vld [vmem:[#allocation14_spill] sm:$0xff] }
 0x2f2   : > { %v9494_v56 = vpop.eup %6703  ;;  %4731 = vmatprep.subr.mxu1 %v9356_v49  ;;  %4216 = vmatpush1.msra.mxu0 %v9454_v53  ;;  %vm11303_vm0 = vnez %v11302_v34  ;;  %v11324_v49 = vld [vmem:[#allocation58_spill] sm:$0xff] }
 0x2f3   : > { %3811 = vst [vmem:[%s9293_s24 + $0x70] sm:$0xff] %v9494_v56  ;;  %6387 = vmatmul.mubr.msk.f32.vlgmr.msra.gmra.mxu0 %vm3118_vm6, %v9329_v3  ;;  %6554 = vmatprep.subr.mxu0 %v10930_v16 }
 0x2f4   : > { %6391 = vmatmul.mubr.msk.f32.vlgmr.msra.gmra.mxu1 %vm11301_vm13, %v11297_v51  ;;  %6555 = vmatpush3.msra.mxu0 %v9487_v46  ;;  %vm11323_vm13 = vnez %v11322_v47  ;;  %v4416_v47 = vrot.slane %v6709_v24, 4 }
 0x2f5   : > { %4732 = vmatpush1.xpose.msra.mxu1 %v9347_v33  ;;  %6556 = vmatprep.subr.mxu0 %v10930_v16  ;;  %v9726_v33 = vld [vmem:[%s7245_s30] sm:$0xff] }
 0x2f6   : > { %4733 = vmatprep.subr.mxu1 %v9336_v43  ;;  %6557 = vmatpush3.msra.mxu0 %v9494_v56  ;;  %v11308_v43 = vld [vmem:[#allocation9_spill] sm:$0xff] }
 0x2f7   : > { %6558 = vmatprep.mubr.msk.f32.mxu0 %vm6767_vm2, %v10930_v16  ;;  %6392 = vmatprep.mubr.msk.f32.mxu1 %vm11303_vm0, %v11297_v51  ;;  %v11306_v16 = vld [vmem:[#allocation8_spill] sm:$0xff]  ;;  %vm11309_vm15 = vnez %v11308_v43  ;;  %vm11327_vm2 = vnez %v11326_v59  ;;  %vm11329_vm0 = vnez %v11328_v4  ;;  %v6710_v4 = vld [vmem:[%s10525_s3 + $0x110] sm:$0xff] }
 0x2f8   : > { %6559 = vmatmul.mubr.msk.f32.vlgmr.msra.gmra.mxu0 %vm3118_vm6, %v9329_v3  ;;  %6393 = vmatmul.mubr.msk.f32.gmra.mxu1 %vm11305_vm3, %v11297_v51  ;;  %vm11307_vm8 = vnez %v11306_v16  ;;  %v9723_v16 = vld [vmem:[%s10525_s3 + $0x170] sm:$0x3f]  ;;  %v9732_v3 = vld [vmem:[%s10525_s3 + $0x188] sm:$0x3f]  ;;  %v9752_v59 = vld [vmem:[%s10525_s3 + $0x178] sm:$0x3f] }
 0x2f9   : > { %4646 = vmatprep.subr.mxu0 %v9398_v12  ;;  %4734 = vmatpush1.xpose.msra.mxu1 %v9321_v18  ;;  %v11311_v18 = vld [vmem:[#allocation6_spill] sm:$0xff]  ;;  %v11361_v12 = vld [vmem:[#allocation83_spill] sm:$0xff] }
 0x2fa   : > { %4647 = vmatpush1.xpose.msra.mxu0 %v9385_v62  ;;  %4901 = vmatprep.subr.mxu1 %v9402_v29  ;;  %vm11312_vm4 = vnez %v11311_v18  ;;  %v11349_v62 = vld [vmem:[#allocation44_spill] sm:$0xff]  ;;  %v11365_v29 = vld [vmem:[#allocation35_spill] sm:$0xff]  ;;  %v728_v18 = vrot.slane %v9726_v33, 1 }
 0x2fb   : > { %4648 = vmatprep.subr.mxu0 %v9373_v52  ;;  %6394 = vmatprep.mubr.msk.f32.mxu1 %vm11307_vm8, %v11297_v51  ;;  %vm11333_vm8 = vnez %v11332_v19  ;;  %v4426_v19 = vrot.slane %v9732_v3, 4  ;;  %v11413_v52 = vld [vmem:[#allocation5_spill] sm:$0xff] }
 0x2fc   : > { %6395 = vmatmul.mubr.msk.f32.gmra.mxu1 %vm11309_vm15, %v11297_v51  ;;  %6398 = vmatprep.mubr.msk.f32.mxu0 %vm7836_vm11, %v11297_v51  ;;  %vm11319_vm11 = vnez %v11318_v27  ;;  %vm11335_vm15 = vnez %v11334_v31  ;;  %v4414_v27 = vrot.slane %v9718_v26, 4  ;;  %v6711_v31 = vld [vmem:[%s10525_s3 + $0x118] sm:$0xff] }
 0x2fd   : > { %6396 = vmatprep.mubr.msk.f32.mxu1 %vm11312_vm4, %v11297_v51  ;;  %vm11337_vm4 = vnez %v11336_v15  ;;  %v4428_v15 = vrot.slane %v6711_v31, 4 }
 0x2fe   : > { %4649 = vmatpush1.xpose.msra.mxu0 %v9360_v50  ;;  %v11330_v50 = vld [vmem:[#allocation17_spill] sm:$0xff] }
 0x2ff   : > { %4816 = vmatprep.subr.mxu0 %v6690_v45  ;;  %vm11331_vm3 = vnez %v11330_v50  ;;  %v11401_v45 = vld [vmem:[#allocation34_spill] sm:$0xff]  ;;  %v4425_v50 = vrot.slane %v6710_v4, 4 }
 0x300   : > { %6397 = vmatmul.mubr.msk.f32.gmra.mxu1 %vm11314_vm14, %v11297_v51  ;;  %vm11339_vm14 = vnez %v11338_v36  ;;  %v4429_v36 = vrot.slane %v9737_v57, 4 }
 0x301   : > { %6399 = vmatmul.mubr.msk.f32.vlgmr.msra.gmra.mxu0 %vm7909_vm7, %v11297_v51  ;;  %6406 = vmatprep.mubr.msk.f32.mxu1 %vm11317_vm10, %v11297_v51  ;;  %vm11325_vm7 = vnez %v11324_v49  ;;  %v4417_v49 = vrot.slane %v9723_v16, 4 }
 0x302   : > { %4817 = vmatpush1.xpose.msra.mxu0 %v9437_v38  ;;  %6400 = vmatprep.mubr.msk.f32.mxu0 %vm11319_vm11, %v11297_v51  ;;  %vm11344_vm11 = vnez %v11343_v17  ;;  %v11397_v38 = vld [vmem:[#allocation61_spill] sm:$0xff] }
 0x303   : > { %4818 = vmatprep.subr.mxu0 %v9423_v14  ;;  %v11389_v14 = vld [vmem:[#allocation27_spill] sm:$0xff] }
 0x304   : > { %6407 = vmatmul.mubr.msk.f32.vlgmr.msra.gmra.mxu1 %vm11321_vm12, %v11297_v51  ;;  %vm11348_vm12 = vnez %v11347_v1 }
 0x305   : > { %6401 = vmatmul.mubr.msk.f32.gmra.mxu0 %vm11323_vm13, %v11297_v51  ;;  %4902 = vmatpush1.xpose.msra.mxu1 %v9391_v11  ;;  %vm11352_vm13 = vnez %v11351_v2  ;;  %v11353_v11 = vld [vmem:[#allocation37_spill] sm:$0xff] }
 0x306   : > { %4819 = vmatpush1.xpose.msra.mxu0 %v9409_v48  ;;  %4903 = vmatprep.subr.mxu1 %v9378_v32  ;;  %v11375_v48 = vld [vmem:[#allocation53_spill] sm:$0xff]  ;;  %v9771_v32 = vadd.f32 %v9726_v33, %v728_v18 }
 0x307   : > { %4986 = vmatprep.subr.mxu0 %v6700_v55  ;;  %6402 = vmatprep.mubr.msk.f32.mxu0 %vm11325_vm7, %v11297_v51  ;;  %vm11358_vm7 = vnez %v11357_v42  ;;  %v11411_v55 = vld [vmem:[#allocation64_spill] sm:$0xff]  ;;  %v6712_v2 = vld [vmem:[%s10525_s3 + $0x100] sm:$0xff] }
 0x308   : > { %6408 = vmatprep.mubr.msk.f32.mxu1 %vm11327_vm2, %v11297_v51  ;;  %vm11360_vm2 = vnez %v11359_v9  ;;  %v4489_v9 = vrot.slane %v9723_v16, 1 }
 0x309   : > { %6403 = vmatmul.mubr.msk.f32.gmra.mxu0 %vm11329_vm0, %v11297_v51  ;;  %6409 = vmatmul.mubr.msk.f32.gmra.mxu1 %vm11331_vm3, %v11297_v51  ;;  %vm11362_vm0 = vnez %v11361_v12  ;;  %vm11364_vm3 = vnez %v11363_v41  ;;  %v6713_v12 = vld [vmem:[%s10525_s3 + $0x130] sm:$0xff] }
 0x30a   : > { %4904 = vmatpush1.xpose.msra.mxu1 %v9366_v5  ;;  %6404 = vmatprep.mubr.msk.f32.mxu0 %vm11333_vm8, %v11297_v51  ;;  %v11340_v5 = vld [vmem:[#allocation10_spill] sm:$0xff]  ;;  %vm11366_vm8 = vnez %v11365_v29  ;;  %v4437_v41 = vrot.slane %v6713_v12, 4  ;;  %v6723_v12 = vld [vmem:[%s10525_s3 + $0x120] sm:$0xff] }
 0x30b   : > { %5071 = vmatprep.subr.mxu1 %v9451_v20  ;;  %6410 = vmatprep.mubr.msk.f32.mxu1 %vm11335_vm15, %v11297_v51  ;;  %vm11341_vm10 = vnez %v11340_v5  ;;  %vm11368_vm15 = vnez %v11367_v39  ;;  %v11403_v20 = vld [vmem:[#allocation56_spill] sm:$0xff]  ;;  %v9765_v5 = vld [vmem:[%s10525_s3 + $0x1a8] sm:$0x3f]  ;;  %v9797_v39 = vld [vmem:[%s10525_s3 + $0x1b0] sm:$0x3f] }
 0x30c   : > { %v4438_v29 = vrot.slane %v9765_v5, 4 }
 0x30d   : > { %6405 = vmatmul.mubr.msk.f32.gmra.mxu0 %vm11337_vm4, %v11297_v51  ;;  %6411 = vmatmul.mubr.msk.f32.gmra.mxu1 %vm11339_vm14, %v11297_v51  ;;  %vm11370_vm4 = vnez %v11369_v0  ;;  %vm11372_vm14 = vnez %v11371_v6 }
 0x30e   : > { %6412 = vmatprep.mubr.msk.f32.mxu1 %vm11341_vm10, %v11297_v51  ;;  %6414 = vmatprep.mubr.msk.f32.mxu0 %vm8263_vm1, %v11297_v51  ;;  %vm11350_vm1 = vnez %v11349_v62  ;;  %vm11374_vm10 = vnez %v11373_v40  ;;  %v4488_v62 = vrot.slane %v9718_v26, 1  ;;  %v6714_v40 = vld [vmem:[%s10525_s3 + $0x108] sm:$0xff] }
 0x311   : > { %6413 = vmatmul.mubr.msk.f32.gmra.mxu1 %vm11344_vm11, %v11297_v51  ;;  %6415 = vmatmul.mubr.msk.f32.vlgmr.msra.gmra.mxu0 %vm8312_vm5, %v11297_v51  ;;  %vm11354_vm5 = vnez %v11353_v11  ;;  %vm11376_vm11 = vnez %v11375_v48  ;;  %v4419_v11 = vrot.slane %v6712_v2, 4  ;;  %v4422_v48 = vrot.slane %v6714_v40, 4  ;;  %v9896_v2 = vld [vmem:[%s10525_s3 + $0x1a0] sm:$0x3f] }
 0x312   : > { %4987 = vmatpush1.xpose.msra.mxu0 %v9473_v58  ;;  %6416 = vmatprep.mubr.msk.f32.mxu0 %vm8177_vm9, %v11297_v51  ;;  %vm11356_vm9 = vnez %v11355_v54  ;;  %v11409_v58 = vld [vmem:[#allocation69_spill] sm:$0xff]  ;;  %v4420_v54 = vrot.slane %v9752_v59, 4 }
 0x313   : > { %4988 = vmatprep.subr.mxu0 %v9464_v60  ;;  %6422 = vmatprep.mubr.msk.f32.mxu1 %vm11348_vm12, %v11297_v51  ;;  %vm11378_vm12 = vnez %v11377_v37  ;;  %v11407_v60 = vld [vmem:[#allocation30_spill] sm:$0xff]  ;;  %v4423_v37 = vrot.slane %v9776_v7, 4 }
 0x315   : > { %6417 = vmatmul.mubr.msk.f32.gmra.mxu0 %vm11350_vm1, %v11297_v51  ;;  %6423 = vmatmul.mubr.msk.f32.vlgmr.msra.gmra.mxu1 %vm11352_vm13, %v11297_v51  ;;  %vm11382_vm13 = vnez %v11381_v28  ;;  %v9812_v28 = vld [vmem:[%s7245_s30 + $0x8] sm:$0xff] }
 0x316   : > { %4989 = vmatpush1.xpose.msra.mxu0 %v9454_v53  ;;  %5072 = vmatpush1.xpose.msra.mxu1 %v9444_v63  ;;  %v11399_v63 = vld [vmem:[#allocation40_spill] sm:$0xff] }
 0x317   : > { %5073 = vmatprep.subr.mxu1 %v9429_v8  ;;  %6561 = vmatprep.subr.mxu0 %v9487_v46  ;;  %v11391_v8 = vld [vmem:[#allocation41_spill] sm:$0xff]  ;;  %v11405_v53 = vld [vmem:[#allocation36_spill] sm:$0xff] }
 0x318   : > { %6418 = vmatprep.mubr.msk.f32.mxu0 %vm11354_vm5, %v11297_v51  ;;  %6424 = vmatprep.mubr.msk.f32.mxu1 %vm11356_vm9, %v11297_v51  ;;  %vm11384_vm5 = vnez %v11383_v61  ;;  %vm11386_vm9 = vnez %v11385_v22  ;;  %v729_v61 = vrot.slane %v9812_v28, 1 }
 0x319   : > { %6419 = vmatmul.mubr.msk.f32.gmra.mxu0 %vm11358_vm7, %v11297_v51  ;;  %6425 = vmatmul.mubr.msk.f32.gmra.mxu1 %vm11360_vm2, %v11297_v51  ;;  %vm11388_vm7 = vnez %v11387_v35  ;;  %vm11390_vm2 = vnez %v11389_v14  ;;  %v9818_v14 = vld [vmem:[%s7245_s30 + $0x20] sm:$0xff] }
 0x31a   : > { %5074 = vmatpush1.xpose.msra.mxu1 %v9415_v13  ;;  %6420 = vmatprep.mubr.msk.f32.mxu0 %vm11362_vm0, %v11297_v51  ;;  %v11379_v13 = vld [vmem:[#allocation47_spill] sm:$0xff]  ;;  %vm11392_vm0 = vnez %v11391_v8  ;;  %v732_v8 = vrot.slane %v9818_v14, 1 }
 0x31b   : > { %6426 = vmatprep.mubr.msk.f32.mxu1 %vm11364_vm3, %v11297_v51  ;;  %vm11380_vm1 = vnez %v11379_v13  ;;  %vm11394_vm3 = vnez %v11393_v25 }
 0x31c   : > { %v9870_v24 = vadd.f32 %v9818_v14, %v732_v8 }
 0x31d   : > { %6421 = vmatmul.mubr.msk.f32.gmra.mxu0 %vm11366_vm8, %v11297_v51  ;;  %6427 = vmatmul.mubr.msk.f32.gmra.mxu1 %vm11368_vm15, %v11297_v51  ;;  %vm11396_vm8 = vnez %v11395_v21  ;;  %vm11398_vm15 = vnez %v11397_v38  ;;  %v6717_v21 = vld [vmem:[%s10525_s3 + $0x138] sm:$0xff] }
 0x31e   : > { %6428 = vmatprep.mubr.msk.f32.mxu1 %vm11370_vm4, %v11297_v51  ;;  %6430 = vmatprep.mubr.msk.f32.mxu0 %vm11372_vm14, %v11297_v51  ;;  %vm11400_vm4 = vnez %v11399_v63  ;;  %vm11402_vm14 = vnez %v11401_v45  ;;  %v4440_v38 = vrot.slane %v6717_v21, 4  ;;  %v4441_v63 = vrot.slane %v9797_v39, 4  ;;  %v9829_v45 = vld [vmem:[%s7245_s30 + $0x28] sm:$0xff]  ;;  %v9923_v21 = vld [vmem:[%s10525_s3 + $0x1d0] sm:$0x3f] }
 0x31f   : > { %11415 = vst [vmem:[#allocation68_spill] sm:$0xff] %v9923_v21 }
 0x321   : > { %6429 = vmatmul.mubr.msk.f32.gmra.mxu1 %vm11374_vm10, %v11297_v51  ;;  %6431 = vmatmul.mubr.msk.f32.vlgmr.msra.gmra.mxu0 %vm11376_vm11, %v11297_v51  ;;  %vm11404_vm10 = vnez %v11403_v20  ;;  %vm11406_vm11 = vnez %v11405_v53  ;;  %v733_v20 = vrot.slane %v9829_v45, 1  ;;  %v9833_v53 = vld [vmem:[%s7245_s30 + $0x10] sm:$0xff] }
 0x322   : > { %6562 = vmatpush3.xpose.msra.mxu0 %v9487_v46  ;;  %6432 = vmatprep.mubr.msk.f32.mxu0 %vm11378_vm12, %v11297_v51  ;;  %vm11408_vm12 = vnez %v11407_v60  ;;  %v5688_v46 = vunpack.c.l.s4 %v6768_v30  ;;  %v730_v60 = vrot.slane %v9833_v53, 1  ;;  %v9970_v30 = vld [vmem:[%s10525_s3 + $0x1b8] sm:$0x3f] }
 0x323   : > { %6563 = vmatprep.subr.mxu0 %v9494_v56  ;;  %6438 = vmatprep.mubr.msk.f32.mxu1 %vm11380_vm1, %v11297_v51  ;;  %vm11410_vm1 = vnez %v11409_v58  ;;  %v9884_v31 = vadd.f32 %v9829_v45, %v733_v20  ;;  %v6725_v20 = vld [vmem:[%s10525_s3 + $0x128] sm:$0xff]  ;;  %11416 = vst [vmem:[#allocation75_spill] sm:$0xff] %v9970_v30 }
 0x324   : > { %v5689_v43 = vunpack.c.0.s8 %v5688_v46 }
 0x325   : > { %6433 = vmatmul.mubr.msk.f32.gmra.mxu0 %vm11382_vm13, %v11297_v51  ;;  %6439 = vmatmul.mubr.msk.f32.vlgmr.msra.gmra.mxu1 %vm11384_vm5, %v11297_v51  ;;  %vm11412_vm13 = vnez %v11411_v55  ;;  %vm5222_vm5 = vcmask 1042432  }
 0x326   : > { %6564 = vmatpush3.xpose.msra.mxu0 %v9494_v56  ;;  %6434 = vmatprep.mubr.msk.f32.mxu0 %vm11386_vm9, %v11297_v51  ;;  %v709_v56 = vld [vmem:[%s10527_s5 + $0x8] sm:$0x1f]  ;;  %vm4412_vm9 = vcmask 1043456   ;;  %v9768_v17 = vsub.s32 %v5689_v43, %v11413_v52 }
 0x327   : > { %6440 = vmatprep.mubr.msk.f32.mxu1 %vm11388_vm7, %v11297_v51  ;;  %v5224_v34 = vrot.slane %v709_v56, 5  ;;  %v9779_v1 = vsel %vm4412_vm9, %v4413_v23, %v4414_v27  ;;  %v9787_v42 = vsel %vm4412_vm9, %v4416_v47, %v4417_v49  ;;  %v9801_v0 = vsel %vm4412_vm9, %v4425_v50, %v4426_v19  ;;  %v9867_v27 = vld [vmem:[%s10525_s3 + $0x198] sm:$0x3f]  ;;  %v9880_v50 = vld [vmem:[%s10525_s3 + $0x1c8] sm:$0x3f] }
 0x328   : > { %v9804_v6 = vsel %vm4412_vm9, %v4428_v15, %v4429_v36  ;;  %v9822_v25 = vsel %vm4412_vm9, %v4419_v11, %v4420_v54  ;;  %v9838_v55 = vsel %vm4412_vm9, %v4437_v41, %v4438_v29  ;;  %v731_v23 = vrot.slane %v9861_v44, 1  ;;  %v9890_v36 = vld [vmem:[%s7245_s30 + $0x48] sm:$0xff]  ;;  %v9940_v11 = vld [vmem:[%s7245_s30 + $0x38] sm:$0xff] }
 0x329   : > { %6435 = vmatmul.mubr.msk.f32.gmra.mxu0 %vm11390_vm2, %v11297_v51  ;;  %6441 = vmatmul.mubr.msk.f32.gmra.mxu1 %vm11392_vm0, %v11297_v51  ;;  %v9875_v4 = vsel %vm4412_vm9, %v4440_v38, %v4441_v63  ;;  %v9887_v15 = vadd.f32 %v9833_v53, %v730_v60  ;;  %v737_v52 = vrot.slane %v9890_v36, 1  ;;  %v4431_v41 = vrot.slane %v6723_v12, 4  ;;  %v6732_v49 = vld [vmem:[%s10525_s3 + $0x148] sm:$0xff] }
 0x32a   : > { %6436 = vmatprep.mubr.msk.f32.mxu0 %vm11394_vm3, %v11297_v51  ;;  %6442 = vmatprep.mubr.msk.f32.mxu1 %vm11396_vm8, %v11297_v51  ;;  %v4432_v29 = vrot.slane %v9867_v27, 4  ;;  %v4450_v8 = vrot.slane %v9880_v50, 4  ;;  %v4434_v60 = vrot.slane %v6725_v20, 4  ;;  %v735_v38 = vrot.slane %v9940_v11, 1  ;;  %v9948_v20 = vld [vmem:[%s7245_s30 + $0x60] sm:$0xff] }
 0x32b   : > { %v9933_v12 = vadd.f32 %v9890_v36, %v737_v52  ;;  %v740_v19 = vrot.slane %v9948_v20, 1  ;;  %v6729_v52 = vld [vmem:[%s10525_s3 + $0x158] sm:$0xff]  ;;  %v4453_v47 = vrot.slane %v9923_v21, 4  ;;  %v4446_v58 = vrot.slane %v6732_v49, 4 }
 0x32c   : > { %v9945_v63 = vsel %vm4412_vm9, %v4431_v41, %v4432_v29  ;;  %vm5333_vm2 = vcmask 64512  }
 0x32d   : > { %6437 = vmatmul.mubr.msk.f32.gmra.mxu0 %vm11398_vm15, %v11297_v51  ;;  %6443 = vmatmul.mubr.msk.f32.gmra.mxu1 %vm11400_vm4, %v11297_v51 }
 0x32e   : > { %6444 = vmatprep.mubr.msk.f32.mxu1 %vm11402_vm14, %v11297_v51  ;;  %6565 = vmatprep.mubr.msk.f32.mxu0 %vm11404_vm10, %v11297_v51 }
 0x331   : > { %6445 = vmatmul.mubr.msk.f32.gmra.mxu1 %vm11406_vm11, %v11297_v51  ;;  %6566 = vmatmul.mubr.msk.f32.vlgmr.msra.gmra.mxu0 %vm11408_vm12, %v11297_v51 }
 0x332   : > { %6568 = vmatprep.mubr.msk.f32.mxu0 %vm11410_vm1, %v11297_v51 }
 0x335   : > { %6569 = vmatmul.mubr.msk.f32.gmra.mxu0 %vm11412_vm13, %v11297_v51  ;;  %v5225_v51 = vsel %vm5222_vm5, %v5223_v10, %v5224_v34  ;;  %v9850_v10 = vsel %vm4412_vm9, %v4422_v48, %v4423_v37  ;;  %v9853_v34 = vadd.f32 %v9812_v28, %v729_v61  ;;  %v9914_v48 = vadd.f32 %v9861_v44, %v731_v23  ;;  %v6724_v37 = vld [vmem:[%s10525_s3 + $0x150] sm:$0xff] }
 0x336   : > { %6571 = vmatprep.subr.msk.mxu0 %vm3118_vm6, %v5225_v51  ;;  %v4449_v61 = vrot.slane %v6724_v37, 4  ;;  %v9936_v37 = vld [vmem:[%s7245_s30 + $0x30] sm:$0xff]  ;;  %v4452_v23 = vrot.slane %v6729_v52, 4  ;;  %v9989_v52 = vadd.f32 %v9948_v20, %v740_v19 }
 0x337   : > { %6572 = vmatpush3.xpose.msk.msra.mxu0 %vm3118_vm6, %v5225_v51  ;;  %v9856_v51 = vld [vmem:[%s7245_s30 + $0x40] sm:$0xff]  ;;  %v734_v54 = vrot.slane %v9936_v37, 1 }
 0x338   : > { %v736_v43 = vrot.slane %v9856_v51, 1  ;;  %v9958_v18 = vsel %vm4412_vm9, %v4449_v61, %v4450_v8  ;;  %v9992_v41 = vsel %vm4412_vm9, %v4452_v23, %v4453_v47  ;;  %v4444_v47 = vrot.slane %v9970_v30, 4 }
 0x339   : > { %v9980_v8 = vadd.f32 %v9936_v37, %v734_v54  ;;  %11418 = vst [vmem:[#allocation24_spill] sm:$0xff] %v9992_v41  ;;  %v10000_v54 = vld [vmem:[%s7245_s30 + $0x68] sm:$0xff] }
 0x33a   : > { %v9911_v40 = vadd.f32 %v9856_v51, %v736_v43  ;;  %v4435_v43 = vrot.slane %v9896_v2, 4  ;;  %11420 = vst [vmem:[#allocation31_spill] sm:$0xff] %v10000_v54 }
 0x33c   : > { %v9964_v13 = vsel %vm4412_vm9, %v4434_v60, %v4435_v43  ;;  %v9983_v60 = vadd.f32 %v9940_v11, %v735_v38  ;;  %v741_v38 = vrot.slane %v10000_v54, 1 }
 0x33e   : > { %11417 = vst [vmem:[#allocation59_spill] sm:$0xff] %v9983_v60 }
 0x394   : > { %v3896_v56 = vpop.f32.mrf.mxu1 }
 0x395   : > { %v4473_v29 = vmul.f32 %v9779_v1, %v3896_v56  ;;  %v9997_v56 = vld [vmem:[%s10525_s3 + $0x1c0] sm:$0x3f] }
 0x396   : > { %v3898_v61 = vpop.f32.mrf.mxu1  ;;  %11419 = vst [vmem:[#allocation80_spill] sm:$0xff] %v9997_v56 }
 0x397   : > { %v4518_v43 = vadd.f32 %v4488_v62, %v4473_v29  ;;  %v4474_v46 = vmul.f32 %v9787_v42, %v3898_v61  ;;  %v6731_v62 = vld [vmem:[%s10525_s3 + $0x140] sm:$0xff]  ;;  %v10025_v61 = vadd.f32 %v10000_v54, %v741_v38 }
 0x398   : > { %v4443_v42 = vrot.slane %v6731_v62, 4  ;;  %v4447_v62 = vrot.slane %v9997_v56, 4 }
 0x399   : > { %v5338_v19 = vmul.f32 1200.0, %v4518_v43  ;;  %5653 = vst [vmem:[%s9975_s15] sm:$0x3] %v4518_v43  ;;  %v5927_v23 = vrot.slane %v4518_v43, 7  ;;  %v4519_v29 = vadd.f32 %v4489_v9, %v4474_v46  ;;  %11421 = vst [vmem:[#allocation79_spill] sm:$0xff] %v10025_v61 }
 0x39a   : > { %v10028_v49 = vsel %vm4412_vm9, %v4443_v42, %v4444_v47  ;;  %v10046_v9 = vsel %vm4412_vm9, %v4446_v58, %v4447_v62  ;;  %v10057_v58 = vld [vmem:[%s7245_s30 + $0x50] sm:$0xff] }
 0x39b   : > { %v5353_v35 = vadd.f32 %v9726_v33, %v5338_v19  ;;  %5957 = vst [vmem:[%s9975_s15] sm:$0x30] %v5927_v23  ;;  %v5339_v43 = vmul.f32 1200.0, %v4519_v29  ;;  %5654 = vst [vmem:[%s9975_s15 + $0x8] sm:$0x3] %v4519_v29  ;;  %v5928_v16 = vrot.slane %v4519_v29, 7  ;;  %v10036_v29 = vadd.f32 %v5338_v19, %v9771_v32  ;;  %v6733_v32 = vld [vmem:[%s10525_s3 + $0x160] sm:$0xff] }
 0x39c   : > { %v4038_v46 = vpop.f32.mrf.mxu1  ;;  %11422 = vst [vmem:[#allocation82_spill] sm:$0xff] %v10028_v49  ;;  %v10033_v23 = vld [vmem:[%s10525_s3 + $0x1d8] sm:$0x3f]  ;;  %11424 = vst [vmem:[#allocation39_spill] sm:$0xff] %v10046_v9  ;;  %v738_v62 = vrot.slane %v10057_v58, 1 }
 0x39d   : > { %11423 = vst [vmem:[#allocation33_spill] sm:$0xff] %v10033_v23  ;;  %v6455_v22 = vadd.f32 -253.16, %v5353_v35  ;;  %v5354_v1 = vadd.f32 %v9812_v28, %v5339_v43  ;;  %5958 = vst [vmem:[%s9975_s15 + $0x8] sm:$0x30] %v5928_v16  ;;  %v10042_v38 = vadd.f32 %v5339_v43, %v9853_v34  ;;  %v4477_v42 = vmul.f32 %v9801_v0, %v4038_v46  ;;  %v10067_v46 = vld [vmem:[%s7245_s30 + $0x58] sm:$0xff] }
 0x39e   : > { %v4040_v47 = vpop.f32.mrf.mxu1  ;;  %v4455_v35 = vrot.slane %v6733_v32, 4  ;;  %v4456_v34 = vrot.slane %v10033_v23, 4  ;;  %v11425_v43 = vrot.slane %v9732_v3, 1  ;;  %v739_v30 = vrot.slane %v10067_v46, 1 }
 0x39f   : > { %v5383_v19 = vmul.f32 0.05, %v6455_v22  ;;  %v6456_v61 = vadd.f32 -253.16, %v5354_v1  ;;  %v4478_v16 = vmul.f32 %v9804_v6, %v4040_v47  ;;  %v5458_v22 = vrot.slane %v10036_v29, 2 }
 0x3a0   : > { %v4522_v0 = vadd.f32 %v11425_v43, %v4477_v42  ;;  %v11426_v6 = vrot.slane %v9737_v57, 1  ;;  %v5459_v3 = vrot.slane %v10042_v38, 2 }
 0x3a1   : > { %v5398_v26 = vmax.f32 %v5383_v19, 0.0  ;;  %v5384_v1 = vmul.f32 0.05, %v6456_v61 }
 0x3a2   : > { %v4523_v47 = vadd.f32 %v11426_v6, %v4478_v16  ;;  %v5342_v42 = vmul.f32 1200.0, %v4522_v0  ;;  %5657 = vst [vmem:[%s9975_s15 + $0x20] sm:$0x3] %v4522_v0  ;;  %v5931_v43 = vrot.slane %v4522_v0, 7  ;;  %v10075_v16 = vsel %vm4412_vm9, %v4455_v35, %v4456_v34 }
 0x3a3   : > { %v5413_v32 = vmin.f32 %v5398_v26, 1.0  ;;  %v5399_v19 = vmax.f32 %v5384_v1, 0.0  ;;  %v3967_v61 = vpop.f32.mrf.mxu0  ;;  %11427 = vst [vmem:[#allocation28_spill] sm:$0xff] %v10075_v16  ;;  %v10081_v26 = vld [vmem:[%s7245_s30 + $0x70] sm:$0xff]  ;;  %v10088_v35 = vadd.f32 %v10057_v58, %v738_v62  ;;  %v10092_v0 = vadd.f32 %v10067_v46, %v739_v30 }
 0x3a4   : > { %v5343_v56 = vmul.f32 1200.0, %v4523_v47  ;;  %5658 = vst [vmem:[%s9975_s15 + $0x28] sm:$0x3] %v4523_v47  ;;  %v5932_v29 = vrot.slane %v4523_v47, 7  ;;  %v5357_v57 = vadd.f32 %v9818_v14, %v5342_v42  ;;  %5961 = vst [vmem:[%s9975_s15 + $0x20] sm:$0x30] %v5931_v43  ;;  %v4475_v38 = vmul.f32 %v9822_v25, %v3967_v61 }
 0x3a5   : > { %v5488_v6 = vmul.f32 %v5458_v22, %v5413_v32  ;;  %v5414_v9 = vmin.f32 %v5399_v19, 1.0  ;;  %v742_v1 = vrot.slane %v10081_v26, 1  ;;  %v11428_v43 = vrot.slane %v9752_v59, 1  ;;  %11429 = vst [vmem:[#allocation57_spill] sm:$0xff] %v10088_v35  ;;  %11430 = vst [vmem:[#allocation49_spill] sm:$0xff] %v10092_v0  ;;  %v4180_v59 = vpop.f32.mrf.mxu1 }
 0x3a6   : > { %v5358_v49 = vadd.f32 %v9829_v45, %v5343_v56  ;;  %5962 = vst [vmem:[%s9975_s15 + $0x28] sm:$0x30] %v5932_v29  ;;  %v6459_v47 = vadd.f32 -253.16, %v5357_v57  ;;  %v5563_v34 = vsub.f32 1.0, %v5413_v32  ;;  %v5432_v19 = vadd.f32 %v5342_v42, %v9870_v24 }
 0x3a7   : > { %v4520_v21 = vadd.f32 %v11428_v43, %v4475_v38  ;;  %v5489_v61 = vmul.f32 %v5459_v3, %v5414_v9  ;;  %v11431_v29 = vrot.slane %v9726_v33, 2  ;;  %v5564_v38 = vsub.f32 1.0, %v5414_v9 }
 0x3a8   : > { %v5387_v16 = vmul.f32 0.05, %v6459_v47  ;;  %v6460_v57 = vadd.f32 -253.16, %v5358_v49  ;;  %v10100_v32 = vadd.f32 %v10081_v26, %v742_v1  ;;  %v11433_v24 = vrot.slane %v9812_v28, 2  ;;  %v3969_v49 = vpop.f32.mrf.mxu0  ;;  %v4182_v1 = vpop.f32.mrf.mxu1 }
 0x3a9   : > { %v5533_v23 = vsub.f32 %v5488_v6, %v11431_v29  ;;  %v5340_v60 = vmul.f32 1200.0, %v4520_v21  ;;  %5655 = vst [vmem:[%s9975_s15 + $0x10] sm:$0x3] %v4520_v21  ;;  %v5578_v47 = vmul.f32 %v5563_v34, %v5458_v22  ;;  %v5462_v29 = vrot.slane %v5432_v19, 2 }
 0x3aa   : > { %11432 = vst [vmem:[#allocation62_spill] sm:$0xff] %v10100_v32  ;;  %v5534_v30 = vsub.f32 %v5489_v61, %v11433_v24  ;;  %v5402_v42 = vmax.f32 %v5387_v16, 0.0  ;;  %v5388_v25 = vmul.f32 0.05, %v6460_v57  ;;  %v5433_v9 = vadd.f32 %v5343_v56, %v9884_v31 }
 0x3ab   : > { %v5355_v6 = vadd.f32 %v9833_v53, %v5340_v60  ;;  %v5929_v0 = vrot.slane %v4520_v21, 7  ;;  %v5548_v43 = vmul.f32 0.00083333335, %v5533_v23  ;;  %v5579_v32 = vmul.f32 %v5564_v38, %v5459_v3  ;;  %v10112_v57 = vpop.f32.mrf.mxu0 }
 0x3ac   : > { %v5417_v35 = vmin.f32 %v5402_v42, 1.0  ;;  %v5403_v62 = vmax.f32 %v5388_v25, 0.0  ;;  %v10107_v41 = vadd.f32 %v5340_v60, %v9887_v15  ;;  %v4481_v16 = vmul.f32 %v9838_v55, %v4180_v59  ;;  %v4322_v23 = vpop.f32.mrf.mxu1 }
 0x3ad   : > { %v6457_v54 = vadd.f32 -253.16, %v5355_v6  ;;  %5959 = vst [vmem:[%s9975_s15 + $0x10] sm:$0x30] %v5929_v0  ;;  %v4476_v61 = vmul.f32 %v9850_v10, %v3969_v49  ;;  %v5549_v22 = vmul.f32 0.00083333335, %v5534_v30  ;;  %v10125_v24 = vpop.f32.mrf.mxu0 }
 0x3ae   : > { %v5567_v31 = vsub.f32 1.0, %v5417_v35  ;;  %v5418_v21 = vmin.f32 %v5403_v62, 1.0  ;;  %v5492_v25 = vmul.f32 %v5462_v29, %v5417_v35  ;;  %v11434_v3 = vrot.slane %v9765_v5, 1  ;;  %v10130_v49 = vpop.f32.mrf.mxu1 }
 0x3af   : > { %v5385_v56 = vmul.f32 0.05, %v6457_v54  ;;  %v11435_v15 = vrot.slane %v9776_v7, 1  ;;  %v11436_v10 = vrot.slane %v9726_v33, 3  ;;  %v5463_v19 = vrot.slane %v5433_v9, 2 }
 0x3b0   : > { %v4526_v34 = vadd.f32 %v11434_v3, %v4481_v16  ;;  %v5582_v54 = vmul.f32 %v5567_v31, %v5462_v29  ;;  %v11437_v7 = vrot.slane %v9812_v28, 3  ;;  %v5683_v42 = vcombine.low %v5548_v43, %v5549_v22 }
 0x3b1   : > { %v4521_v60 = vadd.f32 %v11435_v15, %v4476_v61  ;;  %v5623_v0 = vsub.f32 %v5578_v47, %v11436_v10  ;;  %v5400_v62 = vmax.f32 %v5385_v56, 0.0  ;;  %v5568_v33 = vsub.f32 1.0, %v5418_v21 }
 0x3b2   : > { %v5346_v35 = vmul.f32 1200.0, %v4526_v34  ;;  %5661 = vst [vmem:[%s9975_s15 + $0x40] sm:$0x3] %v4526_v34  ;;  %v5935_v5 = vrot.slane %v4526_v34, 7  ;;  %v5624_v30 = vsub.f32 %v5579_v32, %v11437_v7  ;;  %v5460_v6 = vrot.slane %v10107_v41, 2 }
 0x3b3   : > { %5656 = vst [vmem:[%s9975_s15 + $0x18] sm:$0x3] %v4521_v60  ;;  %v11438_v47 = vrot.slane %v9818_v14, 2  ;;  %v5415_v29 = vmin.f32 %v5400_v62, 1.0  ;;  %v5341_v61 = vmul.f32 1200.0, %v4521_v60  ;;  %v10136_v31 = vpop.f32.mrf.mxu0  ;;  %v5493_v56 = vmul.f32 %v5463_v19, %v5418_v21 }
 0x3b4   : > { %v5361_v16 = vadd.f32 %v9856_v51, %v5346_v35  ;;  %5965 = vst [vmem:[%s9975_s15 + $0x40] sm:$0x30] %v5935_v5  ;;  %v5930_v28 = vrot.slane %v4521_v60, 7  ;;  %v10138_v32 = vpop.f32.mrf.mxu1  ;;  %v10142_v22 = vmul.f32 0.00083333335, %v5623_v0  ;;  %v10151_v21 = vrot.slane %v5683_v42, %v9768_v17 }
 0x3b5   : > { %v5537_v9 = vsub.f32 %v5492_v25, %v11438_v47  ;;  %v11439_v25 = vrot.slane %v9818_v14, 3  ;;  %v5565_v34 = vsub.f32 1.0, %v5415_v29  ;;  %v10146_v10 = vpop.f32.mrf.mxu0  ;;  %v10148_v62 = vmul.f32 0.00083333335, %v5624_v30 }
 0x3b6   : > { %v6463_v15 = vadd.f32 -253.16, %v5361_v16  ;;  %v5583_v60 = vmul.f32 %v5568_v33, %v5463_v19  ;;  %v5356_v5 = vadd.f32 %v9861_v44, %v5341_v61  ;;  %5960 = vst [vmem:[%s9975_s15 + $0x18] sm:$0x30] %v5930_v28  ;;  %v4601_v7 = vpop.f32.mrf.mxu1  ;;  %v5490_v0 = vmul.f32 %v5460_v6, %v5415_v29 }
 0x3b7   : > { %v5627_v3 = vsub.f32 %v5582_v54, %v11439_v25  ;;  %v10155_v47 = vmul.f32 0.00083333335, %v5537_v9  ;;  %v4482_v14 = vmul.f32 %v9875_v4, %v4182_v1  ;;  %v11440_v54 = vrot.slane %v9829_v45, 2 }
 0x3b8   : > { %v5391_v41 = vmul.f32 0.05, %v6463_v15  ;;  %v5436_v30 = vadd.f32 %v5346_v35, %v9911_v40  ;;  %v6458_v25 = vadd.f32 -253.16, %v5356_v5  ;;  %v5431_v42 = vadd.f32 %v5341_v61, %v9914_v48  ;;  %v10162_v19 = vpop.f32.mrf.mxu0  ;;  %v10164_v33 = vpop.f32.mrf.mxu1 }
 0x3b9   : > { %v5538_v16 = vsub.f32 %v5493_v56, %v11440_v54  ;;  %v10166_v28 = vmul.f32 0.00083333335, %v5627_v3  ;;  %v5580_v9 = vmul.f32 %v5565_v34, %v5460_v6  ;;  %v11441_v15 = vrot.slane %v9797_v39, 1 }
 0x3ba   : > { %v5406_v29 = vmax.f32 %v5391_v41, 0.0  ;;  %v11442_v1 = vrot.slane %v9829_v45, 3  ;;  %v5386_v7 = vmul.f32 0.05, %v6458_v25  ;;  %v4479_v40 = vmul.f32 %v9945_v63, %v10112_v57  ;;  %v6560_v35 = vpop.f32.mrf.mxu0  ;;  %v4606_v61 = vpop.f32.mrf.mxu1 }
 0x3bb   : > { %v4527_v4 = vadd.f32 %v11441_v15, %v4482_v14  ;;  %v4485_v48 = vmul.f32 %v9958_v18, %v4322_v23  ;;  %v11443_v3 = vrot.slane %v9833_v53, 2  ;;  %v5461_v34 = vrot.slane %v5431_v42, 2 }
 0x3bc   : > { %v5628_v56 = vsub.f32 %v5583_v60, %v11442_v1  ;;  %v5421_v6 = vmin.f32 %v5406_v29, 1.0  ;;  %v5401_v45 = vmax.f32 %v5386_v7, 0.0  ;;  %v11444_v60 = vrot.slane %v9867_v27, 1  ;;  %v10182_v57 = vpop.f32.mrf.mxu1 }
 0x3bd   : > { %v5535_v5 = vsub.f32 %v5490_v0, %v11443_v3  ;;  %v5347_v41 = vmul.f32 1200.0, %v4527_v4  ;;  %5662 = vst [vmem:[%s9975_s15 + $0x48] sm:$0x3] %v4527_v4  ;;  %v5936_v39 = vrot.slane %v4527_v4, 7  ;;  %v11445_v63 = vrot.slane %v9880_v50, 1 }
 0x3be   : > { %v4524_v14 = vadd.f32 %v11444_v60, %v4479_v40  ;;  %v10184_v23 = vmul.f32 0.00083333335, %v5538_v16  ;;  %v11446_v0 = vrot.slane %v9833_v53, 3  ;;  %v5466_v25 = vrot.slane %v5436_v30, 2  ;;  %v4611_v50 = vpop.f32.mrf.mxu1 }
 0x3bf   : > { %v4530_v18 = vadd.f32 %v11445_v63, %v4485_v48  ;;  %v5362_v29 = vadd.f32 %v9890_v36, %v5347_v41  ;;  %5966 = vst [vmem:[%s9975_s15 + $0x48] sm:$0x30] %v5936_v39  ;;  %v5416_v15 = vmin.f32 %v5401_v45, 1.0  ;;  %v10192_v1 = vmul.f32 0.00083333335, %v5628_v56 }
 0x3c0   : > { %v5625_v54 = vsub.f32 %v5580_v9, %v11446_v0  ;;  %v5344_v42 = vmul.f32 1200.0, %v4524_v14  ;;  %5659 = vst [vmem:[%s9975_s15 + $0x30] sm:$0x3] %v4524_v14  ;;  %v5933_v27 = vrot.slane %v4524_v14, 7  ;;  %v5571_v7 = vsub.f32 1.0, %v5421_v6  ;;  %v10197_v35 = vpop.f32.mrf.mxu1 }
 0x3c1   : > { %v5350_v4 = vmul.f32 1200.0, %v4530_v18  ;;  %5665 = vst [vmem:[%s9975_s15 + $0x60] sm:$0x3] %v4530_v18  ;;  %v6464_v16 = vadd.f32 -253.16, %v5362_v29  ;;  %v5437_v40 = vadd.f32 %v5347_v41, %v9933_v12  ;;  %v5491_v9 = vmul.f32 %v5461_v34, %v5416_v15  ;;  %v10202_v45 = vpop.f32.mrf.mxu0 }
 0x3c2   : > { %v5550_v53 = vmul.f32 0.00083333335, %v5535_v5  ;;  %v5566_v30 = vsub.f32 1.0, %v5416_v15  ;;  %v5359_v48 = vadd.f32 %v9936_v37, %v5344_v42  ;;  %5963 = vst [vmem:[%s9975_s15 + $0x30] sm:$0x30] %v5933_v27  ;;  %v4480_v56 = vmul.f32 %v9964_v13, %v10125_v24  ;;  %v4616_v63 = vpop.f32.mrf.mxu1 }
 0x3c3   : > { %v5640_v61 = vmul.f32 0.00083333335, %v5625_v54  ;;  %v5392_v3 = vmul.f32 0.05, %v6464_v16  ;;  %v5365_v39 = vadd.f32 %v9948_v20, %v5350_v4  ;;  %v5496_v60 = vmul.f32 %v5466_v25, %v5421_v6  ;;  %v4686_v54 = vpop.f32.mrf.mxu0 }
 0x3c4   : > { %v11447_v12 = vrot.slane %v9861_v44, 2  ;;  %v5581_v41 = vmul.f32 %v5566_v30, %v5461_v34  ;;  %v6461_v14 = vadd.f32 -253.16, %v5359_v48  ;;  %v5586_v0 = vmul.f32 %v5571_v7, %v5466_v25  ;;  %v10208_v59 = vpop.f32.mrf.mxu1 }
 0x3c5   : > { %v5407_v29 = vmax.f32 %v5392_v3, 0.0  ;;  %v5467_v15 = vrot.slane %v5437_v40, 2  ;;  %v6467_v27 = vadd.f32 -253.16, %v5365_v39  ;;  %v11448_v16 = vrot.slane %v9861_v44, 3  ;;  %v10215_v40 = vpop.f32.mrf.mxu0 }
 0x3c6   : > { %v5536_v5 = vsub.f32 %v5491_v9, %v11447_v12  ;;  %v5389_v13 = vmul.f32 0.05, %v6461_v14  ;;  %v5939_v24 = vrot.slane %v4530_v18, 7  ;;  %v10211_v34 = vadd.f32 %v5344_v42, %v9980_v8  ;;  %v4771_v18 = vpop.f32.mrf.mxu1 }
 0x3c7   : > { %v5626_v43 = vsub.f32 %v5581_v41, %v11448_v16  ;;  %v5422_v6 = vmin.f32 %v5407_v29, 1.0  ;;  %v5395_v9 = vmul.f32 0.05, %v6467_v27  ;;  %v11449_v25 = vrot.slane %v9896_v2, 1  ;;  %v4691_v8 = vpop.f32.mrf.mxu0 }
 0x3c8   : > { %v5551_v50 = vmul.f32 0.00083333335, %v5536_v5  ;;  %v5404_v3 = vmax.f32 %v5389_v13, 0.0  ;;  %v10218_v44 = vadd.f32 %v5350_v4, %v9989_v52  ;;  %5969 = vst [vmem:[%s9975_s15 + $0x60] sm:$0x30] %v5939_v24  ;;  %v5807_v2 = vcombine.low %v10142_v22, %v10148_v62 }
 0x3c9   : > { %v4525_v7 = vadd.f32 %v11449_v25, %v4480_v56  ;;  %v5641_v30 = vmul.f32 0.00083333335, %v5626_v43  ;;  %v5497_v39 = vmul.f32 %v5467_v15, %v5422_v6  ;;  %v5572_v12 = vsub.f32 1.0, %v5422_v6  ;;  %v10230_v63 = vpop.f32.mrf.mxu0  ;;  %v10232_v29 = vpop.f32.mrf.mxu1 }
 0x3ca   : > { %v5684_v48 = vcombine.low %v5550_v53, %v5551_v50  ;;  %v5410_v5 = vmax.f32 %v5395_v9, 0.0  ;;  %v5685_v52 = vcombine.low %v10155_v47, %v10184_v23  ;;  %v5809_v4 = vcombine.low %v10166_v28, %v10192_v1 }
 0x3cb   : > { %v5345_v41 = vmul.f32 1200.0, %v4525_v7  ;;  %5660 = vst [vmem:[%s9975_s15 + $0x38] sm:$0x3] %v4525_v7  ;;  %v5808_v43 = vcombine.low %v5640_v61, %v5641_v30  ;;  %v5934_v53 = vrot.slane %v4525_v7, 7  ;;  %v5419_v56 = vmin.f32 %v5404_v3, 1.0  ;;  %v4696_v13 = vpop.f32.mrf.mxu0  ;;  %v4776_v24 = vpop.f32.mrf.mxu1 }
 0x3cc   : > { %v5700_v42 = vrot.slane %v5684_v48, %v9768_v17  ;;  %v5464_v14 = vrot.slane %v10211_v34, 2  ;;  %v11450_v27 = vrot.slane %v9856_v51, 2  ;;  %v11451_v62 = vrot.slane %v9856_v51, 3 }
 0x3cd   : > { %v5587_v54 = vmul.f32 %v5572_v12, %v5467_v15  ;;  %v5360_v50 = vadd.f32 %v9940_v11, %v5345_v41  ;;  %5964 = vst [vmem:[%s9975_s15 + $0x38] sm:$0x30] %v5934_v53  ;;  %v11452_v28 = vrot.slane %v9890_v36, 2  ;;  %v5425_v1 = vmin.f32 %v5410_v5, 1.0  ;;  %v10259_v7 = vpop.f32.mrf.mxu0  ;;  %v10261_v30 = vpop.f32.mrf.mxu1  ;;  %v11472_v15 = vld [vmem:[#allocation79_spill] sm:$0xff] }
 0x3ce   : > { %v5541_v22 = vsub.f32 %v5496_v60, %v11450_v27  ;;  %v5631_v61 = vsub.f32 %v5586_v0, %v11451_v62  ;;  %v5715_v47 = vcombine.low %v10151_v21, %v5700_v42  ;;  %v5470_v16 = vrot.slane %v10218_v44, 2  ;;  %v11453_v60 = vld [vmem:[#allocation24_spill] sm:$0xff] }
 0x3cf   : > { %v5542_v23 = vsub.f32 %v5497_v39, %v11452_v28  ;;  %v10245_v6 = vrot.slane %v5807_v2, %v9768_v17  ;;  %v10248_v51 = vrot.slane %v5808_v43, %v9768_v17  ;;  %v4486_v0 = vmul.f32 %v11453_v60, %v10130_v49  ;;  %v4701_v2 = vpop.f32.mrf.mxu0  ;;  %v4781_v42 = vpop.f32.mrf.mxu1 }
 0x3d0   : > { %v10254_v21 = vrot.slane %v5685_v52, %v9768_v17  ;;  %v10257_v34 = vrot.slane %v5809_v4, %v9768_v17  ;;  %v5494_v9 = vmul.f32 %v5464_v14, %v5419_v56  ;;  %v5569_v25 = vsub.f32 1.0, %v5419_v56  ;;  %v11455_v52 = vld [vmem:[#allocation59_spill] sm:$0xff]  ;;  %v11456_v56 = vld [vmem:[#allocation68_spill] sm:$0xff] }
 0x3d1   : > { %v10263_v48 = vmul.f32 0.00083333335, %v5541_v22  ;;  %v10265_v3 = vmul.f32 0.00083333335, %v5631_v61  ;;  %v11454_v49 = vrot.slane %v9890_v36, 3  ;;  %v10270_v39 = vrot.slane %v5715_v47, %v9768_v17  ;;  %v11460_v47 = vld [vmem:[#allocation39_spill] sm:$0xff] }
 0x3d2   : > { %v6462_v18 = vadd.f32 -253.16, %v5360_v50  ;;  %v10272_v12 = vmul.f32 0.00083333335, %v5542_v23  ;;  %v5500_v5 = vmul.f32 %v5470_v16, %v5425_v1  ;;  %v5575_v8 = vsub.f32 1.0, %v5425_v1  ;;  %v10285_v23 = vpop.f32.mrf.mxu1  ;;  %v10287_v1 = vpop.f32.mrf.mxu0 }
 0x3d3   : > { %v5632_v44 = vsub.f32 %v5587_v54, %v11454_v49  ;;  %v5839_v43 = vcombine.low %v10245_v6, %v10248_v51  ;;  %v5435_v4 = vadd.f32 %v5345_v41, %v11455_v52  ;;  %v11457_v36 = vrot.slane %v11456_v56, 1  ;;  %v11459_v54 = vld [vmem:[#allocation82_spill] sm:$0xff]  ;;  %v11464_v49 = vld [vmem:[#allocation80_spill] sm:$0xff]  ;;  %v11466_v56 = vld [vmem:[#allocation31_spill] sm:$0xff] }
 0x3d4   : > { %v5390_v53 = vmul.f32 0.05, %v6462_v18  ;;  %v11458_v22 = vrot.slane %v9936_v37, 2  ;;  %v5584_v61 = vmul.f32 %v5569_v25, %v5464_v14  ;;  %v4483_v50 = vmul.f32 %v11459_v54, %v10136_v31  ;;  %v4786_v2 = vpop.f32.mrf.mxu1  ;;  %v4856_v42 = vpop.f32.mrf.mxu0 }
 0x3d5   : > { %v4531_v27 = vadd.f32 %v11457_v36, %v4486_v0  ;;  %v4484_v28 = vmul.f32 %v11460_v47, %v10146_v10  ;;  %v10289_v13 = vmul.f32 0.00083333335, %v5632_v44  ;;  %v11461_v31 = vrot.slane %v9948_v20, 2  ;;  %v11462_v10 = vld [vmem:[#allocation75_spill] sm:$0xff] }
 0x3d6   : > { %v5539_v62 = vsub.f32 %v5494_v9, %v11458_v22  ;;  %v5405_v41 = vmax.f32 %v5390_v53, 0.0  ;;  %v11463_v9 = vrot.slane %v11462_v10, 1  ;;  %v11465_v18 = vrot.slane %v11464_v49, 1 }
 0x3d7   : > { %v5351_v24 = vmul.f32 1200.0, %v4531_v27  ;;  %5666 = vst [vmem:[%s9975_s15 + $0x68] sm:$0x3] %v4531_v27  ;;  %v5940_v60 = vrot.slane %v4531_v27, 7  ;;  %v10296_v0 = vsub.f32 %v5500_v5, %v11461_v31  ;;  %v5465_v52 = vrot.slane %v5435_v4, 2  ;;  %v11467_v27 = vld [vmem:[#allocation28_spill] sm:$0xff]  ;;  %v10308_v31 = vpop.f32.mrf.mxu0 }
 0x3d8   : > { %v4528_v25 = vadd.f32 %v11463_v9, %v4483_v50  ;;  %v4529_v44 = vadd.f32 %v11465_v18, %v4484_v28  ;;  %v5420_v53 = vmin.f32 %v5405_v41, 1.0  ;;  %v4487_v22 = vmul.f32 %v11467_v27, %v10162_v19  ;;  %v10310_v28 = vpop.f32.mrf.mxu1 }
 0x3d9   : > { %v5366_v36 = vadd.f32 %v11466_v56, %v5351_v24  ;;  %5970 = vst [vmem:[%s9975_s15 + $0x68] sm:$0x30] %v5940_v60  ;;  %v10312_v41 = vmul.f32 %v5575_v8, %v5470_v16  ;;  %v5554_v9 = vmul.f32 0.00083333335, %v5539_v62  ;;  %v11468_v19 = vrot.slane %v9936_v37, 3 }
 0x3da   : > { %v5348_v54 = vmul.f32 1200.0, %v4528_v25  ;;  %5663 = vst [vmem:[%s9975_s15 + $0x50] sm:$0x3] %v4528_v25  ;;  %v5937_v5 = vrot.slane %v4528_v25, 7  ;;  %v5349_v47 = vmul.f32 1200.0, %v4529_v44  ;;  %v5938_v50 = vrot.slane %v4529_v44, 7  ;;  %v4941_v2 = vpop.f32.mrf.mxu1 }
 0x3db   : > { %5664 = vst [vmem:[%s9975_s15 + $0x58] sm:$0x3] %v4529_v44  ;;  %v5495_v4 = vmul.f32 %v5465_v52, %v5420_v53  ;;  %v5570_v10 = vsub.f32 1.0, %v5420_v53  ;;  %v6468_v60 = vadd.f32 -253.16, %v5366_v36  ;;  %v5629_v49 = vsub.f32 %v5584_v61, %v11468_v19  ;;  %v4861_v44 = vpop.f32.mrf.mxu0  ;;  %v11470_v53 = vld [vmem:[#allocation33_spill] sm:$0xff] }
 0x3dc   : > { %v5363_v18 = vadd.f32 %v10057_v58, %v5348_v54  ;;  %5967 = vst [vmem:[%s9975_s15 + $0x50] sm:$0x30] %v5937_v5  ;;  %v5364_v25 = vadd.f32 %v10067_v46, %v5349_v47  ;;  %5968 = vst [vmem:[%s9975_s15 + $0x58] sm:$0x30] %v5938_v50  ;;  %v11469_v42 = vrot.slane %v9940_v11, 2  ;;  %v11471_v36 = vrot.slane %v11470_v53, 1  ;;  %v10328_v50 = vpop.f32.mrf.mxu1 }
 0x3dd   : > { %v5585_v8 = vmul.f32 %v5570_v10, %v5465_v52  ;;  %v5396_v27 = vmul.f32 0.05, %v6468_v60  ;;  %v5441_v37 = vadd.f32 %v5351_v24, %v11472_v15  ;;  %v11473_v19 = vld [vmem:[#allocation57_spill] sm:$0xff]  ;;  %v10326_v38 = vpop.f32.mrf.mxu0  ;;  %v11474_v2 = vrot.slane %v9940_v11, 3 }
 0x3de   : > { %v5540_v16 = vsub.f32 %v5495_v4, %v11469_v42  ;;  %v4532_v62 = vadd.f32 %v11471_v36, %v4487_v22  ;;  %v6465_v61 = vadd.f32 -253.16, %v5363_v18  ;;  %v5438_v14 = vadd.f32 %v5348_v54, %v11473_v19  ;;  %v11475_v15 = vld [vmem:[#allocation49_spill] sm:$0xff]  ;;  %v4946_v18 = vpop.f32.mrf.mxu1 }
 0x3df   : > { %v6466_v5 = vadd.f32 -253.16, %v5364_v25  ;;  %v5630_v55 = vsub.f32 %v5585_v8, %v11474_v2  ;;  %v5411_v4 = vmax.f32 %v5396_v27, 0.0  ;;  %v5439_v24 = vadd.f32 %v5349_v47, %v11475_v15  ;;  %v4866_v54 = vpop.f32.mrf.mxu0 }
 0x3e0   : > { %v5555_v44 = vmul.f32 0.00083333335, %v5540_v16  ;;  %v10332_v52 = vmul.f32 1200.0, %v4532_v62  ;;  %5667 = vst [vmem:[%s9975_s15 + $0x70] sm:$0x3] %v4532_v62  ;;  %v5941_v60 = vrot.slane %v4532_v62, 7  ;;  %v5847_v11 = vrot.slane %v5839_v43, %v9768_v17  ;;  %v10343_v19 = vpop.f32.mrf.mxu1 }
 0x3e1   : > { %v5393_v22 = vmul.f32 0.05, %v6465_v61  ;;  %v5394_v10 = vmul.f32 0.05, %v6466_v5  ;;  %v5644_v25 = vmul.f32 0.00083333335, %v5629_v49  ;;  %v10341_v61 = vpop.f32.mrf.mxu0 }
 0x3e2   : > { %v5645_v42 = vmul.f32 0.00083333335, %v5630_v55  ;;  %v5686_v53 = vcombine.low %v5554_v9, %v5555_v44  ;;  %v5426_v36 = vmin.f32 %v5411_v4, 1.0  ;;  %v5471_v16 = vrot.slane %v5441_v37, 2  ;;  %5971 = vst [vmem:[%s9975_s15 + $0x70] sm:$0x30] %v5941_v60  ;;  %v4951_v43 = vpop.f32.mrf.mxu1 }
 0x3e3   : > { %v5408_v8 = vmax.f32 %v5393_v22, 0.0  ;;  %v5409_v27 = vmax.f32 %v5394_v10, 0.0  ;;  %v5367_v55 = vadd.f32 %v10081_v26, %v10332_v52  ;;  %v5468_v5 = vrot.slane %v5438_v14, 2  ;;  %v4871_v51 = vpop.f32.mrf.mxu0 }
 0x3e4   : > { %v5714_v47 = vrot.slane %v5686_v53, %v9768_v17  ;;  %v5810_v62 = vcombine.low %v5644_v25, %v5645_v42  ;;  %v5576_v49 = vsub.f32 1.0, %v5426_v36  ;;  %v5469_v6 = vrot.slane %v5439_v24, 2  ;;  %v10352_v18 = vpop.f32.mrf.mxu1 }
 0x3e5   : > { %v5423_v9 = vmin.f32 %v5408_v8, 1.0  ;;  %v5424_v44 = vmin.f32 %v5409_v27, 1.0  ;;  %v5856_v37 = vcombine.low %v10265_v3, %v10289_v13  ;;  %v5501_v22 = vmul.f32 %v5471_v16, %v5426_v36  ;;  %v10354_v25 = vpop.f32.mrf.mxu0 }
 0x3e6   : > { %v5716_v2 = vcombine.low %v10254_v21, %v5714_v47  ;;  %v5838_v4 = vrot.slane %v5810_v62, %v9768_v17  ;;  %v5591_v42 = vmul.f32 %v5576_v49, %v5471_v16  ;;  %v6469_v53 = vadd.f32 -253.16, %v5367_v55  ;;  %v4956_v47 = vpop.f32.mrf.mxu1 }
 0x3e7   : > { %v5498_v10 = vmul.f32 %v5468_v5, %v5423_v9  ;;  %v5573_v15 = vsub.f32 1.0, %v5423_v9  ;;  %v5499_v60 = vmul.f32 %v5469_v6, %v5424_v44  ;;  %v5574_v54 = vsub.f32 1.0, %v5424_v44  ;;  %v5026_v62 = vpop.f32.mrf.mxu0 }
 0x3e8   : > { %v5730_v14 = vrot.slane %v5716_v2, %v9768_v17  ;;  %v5840_v24 = vcombine.low %v10257_v34, %v5838_v4  ;;  %v11476_v3 = vrot.slane %v10057_v58, 2  ;;  %v11477_v36 = vrot.slane %v10067_v46, 2 }
 0x3e9   : > { %v5588_v13 = vmul.f32 %v5573_v15, %v5468_v5  ;;  %v5589_v27 = vmul.f32 %v5574_v54, %v5469_v6  ;;  %v11478_v9 = vrot.slane %v9948_v20, 3  ;;  %v11479_v49 = vrot.slane %v11466_v56, 2  ;;  %v10373_v20 = vpop.f32.mrf.mxu1  ;;  %v11482_v15 = vld [vmem:[#allocation62_spill] sm:$0xff] }
 0x3ea   : > { %v5543_v21 = vsub.f32 %v5498_v10, %v11476_v3  ;;  %v5544_v8 = vsub.f32 %v5499_v60, %v11477_v36  ;;  %v5731_v34 = vcombine.low %v10270_v39, %v5730_v14  ;;  %v5854_v16 = vrot.slane %v5840_v24, %v9768_v17  ;;  %v5029_v10 = vpop.f32.mrf.mxu0 }
 0x3eb   : > { %v5635_v44 = vsub.f32 %v10312_v41, %v11478_v9  ;;  %v5546_v55 = vsub.f32 %v5501_v22, %v11479_v49  ;;  %v11480_v5 = vrot.slane %v10057_v58, 3  ;;  %v11481_v6 = vrot.slane %v10067_v46, 3 }
 0x3ec   : > { %v5558_v51 = vmul.f32 0.00083333335, %v5543_v21  ;;  %v5559_v2 = vmul.f32 0.00083333335, %v5544_v8  ;;  %v5855_v39 = vcombine.low %v5847_v11, %v5854_v16  ;;  %v5397_v41 = vmul.f32 0.05, %v6469_v53  ;;  %v5031_v3 = vpop.f32.mrf.mxu0  ;;  %v5111_v21 = vpop.f32.mrf.mxu1 }
 0x3ed   : > { %v5633_v43 = vsub.f32 %v5588_v13, %v11480_v5  ;;  %v5634_v4 = vsub.f32 %v5589_v27, %v11481_v6  ;;  %6470 = vst [vmem:[%s9975_s15 + $0x2] ss:$8 sm:$0xf] %v5731_v34  ;;  %6471 = vst [vmem:[%s9975_s15 + $0x2] ss:$8 sm:$0xf0] %v5731_v34  ;;  %v5442_v22 = vadd.f32 %v10332_v52, %v11482_v15 }
 0x3ee   : > { %v4690_v58 = vadd.f32 %v10215_v40, %v10164_v33  ;;  %v11483_v60 = vrot.slane %v11466_v56, 3  ;;  %v5733_v24 = vcombine.low %v5558_v51, %v5559_v2  ;;  %v11484_v13 = vcombine.low %v10263_v48, %v10272_v12  ;;  %6474 = vst [vmem:[%s9975_s15 + $0x3] ss:$8 sm:$0xf] %v5855_v39  ;;  %v5034_v8 = vpop.f32.mrf.mxu0  ;;  %v5114_v27 = vpop.f32.mrf.mxu1 }
 0x3ef   : > { %v5648_v46 = vmul.f32 0.00083333335, %v5633_v43  ;;  %v5649_v14 = vmul.f32 0.00083333335, %v5634_v4  ;;  %v5560_v53 = vmul.f32 0.00083333335, %v10296_v0  ;;  %v4685_v33 = vadd.f32 %v10202_v45, %v10138_v32 }
 0x3f0   : > { %v5636_v54 = vsub.f32 %v5591_v42, %v11483_v60  ;;  %v5741_v11 = vrot.slane %v11484_v13, %v9768_v17  ;;  %6475 = vst [vmem:[%s9975_s15 + $0x3] ss:$8 sm:$0xf0] %v5855_v39  ;;  %v5412_v52 = vmax.f32 %v5397_v41, 0.0  ;;  %v5865_v40 = vrot.slane %v5856_v37, %v9768_v17  ;;  %v5036_v45 = vpop.f32.mrf.mxu0  ;;  %v5116_v37 = vpop.f32.mrf.mxu1 }
 0x3f1   : > { %v5561_v56 = vmul.f32 0.00083333335, %v5546_v55  ;;  %v5857_v42 = vcombine.low %v5648_v46, %v5649_v14  ;;  %v4775_v36 = vadd.f32 %v10232_v29, %v4690_v58  ;;  %v5650_v47 = vmul.f32 0.00083333335, %v5635_v44 }
 0x3f2   : > { %v5427_v62 = vmin.f32 %v5412_v52, 1.0  ;;  %v5472_v48 = vrot.slane %v5442_v22, 2  ;;  %v4770_v12 = vadd.f32 %v10208_v59, %v4685_v33  ;;  %v5651_v0 = vmul.f32 0.00083333335, %v5636_v54  ;;  %v5039_v43 = vpop.f32.mrf.mxu0 }
 0x3f3   : > { %v5748_v9 = vrot.slane %v5733_v24, %v9768_v17  ;;  %v4700_v34 = vadd.f32 %v10259_v7, %v10197_v35  ;;  %v4860_v32 = vadd.f32 %v10308_v31, %v4775_v36  ;;  %v4695_v29 = vadd.f32 %v10230_v63, %v10182_v57  ;;  %v5119_v35 = vpop.f32.mrf.mxu1 }
 0x3f4   : > { %v5502_v16 = vmul.f32 %v5472_v48, %v5427_v62  ;;  %v5577_v49 = vsub.f32 1.0, %v5427_v62  ;;  %v4855_v44 = vadd.f32 %v10287_v1, %v4770_v12  ;;  %v5734_v55 = vcombine.low %v5560_v53, %v5561_v56  ;;  %v5041_v41 = vpop.f32.mrf.mxu0 }
 0x3f5   : > { %v5872_v59 = vrot.slane %v5857_v42, %v9768_v17  ;;  %v4785_v51 = vadd.f32 %v10285_v23, %v4700_v34  ;;  %v4945_v5 = vadd.f32 %v10328_v50, %v4860_v32  ;;  %v11485_v7 = vrot.slane %v10081_v26, 2  ;;  %v5121_v15 = vpop.f32.mrf.mxu1  ;;  %v6018_v41 = vld [vmem:[%s9293_s24 + $0x18] sm:$0xff] (%p6859_p5) }
 0x3f6   : > { %v5592_v2 = vmul.f32 %v5577_v49, %v5472_v48  ;;  %v4780_v6 = vadd.f32 %v10261_v30, %v4695_v29  ;;  %v4940_v4 = vadd.f32 %v10310_v28, %v4855_v44  ;;  %v5858_v57 = vcombine.low %v5650_v47, %v5651_v0  ;;  %v6567_v24 = vpop.f32.mrf.mxu0  ;;  %v6020_v15 = vld [vmem:[%s9293_s24 + $0x20] sm:$0xff] (%p6859_p5)  ;;  %6019 = vst [vmem:[%s10456_s19 + $0x18] sm:$0xff] (%p6859_p5), %v6018_v41 }
 0x3f7   : > { %v5547_v31 = vsub.f32 %v5502_v16, %v11485_v7  ;;  %v5763_v63 = vcombine.low %v5741_v11, %v5748_v9  ;;  %v4870_v1 = vadd.f32 %v10341_v61, %v4785_v51  ;;  %v5030_v39 = vadd.f32 %v5029_v10, %v4945_v5  ;;  %v5124_v14 = vpop.f32.mrf.mxu1  ;;  %v11488_v16 = vld [vmem:[#allocation26_spill] sm:$0xff]  ;;  %6021 = vst [vmem:[%s10456_s19 + $0x20] sm:$0xff] (%p6859_p5), %v6020_v15 }
 0x3f8   : > { %v11486_v50 = vrot.slane %v10081_v26, 3  ;;  %v4865_v58 = vadd.f32 %v10326_v38, %v4780_v6  ;;  %v5025_v60 = vadd.f32 %v10354_v25, %v4940_v4  ;;  %v5755_v54 = vrot.slane %v5734_v55, %v9768_v17  ;;  %v5194_v11 = vpop.f32.mrf.mxu0  ;;  %v11489_v55 = vld [vmem:[#allocation25_spill] sm:$0xff] }
 0x3f9   : > { %v5562_v23 = vmul.f32 0.00083333335, %v5547_v31  ;;  %v5887_v30 = vcombine.low %v5865_v40, %v5872_v59  ;;  %v4955_v28 = vadd.f32 %v10352_v18, %v4870_v1  ;;  %v5115_v46 = vadd.f32 %v5114_v27, %v5030_v39  ;;  %v5126_v53 = vpop.f32.mrf.mxu1  ;;  %v6014_v1 = vld [vmem:[%s9293_s24 + $0x8] sm:$0xff] (%p6859_p5)  ;;  %v6016_v39 = vld [vmem:[%s9293_s24 + $0x10] sm:$0xff] (%p6859_p5) }
 0x3fa   : > { %v5637_v22 = vsub.f32 %v5592_v2, %v11486_v50  ;;  %v4950_v3 = vadd.f32 %v10343_v19, %v4865_v58  ;;  %v5110_v26 = vadd.f32 %v10373_v20, %v5025_v60  ;;  %v5879_v21 = vrot.slane %v5858_v57, %v9768_v17  ;;  %v6570_v19 = vpop.f32.mrf.mxu0  ;;  %v6024_v50 = vld [vmem:[%s9293_s24 + $0x30] sm:$0xff] (%p6859_p5)  ;;  %v6028_v58 = vld [vmem:[%s9293_s24 + $0x40] sm:$0xff] (%p6859_p5)  ;;  %6015 = vst [vmem:[%s10456_s19 + $0x8] sm:$0xff] (%p6859_p5), %v6014_v1  ;;  %v6030_v60 = vld [vmem:[%s9293_s24 + $0x48] sm:$0xff] (%p6859_p5) }
 0x3fb   : > { %v5762_v10 = vrot.slane %v5562_v23, %v9768_v17  ;;  %v5771_v38 = vrot.slane %v5763_v63, %v9768_v17  ;;  %v5040_v25 = vadd.f32 %v5039_v43, %v4955_v28  ;;  %v5200_v13 = vadd.f32 %v6567_v24, %v5115_v46  ;;  %v6012_v63 = vld [vmem:[%s9293_s24] sm:$0xff] (%p6859_p5)  ;;  %v6022_v23 = vld [vmem:[%s9293_s24 + $0x28] sm:$0xff] (%p6859_p5)  ;;  %6017 = vst [vmem:[%s10456_s19 + $0x10] sm:$0xff] (%p6859_p5), %v6016_v39  ;;  %v6042_v24 = vld [vmem:[%s9293_s24 + $0x78] sm:$0xff] (%p6859_p5) }
 0x3fc   : > { %v5652_v61 = vmul.f32 0.00083333335, %v5637_v22  ;;  %v5035_v33 = vadd.f32 %v5034_v8, %v4950_v3  ;;  %v5195_v40 = vadd.f32 %v5194_v11, %v5110_v26  ;;  %v5895_v56 = vrot.slane %v5887_v30, %v9768_v17  ;;  %v5204_v0 = vpop.f32.mrf.mxu0  ;;  %v6026_v22 = vld [vmem:[%s9293_s24 + $0x38] sm:$0xff] (%p6859_p5)  ;;  %6013 = vst [vmem:[%s10456_s19] sm:$0xff] (%p6859_p5), %v6012_v63  ;;  %6023 = vst [vmem:[%s10456_s19 + $0x28] sm:$0xff] (%p6859_p5), %v6022_v23  ;;  %v6036_v28 = vld [vmem:[%s9293_s24 + $0x60] sm:$0xff] (%p6859_p5) }
 0x3fd   : > { %v5764_v52 = vcombine.low %v5755_v54, %v5762_v10  ;;  %v5125_v42 = vadd.f32 %v5124_v14, %v5040_v25  ;;  %v11487_v62 = vlaneseq  ;;  %v5214_v48 = vmul.f32 0.016666668, %v5200_v13  ;;  %6025 = vst [vmem:[%s10456_s19 + $0x30] sm:$0xff] (%p6859_p5), %v6024_v50  ;;  %6027 = vst [vmem:[%s10456_s19 + $0x38] sm:$0xff] (%p6859_p5), %v6026_v22  ;;  %v6032_v54 = vld [vmem:[%s9293_s24 + $0x50] sm:$0xff] (%p6859_p5)  ;;  %v6034_v30 = vld [vmem:[%s9293_s24 + $0x58] sm:$0xff] (%p6859_p5) }
 0x3fe   : > { %v5886_v18 = vrot.slane %v5652_v61, %v9768_v17  ;;  %v5120_v27 = vadd.f32 %v5119_v35, %v5035_v33  ;;  %v5213_v47 = vmul.f32 0.016666668, %v5195_v40  ;;  %6029 = vst [vmem:[%s10456_s19 + $0x40] sm:$0xff] (%p6859_p5), %v6028_v58  ;;  %6031 = vst [vmem:[%s10456_s19 + $0x48] sm:$0xff] (%p6859_p5), %v6030_v60  ;;  %v6038_v46 = vld [vmem:[%s9293_s24 + $0x68] sm:$0xff] (%p6859_p5)  ;;  %v6040_v14 = vld [vmem:[%s9293_s24 + $0x70] sm:$0xff] (%p6859_p5) }
 0x3ff   : > { %v5778_v20 = vrot.slane %v5764_v52, %v9768_v17  ;;  %vm5787_vm7 = vcmp.lt.s32.totalorder %v11487_v62, 896  ;;  %v5210_v12 = vadd.f32 %v6570_v19, %v5125_v42  ;;  %6033 = vst [vmem:[%s10456_s19 + $0x50] sm:$0xff] (%p6859_p5), %v6032_v54  ;;  %6035 = vst [vmem:[%s10456_s19 + $0x58] sm:$0xff] (%p6859_p5), %v6034_v30  ;;  %v6044_v61 = vld [vmem:[%s9293_s24 + $0x80] sm:$0xff] (%p6859_p5)  ;;  %v6046_v10 = vld [vmem:[%s9293_s24 + $0x88] sm:$0xff] (%p6859_p5) }
 0x400   : > { %v5888_v36 = vcombine.low %v5879_v21, %v5886_v18  ;;  %v5205_v34 = vadd.f32 %v5204_v0, %v5120_v27  ;;  %6573 = vmatprep.mubr.msk.f32.mxu0 %vm3118_vm6, %v5213_v47  ;;  %6037 = vst [vmem:[%s10456_s19 + $0x60] sm:$0xff] (%p6859_p5), %v6036_v28  ;;  %6039 = vst [vmem:[%s10456_s19 + $0x68] sm:$0xff] (%p6859_p5), %v6038_v46  ;;  %v6048_v3 = vld [vmem:[%s9293_s24 + $0x90] sm:$0xff] (%p6859_p5)  ;;  %v6050_v26 = vld [vmem:[%s9293_s24 + $0x98] sm:$0xff] (%p6859_p5) }
 0x401   : > { %v5779_v8 = vcombine.low %v5771_v38, %v5778_v20  ;;  %6574 = vmatmul.mubr.msk.f32.vlgmr.msra.gmra.mxu0 %vm3118_vm6, %v5214_v48  ;;  %v5216_v37 = vmul.f32 0.016666668, %v5210_v12  ;;  %6041 = vst [vmem:[%s10456_s19 + $0x70] sm:$0xff] (%p6859_p5), %v6040_v14  ;;  %6043 = vst [vmem:[%s10456_s19 + $0xf0] sm:$0xff] (%p6859_p5), %v6042_v24  ;;  %v6052_v21 = vld [vmem:[%s9293_s24 + $0xa0] sm:$0xff] (%p6859_p5)  ;;  %v6054_v38 = vld [vmem:[%s9293_s24 + $0xa8] sm:$0xff] (%p6859_p5) }
 0x402   : > { %v5902_v9 = vrot.slane %v5888_v36, %v9768_v17  ;;  %v5215_v45 = vmul.f32 0.016666668, %v5205_v34  ;;  %v6737_v17 = vld [vmem:[%s10529_s7] sm:$0xf]  ;;  %6045 = vst [vmem:[%s10456_s19 + $0xf8] sm:$0xff] (%p6859_p5), %v6044_v61  ;;  %6047 = vst [vmem:[%s10456_s19 + $0x100] sm:$0xff] (%p6859_p5), %v6046_v10 }
 0x403   : > { %6472 = vst.msk [vmem:[%s9975_s15 + $0x42] ss:$8 sm:$0xf] %vm5787_vm7, %v5779_v8  ;;  %6473 = vst.msk [vmem:[%s9975_s15 + $0x42] ss:$8 sm:$0x70] %vm5787_vm7, %v5779_v8  ;;  %v5220_v49 = vrot.slane %v6737_v17, %v11488_v16  ;;  %v5328_v59 = vrot.slane %v6737_v17, %v11489_v55 }
 0x404   : > { %v5903_v32 = vcombine.low %v5895_v56, %v5902_v9  ;;  %6576 = vmatprep.mubr.msk.f32.mxu0 %vm3118_vm6, %v5215_v45  ;;  %6049 = vst [vmem:[%s10456_s19 + $0x108] sm:$0xff] (%p6859_p5), %v6048_v3  ;;  %6051 = vst [vmem:[%s10456_s19 + $0x110] sm:$0xff] (%p6859_p5), %v6050_v26  ;;  %v6056_v25 = vld [vmem:[%s9293_s24 + $0xb0] sm:$0xff] (%p6859_p5)  ;;  %v6058_v13 = vld [vmem:[%s9293_s24 + $0xb8] sm:$0xff] (%p6859_p5) }
 0x405   : > { %6577 = vmatmul.mubr.msk.f32.gmra.mxu0 %vm3118_vm6, %v5216_v37  ;;  %6053 = vst [vmem:[%s10456_s19 + $0x118] sm:$0xff] (%p6859_p5), %v6052_v21  ;;  %6055 = vst [vmem:[%s10456_s19 + $0x120] sm:$0xff] (%p6859_p5), %v6054_v38  ;;  %v6060_v11 = vld [vmem:[%s9293_s24 + $0xc0] sm:$0xff] (%p6859_p5)  ;;  %v6062_v53 = vld [vmem:[%s9293_s24 + $0xc8] sm:$0xff] (%p6859_p5) }
 0x406   : > { %6476 = vst.msk [vmem:[%s9975_s15 + $0x43] ss:$8 sm:$0xf] %vm5787_vm7, %v5903_v32  ;;  %6477 = vst.msk [vmem:[%s9975_s15 + $0x43] ss:$8 sm:$0x70] %vm5787_vm7, %v5903_v32  ;;  %s579_s15 = scalar_lea.vmem %s10531_s9, %s6219_s23 }
 0x407   : > { %6057 = vst [vmem:[%s10456_s19 + $0x128] sm:$0xff] (%p6859_p5), %v6056_v25  ;;  %6059 = vst [vmem:[%s10456_s19 + $0x130] sm:$0xff] (%p6859_p5), %v6058_v13  ;;  %v6064_v52 = vld [vmem:[%s9293_s24 + $0xd0] sm:$0xff] (%p6859_p5)  ;;  %v6066_v18 = vld [vmem:[%s9293_s24 + $0xd8] sm:$0xff] (%p6859_p5) }
 0x408   : > { %6061 = vst [vmem:[%s10456_s19 + $0x138] sm:$0xff] (%p6859_p5), %v6060_v11  ;;  %6063 = vst [vmem:[%s10456_s19 + $0x140] sm:$0xff] (%p6859_p5), %v6062_v53  ;;  %v6068_v33 = vld [vmem:[%s9293_s24 + $0xe0] sm:$0xff] (%p6859_p5)  ;;  %v6070_v40 = vld [vmem:[%s9293_s24 + $0xe8] sm:$0xff] (%p6859_p5) }
 0x409   : > { %6065 = vst [vmem:[%s10456_s19 + $0x148] sm:$0xff] (%p6859_p5), %v6064_v52  ;;  %6067 = vst [vmem:[%s10456_s19 + $0x150] sm:$0xff] (%p6859_p5), %v6066_v18 }
 0x40a   : > { %6069 = vst [vmem:[%s10456_s19 + $0x158] sm:$0xff] (%p6859_p5), %v6068_v33  ;;  %6071 = vst [vmem:[%s10456_s19 + $0x160] sm:$0xff] (%p6859_p5), %v6070_v40 }
 0x4c1   : > { %v6575_v29 = vpop.f32.mrf.mxu0 }
 0x4c2   : > { %v5312_v44 = vadd.f32 %v6575_v29, %v5220_v49 }
 0x4c3   : > { %v5306_v51 = vpop.f32.mrf.mxu0 }
 0x4c4   : > { %v5307_v5 = vadd.f32 %v5306_v51, %v5220_v49  ;;  %v5330_v7 = vmul.f32 %v5328_v59, %v5312_v44 }
 0x4c5   : > { %v6578_v43 = vpop.f32.mrf.mxu0 }
 0x4c6   : > { %v5329_v35 = vmul.f32 %v5328_v59, %v5307_v5  ;;  %v5322_v31 = vadd.f32 %v6578_v43, %v5220_v49  ;;  %5335 = vst.msk [vmem:[%s579_s15 + $0x8] sm:$0xff] %vm5333_vm2, %v5330_v7 }
 0x4c7   : > { %v5316_v2 = vpop.f32.mrf.mxu0 }
 0x4c8   : > { %5334 = vst.msk [vmem:[%s579_s15] sm:$0xff] %vm5333_vm2, %v5329_v35  ;;  %v5317_v6 = vadd.f32 %v5316_v2, %v5220_v49  ;;  %v5332_v57 = vmul.f32 %v5328_v59, %v5322_v31  ;;  %5996 = sbr.rel (!%p6859_p5) target bundleno = 1229 (0x4cd), region = 110 }
 0x4ca   : > { %v5331_v4 = vmul.f32 %v5328_v59, %v5317_v6  ;;  %5337 = vst.msk [vmem:[%s579_s15 + $0x18] sm:$0xff] %vm5333_vm2, %v5332_v57 }
 0x4cc   : > { %5336 = vst.msk [vmem:[%s579_s15 + $0x10] sm:$0xff] %vm5333_vm2, %v5331_v4 }
 0x4cd PF: > { %p18_p12 = scmp.ge.s32.totalorder %s6843_s17, 4   ;;  %s11490_s13 = smov %s6756_s14 }
 0x4ce   : > { %s11491_s14 = smov %s6853_s20  ;;  %s11492_s15 = smov %s6843_s17 }
 0x4cf   :  { %20 = sbr.rel (!%p18_p12) target bundleno = 2 (0x2), region = 195 }

</bundles_post_ra>
